<compile_context>
chip_gen: v5e
topology: v5e:2x2
jax: 0.10.0
libtpu: 0.0.40
codegen_flags: <defaults>
</compile_context>

<pallas_src>
import functools

import jax
import jax.numpy as jnp
from jax import lax
from jax.experimental import pallas as pl
from jax.experimental.pallas import tpu as pltpu

K = 5          # Conv1d kernel_size for both conv layers (from the module)
KPAD = 8       # conv1 tap dim padded to 8 for a clean MXU contraction


# ----------------------------------------------------------------------------
# Wrapper-side im2col for conv1, one block per (batch, time-tile).
# Row layout (residue-major):  row r*(T+2)+i, tap k  ==  x[4*T*t + 4*i + r + k]
# so that both maxpools reduce to unit-stride slice maxima inside the kernel.
# ----------------------------------------------------------------------------
def build_conv1_im2col(x_ncl, T, n_t):
    B2 = x_ncl.shape[0]
    x = x_ncl[:, 0, :]                                   # (B2, L)
    R = T + 2
    idx = ((4 * T) * jnp.arange(n_t)[:, None, None, None]      # tile offset
           + jnp.arange(4)[None, :, None, None]                # residue r
           + 4 * jnp.arange(R)[None, None, :, None]            # i
           + jnp.arange(K)[None, None, None, :])               # tap k
    cols = x[:, idx].reshape(B2, n_t, 4 * R, K)          # (B2, n_t, 4R, 5)
    pad = jnp.zeros((B2, n_t, 4 * R, KPAD - K), x.dtype)
    return jnp.concatenate([cols, pad], axis=-1)         # (B2, n_t, 4R, 8)


# ----------------------------------------------------------------------------
# Kernel 1: conv1 -> relu -> pool -> conv2 -> relu -> pool  for one time tile.
# ----------------------------------------------------------------------------
def conv_tower_kernel(x_ref, w1_ref, b1_ref, w2_ref, b2_ref, o_ref):
    # x_ref : (4*(T+2), 8) f32   im2col'd conv1 input (residue-major rows)
    # w1_ref: (8, 32)      f32   conv1 weights [tap_pad, out_ch]
    # b1_ref: (1, 32)      f32
    # w2_ref: (160, 64)    bf16  fused conv2 weights, rows ordered [tap, in_ch]
    # b2_ref: (1, 64)      f32
    # o_ref : (T, 64)      f32   pooled conv2 output (time-major)
    R = x_ref.shape[0] // 4            # = T + 2
    T = o_ref.shape[0]

    # conv1: one MXU matmul covering all 4 L1-residues at once, then ReLU.
    s1 = jnp.dot(x_ref[...], w1_ref[...], preferred_element_type=jnp.float32)
    s1 = jnp.maximum(s1 + b1_ref[...], 0.0)              # (4R, 32)

    # maxpool1(2): folded into the residue split -> pure VPU max.
    p1e = jnp.maximum(s1[0 * R:1 * R], s1[1 * R:2 * R])  # p1[2i]   (R, 32)
    p1o = jnp.maximum(s1[2 * R:3 * R], s1[3 * R:4 * R])  # p1[2i+1] (R, 32)

    w2 = w2_ref[...]
    b2 = b2_ref[...]

    # conv2 (even output rows): fused 5-tap im2col -> one (T,160)@(160,64) matmul.
    ze = jnp.concatenate([p1e[0:T], p1o[0:T], p1e[1:T + 1],
                          p1o[1:T + 1], p1e[2:T + 2]], axis=1)
    s2e = jnp.dot(ze.astype(jnp.bfloat16), w2,
                  preferred_element_type=jnp.float32)
    s2e = jnp.maximum(s2e + b2, 0.0)

    # conv2 (odd output rows).
    zo = jnp.concatenate([p1o[0:T], p1e[1:T + 1], p1o[1:T + 1],
                          p1e[2:T + 2], p1o[2:T + 2]], axis=1)
    s2o = jnp.dot(zo.astype(jnp.bfloat16), w2,
                  preferred_element_type=jnp.float32)
    s2o = jnp.maximum(s2o + b2, 0.0)

    # maxpool2(2): also just an even/odd VPU max.
    # (64-lane store is accepted here; channel count is 64 by construction.)
    o_ref[...] = jnp.maximum(s2e, s2o)


def conv_tower_pallas(x1, p, T, n_t, P2):
    B2, _, R4, Kp = x1.shape
    return pl.pallas_call(
        conv_tower_kernel,
        out_shape=jax.ShapeDtypeStruct((B2, P2, 64), jnp.float32),
        grid_spec=pltpu.PrefetchScalarGridSpec(
            num_scalar_prefetch=0,
            grid=(B2, n_t),
            in_specs=[
                pl.BlockSpec((pl.Squeezed(), pl.Squeezed(), R4, Kp),
                             lambda b, t: (b, t, 0, 0)),
                pl.BlockSpec((Kp, 32), lambda b, t: (0, 0)),
                pl.BlockSpec((1, 32), lambda b, t: (0, 0)),
                pl.BlockSpec((K * 32, 64), lambda b, t: (0, 0)),
                pl.BlockSpec((1, 64), lambda b, t: (0, 0)),
            ],
            out_specs=pl.BlockSpec((pl.Squeezed(), T, 64),
                                   lambda b, t: (b, t, 0)),
        ),
        compiler_params=pltpu.CompilerParams(
            dimension_semantics=("parallel", "parallel"),   # megacore splits batch/tiles
            vmem_limit_bytes=32 * 1024 * 1024,
        ),
    )(x1, p["w1"], p["b1"], p["w2"], p["b2"])


# ----------------------------------------------------------------------------
# Kernel 2: fc1 -> relu -> fc2, streaming fc1's weight over the Din reduction.
# ----------------------------------------------------------------------------
def mlp_kernel(x_ref, w1_ref, b1_ref, w2_ref, b2_ref, o_ref, acc_ref):
    k = pl.program_id(0)

    @pl.when(k == 0)
    def _():
        acc_ref[...] = jnp.zeros_like(acc_ref)

    acc_ref[...] += jnp.dot(x_ref[...].astype(jnp.bfloat16), w1_ref[...],
                            preferred_element_type=jnp.float32)

    @pl.when(k == pl.num_programs(0) - 1)
    def _():
        h = jnp.maximum(acc_ref[...] + b1_ref[...], 0.0)
        o_ref[...] = (jnp.dot(h.astype(jnp.bfloat16), w2_ref[...],
                              preferred_element_type=jnp.float32)
                      + b2_ref[...])


def mlp_pallas(flat, p, tk):
    B2, Din = flat.shape
    H = p["fw1"].shape[1]
    Dout = p["fw2"].shape[1]
    tk = min(tk, Din)
    assert Din % tk == 0  # TODO(synk): pad Din to a tk multiple for ragged sizes
    return pl.pallas_call(
        mlp_kernel,
        out_shape=jax.ShapeDtypeStruct((B2, Dout), jnp.float32),
        grid_spec=pltpu.PrefetchScalarGridSpec(
            num_scalar_prefetch=0,
            grid=(Din // tk,),
            in_specs=[
                pl.BlockSpec((B2, tk), lambda k: (0, k)),
                pl.BlockSpec((tk, H), lambda k: (k, 0)),   # streamed bf16 weight tile
                pl.BlockSpec((1, H), lambda k: (0, 0)),
                pl.BlockSpec((H, Dout), lambda k: (0, 0)),
                pl.BlockSpec((1, Dout), lambda k: (0, 0)),
            ],
            out_specs=pl.BlockSpec((B2, Dout), lambda k: (0, 0)),
            scratch_shapes=[pltpu.VMEM((B2, H), jnp.float32)],  # f32 accumulator
        ),
        compiler_params=pltpu.CompilerParams(
            dimension_semantics=("arbitrary",),     # reduction axis
            vmem_limit_bytes=32 * 1024 * 1024,
        ),
    )(flat, p["fw1"], p["fb1"], p["fw2"], p["fb2"])


# ----------------------------------------------------------------------------
# Full Siamese forward (both branches share weights -> one stacked batch).
# ----------------------------------------------------------------------------
def siamese_forward(prepared, input1, input2, *, T=64, tk=2048):
    B = input1.shape[0]
    x = jnp.concatenate([input1, input2], axis=0)            # (2B, 1, L)
    L = x.shape[-1]
    P2 = ((L - (K - 1)) // 2 - (K - 1)) // 2
    # TODO(synk): pad the tail time-tile when P2 % T != 0 (needed for L=160000).
    assert P2 % T == 0
    n_t = P2 // T

    x1 = build_conv1_im2col(x, T, n_t)                       # (2B, n_t, 4(T+2), 8)
    conv_out = conv_tower_pallas(x1, prepared, T, n_t, P2)   # (2B, P2, 64)
    # Free reshape: fc1 weight rows were permuted at init so this time-major
    # flatten matches torch's channel-major x.view(B, -1) -- no HBM transpose.
    flat = conv_out.reshape(2 * B, P2 * 64)
    out = mlp_pallas(flat, prepared, tk)
    return out[:B], out[B:]


# ----------------------------------------------------------------------------
# Parameters: PyTorch-style init (torch layout), plus a one-time kernel-ready
# preparation step (bf16 casts, conv2 tap fusion, fc1 row permutation).
# ----------------------------------------------------------------------------
def init_params(key, L):
    P2 = ((L - (K - 1)) // 2 - (K - 1)) // 2
    fc1_in = 64 * P2   # == SiameseNetwork._get_fc1_input_size() formula for length L
    ks = jax.random.split(key, 8)

    def u(k, shape, fan_in):
        bound = 1.0 / float(fan_in) ** 0.5
        return jax.random.uniform(k, shape, jnp.float32, -bound, bound)

    return {
        "w1": u(ks[0], (32, 1, K), 1 * K),        # torch Conv1d weight layout (O, I, K)
        "b1": u(ks[1], (32,), 1 * K),
        "w2": u(ks[2], (64, 32, K), 32 * K),
        "b2": u(ks[3], (64,), 32 * K),
        "fw1": u(ks[4], (fc1_in, 256), fc1_in),   # = torch fc1.weight.T (channel-major rows)
        "fb1": u(ks[5], (256,), fc1_in),
        "fw2": u(ks[6], (256, 128), 256),         # = torch fc2.weight.T
        "fb2": u(ks[7], (128,), 256),
    }


def prepare_params(params, P2):
    # conv1: (O,1,K) -> (K,O), padded to 8 taps.
    w1r = jnp.zeros((KPAD, 32), jnp.float32)
    w1r = w1r.at[:K, :].set(jnp.transpose(params["w1"][:, 0, :], (1, 0)))
    # conv2: (O,I,K) -> fused (K*I, O) so the 5 taps become one matmul. bf16.
    w2f = jnp.transpose(params["w2"], (2, 1, 0)).reshape(K * 32, 64).astype(jnp.bfloat16)
    # fc1: permute rows from channel-major (c*P2 + t) to time-major (t*64 + c)
    # so the kernel-side flatten needs no transpose.  bf16 halves HBM bytes.
    fw1p = (params["fw1"].reshape(64, P2, 256).transpose(1, 0, 2)
            .reshape(P2 * 64, 256).astype(jnp.bfloat16))
    return {
        "w1": w1r,
        "b1": params["b1"].reshape(1, -1),
        "w2": w2f,
        "b2": params["b2"].reshape(1, -1),
        "fw1": fw1p,
        "fb1": params["fb1"].reshape(1, -1),
        "fw2": params["fw2"].astype(jnp.bfloat16),
        "fb2": params["fb2"].reshape(1, -1),
    }


# ----------------------------------------------------------------------------
# Pure-JAX reference (mirrors the PyTorch forward) for the correctness check.
# ----------------------------------------------------------------------------
def reference_forward_one(params, x_ncl):
    y = lax.conv_general_dilated(x_ncl, params["w1"], (1,), "VALID",
                                 dimension_numbers=("NCH", "OIH", "NCH"))
    y = jnp.maximum(y + params["b1"][None, :, None], 0.0)
    y = lax.reduce_window(y, -jnp.inf, lax.max, (1, 1, 2), (1, 1, 2), "VALID")
    z = lax.conv_general_dilated(y, params["w2"], (1,), "VALID",
                                 dimension_numbers=("NCH", "OIH", "NCH"))
    z = jnp.maximum(z + params["b2"][None, :, None], 0.0)
    z = lax.reduce_window(z, -jnp.inf, lax.max, (1, 1, 2), (1, 1, 2), "VALID")
    flat = z.reshape(z.shape[0], -1)                       # channel-major flatten
    h = jnp.maximum(flat @ params["fw1"] + params["fb1"], 0.0)
    return h @ params["fw2"] + params["fb2"]


if __name__ == "__main__":
    # Small test: 2 time tiles of T=64 pooled rows -> L = 4*128 + 12 = 524,
    # fc1_input_size = 64 * 128 = 8192, streamed over the MLP grid in 4 chunks.
    T_TILE = 64           # production: pick the largest tile fitting scoped VMEM
    N_TILES = 2
    L = 4 * T_TILE * N_TILES + 12
    B = 2

    key = jax.random.PRNGKey(0)
    k_params, k_x1, k_x2 = jax.random.split(key, 3)

    params = init_params(k_params, L)
    P2 = ((L - (K - 1)) // 2 - (K - 1)) // 2
    prepared = prepare_params(params, P2)     # one-time weight prep (outside jit)

    input1 = jax.random.normal(k_x1, (B, 1, L), jnp.float32)
    input2 = jax.random.normal(k_x2, (B, 1, L), jnp.float32)

    fwd = jax.jit(functools.partial(siamese_forward, T=T_TILE, tk=2048))
    out1, out2 = fwd(prepared, input1, input2)
    jax.block_until_ready((out1, out2))

    ref1 = reference_forward_one(params, input1)
    ref2 = reference_forward_one(params, input2)

    assert out1.shape == (B, 128) and out2.shape == (B, 128)
    assert jnp.allclose(out1, ref1, rtol=1e-2, atol=1e-2)
    assert jnp.allclose(out2, ref2, rtol=1e-2, atol=1e-2)

    print("KERNEL_OK")
</pallas_src>

<mosaic_0001>
module attributes {stable_mosaic.version = 11 : i64} {
  func.func @conv_tower_kernel(%arg0: i32, %arg1: i32, %arg2: memref<1x1x264x8xf32, #tpu.memory_space<vmem>>, %arg3: memref<8x32xf32, #tpu.memory_space<vmem>>, %arg4: memref<1x32xf32, #tpu.memory_space<vmem>>, %arg5: memref<160x64xbf16, #tpu.memory_space<vmem>>, %arg6: memref<1x64xf32, #tpu.memory_space<vmem>>, %arg7: memref<1x64x64xf32, #tpu.memory_space<vmem>>) attributes {dimension_semantics = [#tpu.dimension_semantics<parallel>, #tpu.dimension_semantics<parallel>], iteration_bounds = array<i64: 4, 2>, scalar_prefetch = 0 : i64, scratch_operands = 0 : i64, tpu.core_type = #tpu.core_type<tc>, window_params = [{transform_indices = @transform_0, window_bounds = array<i64: 1, 1, 264, 8>}, {pipeline_mode = #tpu.pipeline_mode<synchronous>, transform_indices = @transform_1, window_bounds = array<i64: 8, 32>}, {pipeline_mode = #tpu.pipeline_mode<synchronous>, transform_indices = @transform_2, window_bounds = array<i64: 1, 32>}, {pipeline_mode = #tpu.pipeline_mode<synchronous>, transform_indices = @transform_3, window_bounds = array<i64: 160, 64>}, {pipeline_mode = #tpu.pipeline_mode<synchronous>, transform_indices = @transform_4, window_bounds = array<i64: 1, 64>}, {transform_indices = @transform_5, window_bounds = array<i64: 1, 64, 64>}]} {
    %c0 = arith.constant 0 : index
    %c0_0 = arith.constant 0 : index
    %c0_1 = arith.constant 0 : index
    %c0_2 = arith.constant 0 : index
    %0 = vector.load %arg2[%c0, %c0_0, %c0_1, %c0_2] : memref<1x1x264x8xf32, #tpu.memory_space<vmem>>, vector<1x1x264x8xf32>
    %1 = vector.shape_cast %0 : vector<1x1x264x8xf32> to vector<264x8xf32>
    %c0_3 = arith.constant 0 : index
    %c0_4 = arith.constant 0 : index
    %2 = vector.load %arg3[%c0_3, %c0_4] : memref<8x32xf32, #tpu.memory_space<vmem>>, vector<8x32xf32>
    %cst = arith.constant dense<0.000000e+00> : vector<264x32xf32>
    %3 = tpu.matmul %1, %2, %cst {dimension_numbers = #tpu.dot_dimension_numbers<[1], [0], [0], [1], [0, 0, 1, 1], [], []>} : vector<264x8xf32>, vector<8x32xf32>, vector<264x32xf32> -> vector<264x32xf32>
    %c0_5 = arith.constant 0 : index
    %c0_6 = arith.constant 0 : index
    %4 = vector.load %arg4[%c0_5, %c0_6] : memref<1x32xf32, #tpu.memory_space<vmem>>, vector<1x32xf32>
    %5 = vector.broadcast %4 : vector<1x32xf32> to vector<264x32xf32>
    %6 = arith.addf %3, %5 : vector<264x32xf32>
    %cst_7 = arith.constant 0.000000e+00 : f32
    %7 = vector.broadcast %cst_7 : f32 to vector<264x32xf32>
    %8 = arith.maximumf %6, %7 : vector<264x32xf32>
    %9 = vector.extract_strided_slice %8 {offsets = [0, 0], sizes = [66, 32], strides = [1, 1]} : vector<264x32xf32> to vector<66x32xf32>
    %10 = vector.extract_strided_slice %8 {offsets = [66, 0], sizes = [66, 32], strides = [1, 1]} : vector<264x32xf32> to vector<66x32xf32>
    %11 = arith.maximumf %9, %10 : vector<66x32xf32>
    %12 = vector.extract_strided_slice %8 {offsets = [132, 0], sizes = [66, 32], strides = [1, 1]} : vector<264x32xf32> to vector<66x32xf32>
    %13 = vector.extract_strided_slice %8 {offsets = [198, 0], sizes = [66, 32], strides = [1, 1]} : vector<264x32xf32> to vector<66x32xf32>
    %14 = arith.maximumf %12, %13 : vector<66x32xf32>
    %c0_8 = arith.constant 0 : index
    %c0_9 = arith.constant 0 : index
    %15 = vector.load %arg5[%c0_8, %c0_9] : memref<160x64xbf16, #tpu.memory_space<vmem>>, vector<160x64xbf16>
    %c0_10 = arith.constant 0 : index
    %c0_11 = arith.constant 0 : index
    %16 = vector.load %arg6[%c0_10, %c0_11] : memref<1x64xf32, #tpu.memory_space<vmem>>, vector<1x64xf32>
    %17 = vector.extract_strided_slice %11 {offsets = [0, 0], sizes = [64, 32], strides = [1, 1]} : vector<66x32xf32> to vector<64x32xf32>
    %18 = vector.extract_strided_slice %14 {offsets = [0, 0], sizes = [64, 32], strides = [1, 1]} : vector<66x32xf32> to vector<64x32xf32>
    %19 = vector.extract_strided_slice %11 {offsets = [1, 0], sizes = [64, 32], strides = [1, 1]} : vector<66x32xf32> to vector<64x32xf32>
    %20 = vector.extract_strided_slice %14 {offsets = [1, 0], sizes = [64, 32], strides = [1, 1]} : vector<66x32xf32> to vector<64x32xf32>
    %21 = vector.extract_strided_slice %11 {offsets = [2, 0], sizes = [64, 32], strides = [1, 1]} : vector<66x32xf32> to vector<64x32xf32>
    %22 = tpu.concatenate %17, %18, %19, %20, %21 in 1 : vector<64x32xf32>, vector<64x32xf32>, vector<64x32xf32>, vector<64x32xf32>, vector<64x32xf32> -> vector<64x160xf32>
    %23 = arith.truncf %22 : vector<64x160xf32> to vector<64x160xbf16>
    %cst_12 = arith.constant dense<0.000000e+00> : vector<64x64xf32>
    %24 = tpu.matmul %23, %15, %cst_12 {dimension_numbers = #tpu.dot_dimension_numbers<[1], [0], [0], [1], [0, 0, 1, 1], [], []>} : vector<64x160xbf16>, vector<160x64xbf16>, vector<64x64xf32> -> vector<64x64xf32>
    %25 = vector.broadcast %16 : vector<1x64xf32> to vector<64x64xf32>
    %26 = arith.addf %24, %25 : vector<64x64xf32>
    %cst_13 = arith.constant 0.000000e+00 : f32
    %27 = vector.broadcast %cst_13 : f32 to vector<64x64xf32>
    %28 = arith.maximumf %26, %27 : vector<64x64xf32>
    %29 = vector.extract_strided_slice %14 {offsets = [0, 0], sizes = [64, 32], strides = [1, 1]} : vector<66x32xf32> to vector<64x32xf32>
    %30 = vector.extract_strided_slice %11 {offsets = [1, 0], sizes = [64, 32], strides = [1, 1]} : vector<66x32xf32> to vector<64x32xf32>
    %31 = vector.extract_strided_slice %14 {offsets = [1, 0], sizes = [64, 32], strides = [1, 1]} : vector<66x32xf32> to vector<64x32xf32>
    %32 = vector.extract_strided_slice %11 {offsets = [2, 0], sizes = [64, 32], strides = [1, 1]} : vector<66x32xf32> to vector<64x32xf32>
    %33 = vector.extract_strided_slice %14 {offsets = [2, 0], sizes = [64, 32], strides = [1, 1]} : vector<66x32xf32> to vector<64x32xf32>
    %34 = tpu.concatenate %29, %30, %31, %32, %33 in 1 : vector<64x32xf32>, vector<64x32xf32>, vector<64x32xf32>, vector<64x32xf32>, vector<64x32xf32> -> vector<64x160xf32>
    %35 = arith.truncf %34 : vector<64x160xf32> to vector<64x160xbf16>
    %cst_14 = arith.constant dense<0.000000e+00> : vector<64x64xf32>
    %36 = tpu.matmul %35, %15, %cst_14 {dimension_numbers = #tpu.dot_dimension_numbers<[1], [0], [0], [1], [0, 0, 1, 1], [], []>} : vector<64x160xbf16>, vector<160x64xbf16>, vector<64x64xf32> -> vector<64x64xf32>
    %37 = vector.broadcast %16 : vector<1x64xf32> to vector<64x64xf32>
    %38 = arith.addf %36, %37 : vector<64x64xf32>
    %cst_15 = arith.constant 0.000000e+00 : f32
    %39 = vector.broadcast %cst_15 : f32 to vector<64x64xf32>
    %40 = arith.maximumf %38, %39 : vector<64x64xf32>
    %41 = arith.maximumf %28, %40 : vector<64x64xf32>
    %c0_16 = arith.constant 0 : index
    %c0_17 = arith.constant 0 : index
    %c0_18 = arith.constant 0 : index
    %42 = vector.load %arg7[%c0_16, %c0_17, %c0_18] : memref<1x64x64xf32, #tpu.memory_space<vmem>>, vector<1x64x64xf32>
    %43 = vector.shape_cast %42 : vector<1x64x64xf32> to vector<64x64xf32>
    %44 = vector.shape_cast %41 : vector<64x64xf32> to vector<1x64x64xf32>
    tpu.vector_store %arg7[%c0_16, %c0_17, %c0_18], %44 {strides = array<i32>} : memref<1x64x64xf32, #tpu.memory_space<vmem>>, vector<1x64x64xf32>,
    return
  }
  func.func @transform_0(%arg0: i32, %arg1: i32) -> (i32, i32, i32, i32) {
    %c0_i32 = arith.constant 0 : i32
    %c0_i32_0 = arith.constant 0 : i32
    %c0_i32_1 = arith.constant 0 : i32
    return %arg0, %arg1, %c0_i32, %c0_i32_0 : i32, i32, i32, i32
  }
  func.func @transform_1(%arg0: i32, %arg1: i32) -> (i32, i32) {
    %c0_i32 = arith.constant 0 : i32
    %c0_i32_0 = arith.constant 0 : i32
    %c0_i32_1 = arith.constant 0 : i32
    return %c0_i32, %c0_i32_0 : i32, i32
  }
  func.func @transform_2(%arg0: i32, %arg1: i32) -> (i32, i32) {
    %c0_i32 = arith.constant 0 : i32
    %c0_i32_0 = arith.constant 0 : i32
    %c0_i32_1 = arith.constant 0 : i32
    return %c0_i32, %c0_i32_0 : i32, i32
  }
  func.func @transform_3(%arg0: i32, %arg1: i32) -> (i32, i32) {
    %c0_i32 = arith.constant 0 : i32
    %c0_i32_0 = arith.constant 0 : i32
    %c0_i32_1 = arith.constant 0 : i32
    return %c0_i32, %c0_i32_0 : i32, i32
  }
  func.func @transform_4(%arg0: i32, %arg1: i32) -> (i32, i32) {
    %c0_i32 = arith.constant 0 : i32
    %c0_i32_0 = arith.constant 0 : i32
    %c0_i32_1 = arith.constant 0 : i32
    return %c0_i32, %c0_i32_0 : i32, i32
  }
  func.func @transform_5(%arg0: i32, %arg1: i32) -> (i32, i32, i32) {
    %c0_i32 = arith.constant 0 : i32
    %c0_i32_0 = arith.constant 0 : i32
    return %arg0, %arg1, %c0_i32 : i32, i32, i32
  }
}

module attributes {stable_mosaic.version = 11 : i64} {
  func.func @mlp_kernel(%arg0: i32, %arg1: memref<4x2048xf32, #tpu.memory_space<vmem>>, %arg2: memref<2048x256xbf16, #tpu.memory_space<vmem>>, %arg3: memref<1x256xf32, #tpu.memory_space<vmem>>, %arg4: memref<256x128xbf16, #tpu.memory_space<vmem>>, %arg5: memref<1x128xf32, #tpu.memory_space<vmem>>, %arg6: memref<4x128xf32, #tpu.memory_space<vmem>>, %arg7: memref<4x256xf32, #tpu.memory_space<vmem>>) attributes {dimension_semantics = [#tpu.dimension_semantics<arbitrary>], iteration_bounds = array<i64: 4>, scalar_prefetch = 0 : i64, scratch_operands = 1 : i64, tpu.core_type = #tpu.core_type<tc>, window_params = [{transform_indices = @transform_0, window_bounds = array<i64: 4, 2048>}, {transform_indices = @transform_1, window_bounds = array<i64: 2048, 256>}, {pipeline_mode = #tpu.pipeline_mode<synchronous>, transform_indices = @transform_2, window_bounds = array<i64: 1, 256>}, {pipeline_mode = #tpu.pipeline_mode<synchronous>, transform_indices = @transform_3, window_bounds = array<i64: 256, 128>}, {pipeline_mode = #tpu.pipeline_mode<synchronous>, transform_indices = @transform_4, window_bounds = array<i64: 1, 128>}, {pipeline_mode = #tpu.pipeline_mode<synchronous>, transform_indices = @transform_5, window_bounds = array<i64: 4, 128>}]} {
    %c0_i32 = arith.constant 0 : i32
    %0 = arith.cmpi eq, %arg0, %c0_i32 : i32
    %1 = arith.extui %0 : i1 to i32
    %c0_i32_0 = arith.constant 0 : i32
    %2 = arith.cmpi ne, %1, %c0_i32_0 : i32
    scf.if %2 {
      %cst_9 = arith.constant 0.000000e+00 : f32
      %13 = vector.broadcast %cst_9 : f32 to vector<4x256xf32>
      %c0_10 = arith.constant 0 : index
      %c0_11 = arith.constant 0 : index
      %14 = vector.load %arg7[%c0_10, %c0_11] : memref<4x256xf32, #tpu.memory_space<vmem>>, vector<4x256xf32>
      tpu.vector_store %arg7[%c0_10, %c0_11], %13 {strides = array<i32>} : memref<4x256xf32, #tpu.memory_space<vmem>>, vector<4x256xf32>,
    } else {
    }
    %c0 = arith.constant 0 : index
    %c0_1 = arith.constant 0 : index
    %3 = vector.load %arg7[%c0, %c0_1] : memref<4x256xf32, #tpu.memory_space<vmem>>, vector<4x256xf32>
    %c0_2 = arith.constant 0 : index
    %c0_3 = arith.constant 0 : index
    %4 = vector.load %arg1[%c0_2, %c0_3] : memref<4x2048xf32, #tpu.memory_space<vmem>>, vector<4x2048xf32>
    %5 = arith.truncf %4 : vector<4x2048xf32> to vector<4x2048xbf16>
    %c0_4 = arith.constant 0 : index
    %c0_5 = arith.constant 0 : index
    %6 = vector.load %arg2[%c0_4, %c0_5] : memref<2048x256xbf16, #tpu.memory_space<vmem>>, vector<2048x256xbf16>
    %cst = arith.constant dense<0.000000e+00> : vector<4x256xf32>
    %7 = tpu.matmul %5, %6, %cst {dimension_numbers = #tpu.dot_dimension_numbers<[1], [0], [0], [1], [0, 0, 1, 1], [], []>} : vector<4x2048xbf16>, vector<2048x256xbf16>, vector<4x256xf32> -> vector<4x256xf32>
    %8 = arith.addf %3, %7 : vector<4x256xf32>
    %c0_6 = arith.constant 0 : index
    %c0_7 = arith.constant 0 : index
    %9 = vector.load %arg7[%c0_6, %c0_7] : memref<4x256xf32, #tpu.memory_space<vmem>>, vector<4x256xf32>
    tpu.vector_store %arg7[%c0_6, %c0_7], %8 {strides = array<i32>} : memref<4x256xf32, #tpu.memory_space<vmem>>, vector<4x256xf32>,
    %c3_i32 = arith.constant 3 : i32
    %10 = arith.cmpi eq, %arg0, %c3_i32 : i32
    %11 = arith.extui %10 : i1 to i32
    %c0_i32_8 = arith.constant 0 : i32
    %12 = arith.cmpi ne, %11, %c0_i32_8 : i32
    scf.if %12 {
      %c0_9 = arith.constant 0 : index
      %c0_10 = arith.constant 0 : index
      %13 = vector.load %arg7[%c0_9, %c0_10] : memref<4x256xf32, #tpu.memory_space<vmem>>, vector<4x256xf32>
      %c0_11 = arith.constant 0 : index
      %c0_12 = arith.constant 0 : index
      %14 = vector.load %arg3[%c0_11, %c0_12] : memref<1x256xf32, #tpu.memory_space<vmem>>, vector<1x256xf32>
      %15 = vector.broadcast %14 : vector<1x256xf32> to vector<4x256xf32>
      %16 = arith.addf %13, %15 : vector<4x256xf32>
      %cst_13 = arith.constant 0.000000e+00 : f32
      %17 = vector.broadcast %cst_13 : f32 to vector<4x256xf32>
      %18 = arith.maximumf %16, %17 : vector<4x256xf32>
      %19 = arith.truncf %18 : vector<4x256xf32> to vector<4x256xbf16>
      %c0_14 = arith.constant 0 : index
      %c0_15 = arith.constant 0 : index
      %20 = vector.load %arg4[%c0_14, %c0_15] : memref<256x128xbf16, #tpu.memory_space<vmem>>, vector<256x128xbf16>
      %cst_16 = arith.constant dense<0.000000e+00> : vector<4x128xf32>
      %21 = tpu.matmul %19, %20, %cst_16 {dimension_numbers = #tpu.dot_dimension_numbers<[1], [0], [0], [1], [0, 0, 1, 1], [], []>} : vector<4x256xbf16>, vector<256x128xbf16>, vector<4x128xf32> -> vector<4x128xf32>
      %c0_17 = arith.constant 0 : index
      %c0_18 = arith.constant 0 : index
      %22 = vector.load %arg5[%c0_17, %c0_18] : memref<1x128xf32, #tpu.memory_space<vmem>>, vector<1x128xf32>
      %23 = vector.broadcast %22 : vector<1x128xf32> to vector<4x128xf32>
      %24 = arith.addf %21, %23 : vector<4x128xf32>
      %c0_19 = arith.constant 0 : index
      %c0_20 = arith.constant 0 : index
      %25 = vector.load %arg6[%c0_19, %c0_20] : memref<4x128xf32, #tpu.memory_space<vmem>>, vector<4x128xf32>
      tpu.vector_store %arg6[%c0_19, %c0_20], %24 {strides = array<i32>} : memref<4x128xf32, #tpu.memory_space<vmem>>, vector<4x128xf32>,
    } else {
    }
    return
  }
  func.func @transform_0(%arg0: i32) -> (i32, i32) {
    %c0_i32 = arith.constant 0 : i32
    %c0_i32_0 = arith.constant 0 : i32
    return %c0_i32, %arg0 : i32, i32
  }
  func.func @transform_1(%arg0: i32) -> (i32, i32) {
    %c0_i32 = arith.constant 0 : i32
    %c0_i32_0 = arith.constant 0 : i32
    return %arg0, %c0_i32 : i32, i32
  }
  func.func @transform_2(%arg0: i32) -> (i32, i32) {
    %c0_i32 = arith.constant 0 : i32
    %c0_i32_0 = arith.constant 0 : i32
    %c0_i32_1 = arith.constant 0 : i32
    return %c0_i32, %c0_i32_0 : i32, i32
  }
  func.func @transform_3(%arg0: i32) -> (i32, i32) {
    %c0_i32 = arith.constant 0 : i32
    %c0_i32_0 = arith.constant 0 : i32
    %c0_i32_1 = arith.constant 0 : i32
    return %c0_i32, %c0_i32_0 : i32, i32
  }
  func.func @transform_4(%arg0: i32) -> (i32, i32) {
    %c0_i32 = arith.constant 0 : i32
    %c0_i32_0 = arith.constant 0 : i32
    %c0_i32_1 = arith.constant 0 : i32
    return %c0_i32, %c0_i32_0 : i32, i32
  }
  func.func @transform_5(%arg0: i32) -> (i32, i32) {
    %c0_i32 = arith.constant 0 : i32
    %c0_i32_0 = arith.constant 0 : i32
    %c0_i32_1 = arith.constant 0 : i32
    return %c0_i32, %c0_i32_0 : i32, i32
  }
}

</mosaic_0001>

<bundles_post_ra>
// kernel: siamese_forward.2
= control target key start
LH: loop header
LB: loop body
LE: loop exit
PB: predicated region body
PF: predicated region fallthrough
CT: control target
= control target key end

     0   :  { %s1765_s18 = smov 0   ;;  %s1767_s19 = smov 0   ;;  %s2433_s0 = inlined_call_operand.vmem [shape: f32[4,2,264,8], index: 0, kind: input, shape index: {}]   ;;  %s2434_s1 = inlined_call_operand.vmem [shape: f32[8,32], index: 1, kind: input, shape index: {}]   ;;  %s2435_s2 = inlined_call_operand.vmem [shape: f32[1,32], index: 2, kind: input, shape index: {}]   ;;  %s2436_s3 = inlined_call_operand.vmem [shape: bf16[160,64], index: 3, kind: input, shape index: {}]   ;;  %s2437_s4 = inlined_call_operand.vmem [shape: f32[1,64], index: 4, kind: input, shape index: {}]   ;;  %s2438_s5 = inlined_call_operand.vmem [shape: f32[4,128,64], index: 5, kind: output, shape index: {}]  }
   0x1   :  { %s1769_s20 = smov 0   ;;  %s1771_s21 = smov 0  }
   0x2   :  { %s1773_s22 = smov 0  }
   0x3 LB: > { %s24_s23 = sadd.s32 1, %s1722_s20  ;;  %s27_s24 = sadd.s32 1, %s1726_s21  ;;  %s1730_s22 = sphi %s1773_s22, %s15_s22   ;;  %s1726_s21 = sphi %s1771_s21, %s2442_s21   ;;  %s1722_s20 = sphi %s1769_s20, %s2441_s20   ;;  %s1718_s19 = sphi %s1767_s19, %s2440_s19   ;;  %s1714_s18 = sphi %s1765_s18, %s2439_s18  }
   0x4   : > { %p25_p0 = scmp.ge.s32.totalorder %s24_s23, 2  ;;  %p1425_p1 = scmp.ge.s32.totalorder %s1730_s22, 1 }
   0x5   : > { %p207_p2 = scmp.lt.s32.totalorder %s1730_s22, 9 }
   0x6   : > { %s2444_s23 = smov (%p25_p0, %s24_s23), 0  ;;  %s2446_s24 = smov (!%p25_p0, %s27_s24), %s1726_s21 }
   0x7   : > { %p208_p3 = pnand %p1425_p1, %p207_p2  ;;  %p29_p4 = scmp.ge.s32.totalorder %s2446_s24, 4 }
   0x8   : > { %p243_p5 = scmp.lt.s32.totalorder (!%p208_p3), %s1718_s19, 3  ;;  %p245_p6 = scmp.lt.s32.totalorder (!%p208_p3), %s1714_s18, 1 }
   0x9   : > { %s2448_s24 = smov (%p29_p4, %s2446_s24), 0  ;;  %211 = sbr.rel (%p208_p3) target bundleno = 617 (0x269), region = 40 }
   0xa   : > { %s1732_s16 = smov (!%p208_p3), 64   ;;  %s1733_s17 = smov (!%p208_p3), 96  }
   0xb   : > { %s1734_s25 = smov (!%p208_p3), 32  }
   0xe   : > { %v296_v0 = vld [vmem:[%s2434_s1] sm:$0xff]  ;;  %s2450_s19 = smov (!%p243_p5, %s1718_s19), 3  ;;  %vm301_vm0 = vcmask 64512   ;;  %vm559_vm1 = vcmask 1045504   ;;  %vm720_vm2 = vcmask 1046528   ;;  %vm1093_vm3 = vcmask 1041408  }
   0xf   : > { %416 = vmatpush.msra.mxu0 %v296_v0  ;;  %1523 = vmatpush.msra.mxu1 %v296_v0  ;;  %s246_s27 = scalar_select %p245_p6, %s1714_s18, 1  ;;  %v1887_v45 = vld [vmem:[%s2435_s2] ss:$0 sm:$0xff]  ;;  %vm762_vm4 = vcmask 1042432   ;;  %vm829_vm5 = vcmask 261120   ;;  %vm669_vm6 = vcmask 1043456  }
  0x10   : > { %1524 = vmatpush.msra.mxu3 %v296_v0  ;;  %s1526_s28 = smul.u32 66, %s2450_s19  ;;  %vm838_vm7 = vcmask 523264   ;;  %vm847_vm8 = vcmask 785408  }
  0x11   : > { %s1525_s29 = smul.u32 33, %s246_s27  ;;  %s1428_s27 = sshll.u32 %s2450_s19, 4 }
  0x13   : > { %s249_s30 = sadd.s32 %s1526_s28, %s1525_s29 }
  0x14   : > { %s1426_s6 = sshll.u32 %s249_s30, 3 }
  0x15   : > { %s1808_s9 = scalar_lea.vmem %s2433_s0, %s1426_s6 }
  0x16   : > { %v263_v1 = vld [vmem:[%s1808_s9] sm:$0xff]  ;;  %v281_v2 = vld [vmem:[%s1808_s9 + $0x90] sm:$0xff]  ;;  %v290_v3 = vld [vmem:[%s1808_s9 + $0xd8] sm:$0xff] }
  0x17   : > { %1430 = vmatmul.msk.f32.vlgmr.msra.gmra.mxu0 %vm301_vm0, %v263_v1  ;;  %1448 = vmatmul.msk.f32.vlgmr.msra.gmra.mxu1 %vm301_vm0, %v281_v2  ;;  %v264_v4 = vld [vmem:[%s1808_s9 + $0x8] sm:$0xff]  ;;  %v282_v5 = vld [vmem:[%s1808_s9 + $0x98] sm:$0xff]  ;;  %v291_v6 = vld [vmem:[%s1808_s9 + $0xe0] sm:$0xff] }
  0x18   : > { %1457 = vmatmul.msk.f32.vlgmr.msra.gmra.mxu3 %vm301_vm0, %v290_v3  ;;  %v265_v7 = vld [vmem:[%s1808_s9 + $0x10] sm:$0xff]  ;;  %v283_v8 = vld [vmem:[%s1808_s9 + $0xa0] sm:$0xff]  ;;  %v292_v9 = vld [vmem:[%s1808_s9 + $0xe8] sm:$0xff] }
  0x19   : > { %v266_v10 = vld [vmem:[%s1808_s9 + $0x18] sm:$0xff]  ;;  %v284_v11 = vld [vmem:[%s1808_s9 + $0xa8] sm:$0xff]  ;;  %v293_v12 = vld [vmem:[%s1808_s9 + $0xf0] sm:$0xff] }
  0x1a   : > { %v267_v13 = vld [vmem:[%s1808_s9 + $0x20] sm:$0xff]  ;;  %v285_v14 = vld [vmem:[%s1808_s9 + $0xb0] sm:$0xff]  ;;  %v294_v15 = vld [vmem:[%s1808_s9 + $0xf8] sm:$0xff] }
  0x1b   : > { %v268_v16 = vld [vmem:[%s1808_s9 + $0x28] sm:$0xff]  ;;  %v286_v17 = vld [vmem:[%s1808_s9 + $0xb8] sm:$0xff]  ;;  %v295_v18 = vld [vmem:[%s1808_s9 + $0x100] sm:$0xff] }
  0x1c   : > { %v269_v19 = vld [vmem:[%s1808_s9 + $0x30] sm:$0xff]  ;;  %v287_v20 = vld [vmem:[%s1808_s9 + $0xc0] sm:$0xff]  ;;  %v270_v21 = vld [vmem:[%s1808_s9 + $0x38] sm:$0xff] }
  0x1d   : > { %v288_v22 = vld [vmem:[%s1808_s9 + $0xc8] sm:$0xff]  ;;  %v271_v23 = vld [vmem:[%s1808_s9 + $0x40] sm:$0xff]  ;;  %v289_v24 = vld [vmem:[%s1808_s9 + $0xd0] sm:$0xff] }
  0x1e   : > { %v272_v25 = vld [vmem:[%s1808_s9 + $0x48] sm:$0xff]  ;;  %v273_v26 = vld [vmem:[%s1808_s9 + $0x50] sm:$0xff]  ;;  %v274_v27 = vld [vmem:[%s1808_s9 + $0x58] sm:$0xff] }
  0x1f   : > { %1431 = vmatmul.msk.f32.gmra.mxu0 %vm301_vm0, %v264_v4  ;;  %1449 = vmatmul.msk.f32.gmra.mxu1 %vm301_vm0, %v282_v5  ;;  %v275_v28 = vld [vmem:[%s1808_s9 + $0x60] sm:$0xff]  ;;  %v276_v29 = vld [vmem:[%s1808_s9 + $0x68] sm:$0xff]  ;;  %v277_v30 = vld [vmem:[%s1808_s9 + $0x70] sm:$0xff] }
  0x20   : > { %1458 = vmatmul.msk.f32.gmra.mxu3 %vm301_vm0, %v291_v6  ;;  %v278_v31 = vld [vmem:[%s1808_s9 + $0x78] sm:$0xff]  ;;  %v279_v34 = vld [vmem:[%s1808_s9 + $0x80] sm:$0xff]  ;;  %v280_v37 = vld [vmem:[%s1808_s9 + $0x88] sm:$0xff] }
  0x27   : > { %1432 = vmatmul.msk.f32.gmra.mxu0 %vm301_vm0, %v265_v7  ;;  %1450 = vmatmul.msk.f32.gmra.mxu1 %vm301_vm0, %v283_v8 }
  0x28   : > { %1459 = vmatmul.msk.f32.gmra.mxu3 %vm301_vm0, %v292_v9 }
  0x2f   : > { %1433 = vmatmul.msk.f32.gmra.mxu0 %vm301_vm0, %v266_v10  ;;  %1451 = vmatmul.msk.f32.gmra.mxu1 %vm301_vm0, %v284_v11  ;;  %v1522_v11 = vld [vmem:[%s2436_s3 + $0x48] sm:$0xff] }
  0x30   : > { %1460 = vmatmul.msk.f32.gmra.mxu3 %vm301_vm0, %v293_v12  ;;  %974 = vmatpush.bf16.msra.mxu2 %v1522_v11 }
  0x37   : > { %1434 = vmatmul.msk.f32.gmra.mxu0 %vm301_vm0, %v267_v13  ;;  %1452 = vmatmul.msk.f32.gmra.mxu1 %vm301_vm0, %v285_v14 }
  0x38   : > { %1461 = vmatmul.msk.f32.gmra.mxu3 %vm301_vm0, %v294_v15 }
  0x3f   : > { %1435 = vmatmul.msk.f32.gmra.mxu0 %vm301_vm0, %v268_v16  ;;  %1453 = vmatmul.msk.f32.gmra.mxu1 %vm301_vm0, %v286_v17 }
  0x40   : > { %1462 = vmatmul.msk.f32.gmra.mxu3 %vm301_vm0, %v295_v18 }
  0x47   : > { %1436 = vmatmul.msk.f32.gmra.mxu0 %vm301_vm0, %v269_v19  ;;  %1454 = vmatmul.msk.f32.gmra.mxu1 %vm301_vm0, %v287_v20  ;;  %v1521_v20 = vld [vmem:[%s2436_s3 + $0x40] sm:$0xff] }
  0x48   : > { %975 = vmatpush.bf16.msra.mxu2 %v1521_v20 }
  0x4c   : > { %1281 = vmatpush.bf16.msrb.mxu2 %v1522_v11 }
  0x4f   : > { %1437 = vmatmul.msk.f32.gmra.mxu0 %vm301_vm0, %v270_v21  ;;  %1455 = vmatmul.msk.f32.gmra.mxu1 %vm301_vm0, %v288_v22 }
  0x50   : > { %1282 = vmatpush.bf16.msrb.mxu2 %v1521_v20 }
  0x57   : > { %1438 = vmatmul.msk.f32.gmra.mxu0 %vm301_vm0, %v271_v23  ;;  %1456 = vmatmul.msk.f32.gmra.mxu1 %vm301_vm0, %v289_v24 }
  0x5f   : > { %1439 = vmatmul.msk.f32.gmra.mxu0 %vm301_vm0, %v272_v25 }
  0x67   : > { %1440 = vmatmul.msk.f32.gmra.mxu0 %vm301_vm0, %v273_v26 }
  0x6f   : > { %1441 = vmatmul.msk.f32.gmra.mxu0 %vm301_vm0, %v274_v27 }
  0x77   : > { %1442 = vmatmul.msk.f32.gmra.mxu0 %vm301_vm0, %v275_v28 }
  0x7f   : > { %1443 = vmatmul.msk.f32.gmra.mxu0 %vm301_vm0, %v276_v29 }
  0x87   : > { %1444 = vmatmul.msk.f32.gmra.mxu0 %vm301_vm0, %v277_v30 }
  0x8f   : > { %1445 = vmatmul.msk.f32.gmra.mxu0 %vm301_vm0, %v278_v31 }
  0x94   : > { %v1872_v32 = vpop.f32.mrf.mxu0  ;;  %v472_v33 = vpop.f32.mrf.mxu1 }
  0x95   : > { %v473_v17 = vadd.f32 %v1887_v45, %v472_v33 }
  0x97   : > { %1446 = vmatmul.msk.f32.gmra.mxu0 %vm301_vm0, %v279_v34  ;;  %v535_v23 = vmax.f32 %v473_v17, 0.0 }
  0x9b   : > { %v499_v38 = vpop.f32.mrf.mxu3 }
  0x9c   : > { %v1876_v35 = vpop.f32.mrf.mxu0  ;;  %v475_v36 = vpop.f32.mrf.mxu1  ;;  %v500_v63 = vadd.f32 %v1887_v45, %v499_v38 }
  0x9d   : > { %v476_v5 = vadd.f32 %v1887_v45, %v475_v36 }
  0x9e   : > { %v544_v1 = vmax.f32 %v500_v63, 0.0 }
  0x9f   : > { %1447 = vmatmul.msk.f32.gmra.mxu0 %vm301_vm0, %v280_v37  ;;  %v536_v9 = vmax.f32 %v476_v5, 0.0 }
  0xa0   : > { %v609_v7 = vrot.slane %v544_v1, 2 }
  0xa3   : > { %v502_v41 = vpop.f32.mrf.mxu3 }
  0xa4   : > { %v1880_v39 = vpop.f32.mrf.mxu0  ;;  %v478_v40 = vpop.f32.mrf.mxu1  ;;  %v503_v0 = vadd.f32 %v1887_v45, %v502_v41 }
  0xa5   : > { %v479_v6 = vadd.f32 %v1887_v45, %v478_v40 }
  0xa6   : > { %v545_v2 = vmax.f32 %v503_v0, 0.0 }
  0xa7   : > { %v537_v10 = vmax.f32 %v479_v6, 0.0 }
  0xa8   : > { %v611_v8 = vrot.slane %v545_v2, 2 }
  0xaa   : > { %v612_v12 = vsel %vm559_vm1, %v609_v7, %v611_v8 }
  0xab   : > { %v505_v44 = vpop.f32.mrf.mxu3  ;;  %v1921_v18 = vmax.f32 %v536_v9, %v612_v12 }
  0xac   : > { %v1882_v42 = vpop.f32.mrf.mxu0  ;;  %v481_v43 = vpop.f32.mrf.mxu1  ;;  %v506_v46 = vadd.f32 %v1887_v45, %v505_v44 }
  0xad   : > { %v482_v50 = vadd.f32 %v1887_v45, %v481_v43  ;;  %v1054_v24 = vrot.slane %v1921_v18, 1 }
  0xae   : > { %v546_v49 = vmax.f32 %v506_v46, 0.0 }
  0xaf   : > { %v538_v55 = vmax.f32 %v482_v50, 0.0 }
  0xb0   : > { %v613_v53 = vrot.slane %v546_v49, 2  ;;  %v419_v49 = vadd.f32 %v1887_v45, %v1872_v32 }
  0xb2   : > { %v614_v13 = vsel %vm559_vm1, %v611_v8, %v613_v53  ;;  %v517_v63 = vmax.f32 %v419_v49, 0.0 }
  0xb3   : > { %v508_v51 = vpop.f32.mrf.mxu3  ;;  %v1923_v19 = vmax.f32 %v537_v10, %v614_v13 }
  0xb4   : > { %v1890_v47 = vpop.f32.mrf.mxu0  ;;  %v1892_v48 = vpop.f32.mrf.mxu1  ;;  %v509_v52 = vadd.f32 %v1887_v45, %v508_v51 }
  0xb5   : > { %v1056_v25 = vrot.slane %v1923_v19, 1 }
  0xb6   : > { %v547_v54 = vmax.f32 %v509_v52, 0.0 }
  0xb7   : > { %v1057_v36 = vsel %vm720_vm2, %v1054_v24, %v1056_v25 }
  0xb8   : > { %v1896_v56 = vrot.slane %v547_v54, 2 }
  0xba   : > { %v616_v59 = vsel %vm559_vm1, %v613_v53, %v1896_v56 }
  0xbb   : > { %v1904_v60 = vmax.f32 %v538_v55, %v616_v59  ;;  %v422_v55 = vadd.f32 %v1887_v45, %v1876_v35 }
  0xbc   : > { %v1898_v57 = vpop.f32.mrf.mxu0  ;;  %v1900_v58 = vpop.f32.mrf.mxu1 }
  0xbd   : > { %v518_v1 = vmax.f32 %v422_v55, 0.0 }
  0xc4   : > { %v1906_v61 = vpop.f32.mrf.mxu0  ;;  %v490_v62 = vpop.f32.mrf.mxu1 }
  0xc5   : > { %v1939_v33 = vadd.f32 %v1887_v45, %v490_v62 }
  0xc7   : > { %v541_v44 = vmax.f32 %v1939_v33, 0.0 }
  0xc9   : > { %v604_v50 = vrot.slane %v541_v44, 2 }
  0xcc   : > { %v1910_v3 = vpop.f32.mrf.mxu0  ;;  %v493_v4 = vpop.f32.mrf.mxu1 }
  0xcd   : > { %v494_v27 = vadd.f32 %v1887_v45, %v493_v4 }
  0xcf   : > { %v542_v38 = vmax.f32 %v494_v27, 0.0  ;;  %v428_v27 = vadd.f32 %v1887_v45, %v1882_v42 }
  0xd1   : > { %v605_v51 = vrot.slane %v542_v38, 2 }
  0xd3   : > { %v1962_v0 = vsel %vm559_vm1, %v604_v50, %v605_v51 }
  0xd4   : > { %v442_v14 = vpop.f32.mrf.mxu0  ;;  %v496_v15 = vpop.f32.mrf.mxu1 }
  0xd5   : > { %v497_v16 = vadd.f32 %v1887_v45, %v496_v15  ;;  %v1935_v30 = vadd.f32 %v1887_v45, %v442_v14 }
  0xd7   : > { %v543_v21 = vmax.f32 %v497_v16, 0.0  ;;  %v525_v41 = vmax.f32 %v1935_v30, 0.0 }
  0xd9   : > { %v607_v22 = vrot.slane %v543_v21, 2  ;;  %v560_v53 = vrot.slane %v525_v41, 2 }
  0xdb   : > { %v610_v26 = vsel %vm559_vm1, %v607_v22, %v609_v7  ;;  %v425_v7 = vadd.f32 %v1887_v45, %v1880_v39  ;;  %v1979_v15 = vsel %vm559_vm1, %v605_v51, %v607_v22 }
  0xdc   : > { %v1932_v28 = vmax.f32 %v535_v23, %v610_v26  ;;  %v445_v29 = vpop.f32.mrf.mxu0 }
  0xdd   : > { %v446_v31 = vadd.f32 %v1887_v45, %v445_v29  ;;  %v519_v20 = vmax.f32 %v425_v7, 0.0 }
  0xde   : > { %v1052_v34 = vrot.slane %v1932_v28, 1 }
  0xdf   : > { %v526_v37 = vmax.f32 %v446_v31, 0.0 }
  0xe0   : > { %v1055_v40 = vsel %vm720_vm2, %v1052_v34, %v1054_v24 }
  0xe1   : > { %v1570_v43 = vpack.i.bf16 %v1057_v36, %v1055_v40  ;;  %v561_v46 = vrot.slane %v526_v37, 2 }
  0xe3   : > { %1571 = vrot.lane.b32.xlu1 %v1570_v43, %s1732_s16  ;;  %v562_v59 = vsel %vm559_vm1, %v560_v53, %v561_v46 }
  0xe4   : > { %v448_v52 = vpop.f32.mrf.mxu0  ;;  %v1964_v2 = vmax.f32 %v517_v63, %v562_v59 }
  0xe5   : > { %v449_v54 = vadd.f32 %v1887_v45, %v448_v52 }
  0xe6   : > { %v1094_v8 = vrot.slane %v1964_v2, 6  ;;  %v1005_v10 = vrot.slane %v1964_v2, 5  ;;  %v804_v29 = vrot.slane %v1964_v2, 2 }
  0xe7   : > { %v527_v62 = vmax.f32 %v449_v54, 0.0  ;;  %v431_v54 = vadd.f32 %v1887_v45, %v1890_v47 }
  0xe9   : > { %v563_v32 = vrot.slane %v527_v62, 2 }
  0xeb   : > { %v564_v4 = vsel %vm559_vm1, %v561_v46, %v563_v32  ;;  %v520_v46 = vmax.f32 %v428_v27, 0.0 }
  0xec   : > { %v1967_v5 = vmax.f32 %v518_v1, %v564_v4  ;;  %v451_v6 = vpop.f32.mrf.mxu0 }
  0xed   : > { %v452_v35 = vadd.f32 %v1887_v45, %v451_v6 }
  0xee   : > { %v1095_v9 = vrot.slane %v1967_v5, 6  ;;  %v1006_v11 = vrot.slane %v1967_v5, 5  ;;  %v805_v26 = vrot.slane %v1967_v5, 2 }
  0xef   : > { %v528_v12 = vmax.f32 %v452_v35, 0.0  ;;  %v521_v35 = vmax.f32 %v431_v54, 0.0 }
  0xf0   : > { %v1096_v13 = vsel %vm1093_vm3, %v1094_v8, %v1095_v9  ;;  %v1007_v14 = vsel %vm762_vm4, %v1005_v10, %v1006_v11  ;;  %v806_v37 = vsel %vm559_vm1, %v804_v29, %v805_v26  ;;  %v437_v29 = vadd.f32 %v1887_v45, %v1906_v61  ;;  %v511_v61 = vpop.f32.mrf.mxu3 }
  0xf1   : > { %v565_v39 = vrot.slane %v528_v12, 2  ;;  %v1580_v16 = vpack.i.bf16 %v1096_v13, %v1094_v8  ;;  %v1575_v17 = vpack.i.bf16 %v1007_v14, %v1005_v10 }
  0xf3   : > { %v566_v21 = vsel %vm559_vm1, %v563_v32, %v565_v39  ;;  %1581 = vrot.lane.b32.xlu2 %v1580_v16, %s1733_s17  ;;  %1576 = vrot.lane.b32.xlu0 %v1575_v17, %s1734_s25 }
  0xf4   : > { %v1984_v23 = vmax.f32 %v519_v20, %v566_v21  ;;  %v454_v24 = vpop.f32.mrf.mxu0  ;;  %v434_v21 = vadd.f32 %v1887_v45, %v1898_v57 }
  0xf5   : > { %v455_v22 = vadd.f32 %v1887_v45, %v454_v24 }
  0xf6   : > { %v807_v31 = vrot.slane %v1984_v23, 2  ;;  %v1097_v51 = vrot.slane %v1984_v23, 6  ;;  %v1008_v52 = vrot.slane %v1984_v23, 5  ;;  %v522_v27 = vmax.f32 %v434_v21, 0.0 }
  0xf7   : > { %v529_v36 = vmax.f32 %v455_v22, 0.0 }
  0xf8   : > { %v808_v38 = vsel %vm559_vm1, %v805_v26, %v807_v31  ;;  %v1098_v63 = vsel %vm1093_vm3, %v1095_v9, %v1097_v51  ;;  %v1009_v1 = vsel %vm762_vm4, %v1006_v11, %v1008_v52 }
  0xf9   : > { %v567_v40 = vrot.slane %v529_v36, 2  ;;  %v857_v43 = vpack.c.bf16 %v808_v38, %v806_v37  ;;  %v523_v38 = vmax.f32 %v437_v29, 0.0 }
  0xfb   : > { %v568_v49 = vsel %vm559_vm1, %v565_v39, %v567_v40  ;;  %1503 = vmatmul.msk.bf16.vlgmr.msra.gmra.mxu2 %vm829_vm5, %v857_v43 }
  0xfc   : > { %v1996_v50 = vmax.f32 %v520_v46, %v568_v49  ;;  %v457_v42 = vpop.f32.mrf.mxu0 }
  0xfd   : > { %v458_v53 = vadd.f32 %v1887_v45, %v457_v42  ;;  %v440_v42 = vadd.f32 %v1887_v45, %v1910_v3 }
  0xfe   : > { %v1099_v55 = vrot.slane %v1996_v50, 6  ;;  %v1010_v59 = vrot.slane %v1996_v50, 5  ;;  %v809_v12 = vrot.slane %v1996_v50, 2 }
  0xff   : > { %v530_v62 = vmax.f32 %v458_v53, 0.0 }
 0x100   : > { %v1100_v32 = vsel %vm1093_vm3, %v1097_v51, %v1099_v55  ;;  %v1011_v4 = vsel %vm762_vm4, %v1008_v52, %v1010_v59  ;;  %v810_v39 = vsel %vm559_vm1, %v807_v31, %v809_v12 }
 0x101   : > { %v569_v6 = vrot.slane %v530_v62, 2  ;;  %v1590_v7 = vpack.i.bf16 %v1100_v32, %v1098_v63  ;;  %v1585_v47 = vpack.i.bf16 %v1011_v4, %v1009_v1  ;;  %v524_v32 = vmax.f32 %v440_v42, 0.0 }
 0x102   : > { %v512_v1 = vadd.f32 %v1887_v45, %v511_v61  ;;  %v514_v61 = vpop.f32.mrf.mxu3 }
 0x103   : > { %v570_v8 = vsel %vm559_vm1, %v567_v40, %v569_v6  ;;  %1591 = vrot.lane.b32.xlu2 %v1590_v7, %s1733_s17  ;;  %1586 = vrot.lane.b32.xlu0 %v1585_v47, %s1734_s25 }
 0x104   : > { %v2016_v9 = vmax.f32 %v521_v35, %v570_v8  ;;  %v460_v10 = vpop.f32.mrf.mxu0  ;;  %v548_v35 = vmax.f32 %v512_v1, 0.0  ;;  %v1143_v1 = vrot.slane %v1921_v18, 2 }
 0x105   : > { %v461_v11 = vadd.f32 %v1887_v45, %v460_v10 }
 0x106   : > { %v811_v13 = vrot.slane %v2016_v9, 2  ;;  %v2062_v30 = vrot.slane %v548_v35, 2 }
 0x107   : > { %v531_v14 = vmax.f32 %v461_v11, 0.0 }
 0x108   : > { %v812_v16 = vsel %vm559_vm1, %v809_v12, %v811_v13 }
 0x109   : > { %v571_v17 = vrot.slane %v531_v14, 2  ;;  %v859_v20 = vpack.c.bf16 %v812_v16, %v810_v39  ;;  %v766_v39 = vrot.slane %v1932_v28, 5 }
 0x10b   : > { %1504 = vmatmul.msk.bf16.gmra.mxu2 %vm829_vm5, %v859_v20  ;;  %v572_v26 = vsel %vm559_vm1, %v569_v6, %v571_v17 }
 0x10c   : > { %v463_v24 = vpop.f32.mrf.mxu0  ;;  %v2030_v31 = vmax.f32 %v522_v27, %v572_v26 }
 0x10d   : > { %v464_v22 = vadd.f32 %v1887_v45, %v463_v24 }
 0x10e   : > { %v813_v46 = vrot.slane %v2030_v31, 2  ;;  %v1014_v42 = vrot.slane %v2030_v31, 5 }
 0x10f   : > { %v532_v36 = vmax.f32 %v464_v22, 0.0 }
 0x110   : > { %v814_v53 = vsel %vm559_vm1, %v811_v13, %v813_v46  ;;  %v485_v13 = vadd.f32 %v1887_v45, %v1892_v48 }
 0x111   : > { %v573_v37 = vrot.slane %v532_v36, 2 }
 0x113   : > { %v574_v40 = vsel %vm559_vm1, %v571_v17, %v573_v37 }
 0x114   : > { %v2033_v43 = vmax.f32 %v523_v38, %v574_v40  ;;  %v466_v57 = vpop.f32.mrf.mxu0 }
 0x115   : > { %v467_v49 = vadd.f32 %v1887_v45, %v466_v57 }
 0x116   : > { %v815_v51 = vrot.slane %v2033_v43, 2 }
 0x117   : > { %v533_v52 = vmax.f32 %v467_v49, 0.0  ;;  %v724_v49 = vrot.slane %v1984_v23, 1 }
 0x118   : > { %v816_v54 = vsel %vm559_vm1, %v813_v46, %v815_v51  ;;  %v1103_v46 = vrot.slane %v2030_v31, 6 }
 0x119   : > { %v575_v62 = vrot.slane %v533_v52, 2  ;;  %v861_v63 = vpack.c.bf16 %v816_v54, %v814_v53  ;;  %v2053_v8 = vmax.f32 %v533_v52, %v1962_v0  ;;  %v1101_v53 = vrot.slane %v2016_v9, 6 }
 0x11a   : > { %v722_v54 = vrot.slane %v1967_v5, 1 }
 0x11b   : > { %v576_v4 = vsel %vm559_vm1, %v573_v37, %v575_v62  ;;  %1505 = vmatmul.msk.bf16.gmra.mxu2 %vm829_vm5, %v861_v63  ;;  %v2049_v3 = vmax.f32 %v525_v41, %v575_v62  ;;  %v1049_v41 = vrot.slane %v2053_v8, 1  ;;  %v763_v16 = vrot.slane %v2053_v8, 5 }
 0x11c   : > { %v2045_v6 = vmax.f32 %v524_v32, %v576_v4  ;;  %v469_v7 = vpop.f32.mrf.mxu0  ;;  %v670_v48 = vrot.slane %v2053_v8, 4  ;;  %v1012_v62 = vrot.slane %v2016_v9, 5  ;;  %v768_v63 = vrot.slane %v1921_v18, 5 }
 0x11d   : > { %v470_v47 = vadd.f32 %v1887_v45, %v469_v7  ;;  %v819_v11 = vrot.slane %v2049_v3, 2  ;;  %v770_v32 = vrot.slane %v1923_v19, 5  ;;  %v721_v4 = vrot.slane %v1964_v2, 1 }
 0x11e   : > { %v817_v12 = vrot.slane %v2045_v6, 2  ;;  %v725_v7 = vsel %vm720_vm2, %v722_v54, %v724_v49 }
 0x11f   : > { %v534_v10 = vmax.f32 %v470_v47, 0.0 }
 0x120   : > { %v818_v21 = vsel %vm559_vm1, %v815_v51, %v817_v12  ;;  %v820_v24 = vsel %vm559_vm1, %v817_v12, %v819_v11  ;;  %v618_v51 = vsel %vm559_vm1, %v1896_v56, %v2062_v30  ;;  %v1104_v56 = vsel %vm1093_vm3, %v1101_v53, %v1103_v46 }
 0x121   : > { %v2060_v14 = vmax.f32 %v534_v10, %v1979_v15  ;;  %v673_v15 = vrot.slane %v1932_v28, 4  ;;  %v863_v52 = vpack.c.bf16 %v820_v24, %v818_v21  ;;  %v515_v10 = vadd.f32 %v1887_v45, %v514_v61 }
 0x122   : > { %v1015_v12 = vsel %vm762_vm4, %v1012_v62, %v1014_v42  ;;  %v1145_v11 = vrot.slane %v1923_v19, 2  ;;  %v1058_v21 = vrot.slane %v1904_v60, 1 }
 0x123   : > { %v1050_v0 = vrot.slane %v2060_v14, 1  ;;  %v764_v17 = vrot.slane %v2060_v14, 5  ;;  %v671_v20 = vrot.slane %v2060_v14, 4  ;;  %v1139_v47 = vrot.slane %v2060_v14, 2 }
 0x125   : > { %v1051_v26 = vsel %vm720_vm2, %v1049_v41, %v1050_v0  ;;  %v1053_v22 = vsel %vm720_vm2, %v1050_v0, %v1052_v34  ;;  %v765_v27 = vsel %vm762_vm4, %v763_v16, %v764_v17  ;;  %v767_v29 = vsel %vm762_vm4, %v764_v17, %v766_v39 }
 0x126   : > { %v1595_v36 = vpack.i.bf16 %v1053_v22, %v1051_v26  ;;  %v1620_v37 = vpack.i.bf16 %v767_v29, %v765_v27  ;;  %v672_v38 = vsel %vm669_vm6, %v670_v48, %v671_v20  ;;  %v674_v40 = vsel %vm669_vm6, %v671_v20, %v673_v15 }
 0x127   : > { %v1605_v57 = vpack.i.bf16 %v674_v40, %v672_v38  ;;  %v539_v34 = vmax.f32 %v485_v13, 0.0  ;;  %v1102_v13 = vsel %vm1093_vm3, %v1099_v55, %v1101_v53  ;;  %v723_v41 = vsel %vm720_vm2, %v721_v4, %v722_v54 }
 0x128   : > { %1596 = vrot.lane.b32.xlu1 %v1595_v36, %s1732_s16  ;;  %1621 = vrot.lane.b32.xlu2 %v1620_v37, %s1733_s17  ;;  %v1138_v0 = vrot.slane %v2053_v8, 2  ;;  %v1141_v16 = vrot.slane %v1932_v28, 2  ;;  %v1625_v17 = vpack.i.bf16 %v1104_v56, %v1102_v13  ;;  %v1013_v20 = vsel %vm762_vm4, %v1010_v59, %v1012_v62 }
 0x129   : > { %1606 = vrot.lane.b32.xlu0 %v1605_v57, %s1734_s25  ;;  %v2110_v35 = vmax.f32 %v539_v34, %v618_v51  ;;  %v1600_v48 = vpack.i.bf16 %v725_v7, %v723_v41  ;;  %v1610_v24 = vpack.i.bf16 %v1015_v12, %v1013_v20  ;;  %v675_v27 = vrot.slane %v1921_v18, 4 }
 0x12a   : > { %v1140_v22 = vsel %vm559_vm1, %v1138_v0, %v1139_v47  ;;  %v1142_v55 = vsel %vm559_vm1, %v1139_v47, %v1141_v16  ;;  %v677_v29 = vrot.slane %v1923_v19, 4  ;;  %v1144_v59 = vsel %vm559_vm1, %v1141_v16, %v1143_v1 }
 0x12b   : > { %1506 = vmatmul.msk.bf16.gmra.mxu2 %vm829_vm5, %v863_v52  ;;  %v1060_v26 = vrot.slane %v2110_v35, 1  ;;  %v1146_v36 = vsel %vm559_vm1, %v1143_v1, %v1145_v11  ;;  %v549_v37 = vmax.f32 %v515_v10, 0.0  ;;  %v1192_v38 = vpack.c.bf16 %v1142_v55, %v1140_v22 }
 0x12c   : > { %v769_v40 = vsel %vm762_vm4, %v766_v39, %v768_v63  ;;  %v771_v57 = vsel %vm762_vm4, %v768_v63, %v770_v32  ;;  %v1059_v34 = vsel %vm720_vm2, %v1056_v25, %v1058_v21  ;;  %v676_v61 = vsel %vm669_vm6, %v673_v15, %v675_v27 }
 0x12d   : > { %v1061_v51 = vsel %vm720_vm2, %v1058_v21, %v1060_v26  ;;  %v678_v39 = vsel %vm669_vm6, %v675_v27, %v677_v29  ;;  %v1194_v52 = vpack.c.bf16 %v1146_v36, %v1144_v59  ;;  %v488_v53 = vadd.f32 %v1887_v45, %v1900_v58 }
 0x12e   : > { %v619_v54 = vrot.slane %v549_v37, 2  ;;  %v1640_v62 = vpack.i.bf16 %v771_v57, %v769_v40  ;;  %v1615_v63 = vpack.i.bf16 %v1061_v51, %v1059_v34  ;;  %v1215_v25 = vrot.slane %v1192_v38, 2 }
 0x12f   : > { %v1630_v1 = vpack.i.bf16 %v678_v39, %v676_v61  ;;  %v1107_v56 = vrot.slane %v2045_v6, 6  ;;  %v728_v4 = vrot.slane %v2016_v9, 1  ;;  %v1216_v15 = vrot.slane %v1194_v52, 2 }
 0x130   : > { %1626 = vrot.lane.b32.xlu2 %v1625_v17, %s1733_s17  ;;  %1601 = vrot.lane.b32.xlu1 %v1600_v48, %s1732_s16  ;;  %v1018_v7 = vrot.slane %v2045_v6, 5  ;;  %v1147_v47 = vrot.slane %v1904_v60, 2  ;;  %v1149_v45 = vrot.slane %v2110_v35, 2  ;;  %v540_v58 = vmax.f32 %v488_v53, 0.0 }
 0x131   : > { %1611 = vrot.lane.b32.xlu0 %v1610_v24, %s1734_s25  ;;  %v1105_v10 = vrot.slane %v2033_v43, 6  ;;  %v726_v12 = vrot.slane %v1996_v50, 1  ;;  %v620_v13 = vsel %vm559_vm1, %v2062_v30, %v619_v54  ;;  %v1217_v41 = vsel %vm559_vm1, %v1215_v25, %v1216_v15  ;;  %v1519_v25 = vld [vmem:[%s2436_s3 + $0x30] sm:$0xff] }
 0x132   : > { %v1016_v0 = vrot.slane %v2033_v43, 5  ;;  %v1148_v30 = vsel %vm559_vm1, %v1145_v11, %v1147_v47  ;;  %v1150_v48 = vsel %vm559_vm1, %v1147_v47, %v1149_v45  ;;  %v2185_v21 = vmax.f32 %v540_v58, %v620_v13 }
 0x133   : > { %v1108_v16 = vsel %vm1093_vm3, %v1105_v10, %v1107_v56  ;;  %v729_v17 = vsel %vm720_vm2, %v726_v12, %v728_v4  ;;  %v2189_v24 = vmax.f32 %v541_v44, %v619_v54  ;;  %v1106_v22 = vsel %vm1093_vm3, %v1103_v46, %v1105_v10 }
 0x134   : > { %v1019_v20 = vsel %vm762_vm4, %v1016_v0, %v1018_v7  ;;  %v727_v55 = vsel %vm720_vm2, %v724_v49, %v726_v12  ;;  %v1655_v27 = vpack.i.bf16 %v1108_v16, %v1106_v22  ;;  %v1017_v11 = vsel %vm762_vm4, %v1014_v42, %v1016_v0  ;;  %v1520_v42 = vld [vmem:[%s2436_s3 + $0x38] sm:$0xff] }
 0x135   : > { %v1635_v59 = vpack.i.bf16 %v729_v17, %v727_v55  ;;  %v772_v36 = vrot.slane %v1904_v60, 5  ;;  %v1645_v37 = vpack.i.bf16 %v1019_v20, %v1017_v11  ;;  %v774_v33 = vrot.slane %v2110_v35, 5  ;;  %939 = vmatpush.bf16.msrb.mxu1 %v1520_v42  ;;  %1246 = vmatpush.bf16.msrb.mxu3 %v1520_v42 }
 0x136   : > { %v1062_v44 = vrot.slane %v2185_v21, 1  ;;  %v1064_v38 = vrot.slane %v2189_v24, 1  ;;  %v679_v46 = vrot.slane %v1904_v60, 4  ;;  %v681_v49 = vrot.slane %v2110_v35, 4 }
 0x137   : > { %v1196_v40 = vpack.c.bf16 %v1150_v48, %v1148_v30  ;;  %v773_v57 = vsel %vm762_vm4, %v770_v32, %v772_v36  ;;  %v775_v34 = vsel %vm762_vm4, %v772_v36, %v774_v33  ;;  %v732_v32 = vrot.slane %v2033_v43, 1 }
 0x138   : > { %1641 = vrot.lane.b32.xlu2 %v1640_v62, %s1733_s17  ;;  %1616 = vrot.lane.b32.xlu1 %v1615_v63, %s1732_s16  ;;  %v1063_v51 = vsel %vm720_vm2, %v1060_v26, %v1062_v44  ;;  %v1065_v61 = vsel %vm720_vm2, %v1062_v44, %v1064_v38  ;;  %v680_v39 = vsel %vm669_vm6, %v677_v29, %v679_v46  ;;  %v1020_v26 = vrot.slane %v2049_v3, 5 }
 0x139   : > { %1631 = vrot.lane.b32.xlu0 %v1630_v1, %s1734_s25  ;;  %v682_v52 = vsel %vm669_vm6, %v679_v46, %v681_v49  ;;  %v1670_v53 = vpack.i.bf16 %v775_v34, %v773_v57  ;;  %v1650_v54 = vpack.i.bf16 %v1065_v61, %v1063_v51  ;;  %v1220_v62 = vrot.slane %v1196_v40, 2  ;;  %940 = vmatpush.bf16.msrb.mxu1 %v1519_v25  ;;  %v1516_v57 = vld [vmem:[%s2436_s3 + $0x18] sm:$0xff]  ;;  %v1514_v61 = vld [vmem:[%s2436_s3 + $0x8] sm:$0xff] }
 0x13a   : > { %v1660_v63 = vpack.i.bf16 %v682_v52, %v680_v39  ;;  %v730_v29 = vrot.slane %v2030_v31, 1  ;;  %v1151_v1 = vrot.slane %v2185_v21, 2  ;;  %v683_v58 = vrot.slane %v2185_v21, 4  ;;  %1247 = vmatpush.bf16.msrb.mxu3 %v1519_v25  ;;  %v1513_v39 = vld [vmem:[%s2436_s3] sm:$0xff] }
 0x13b   : > { %1507 = vmatmul.msk.bf16.vlgmr.msrb.gmra.mxu2 %vm829_vm5, %v1217_v41  ;;  %v1221_v47 = vsel %vm559_vm1, %v1216_v15, %v1220_v62  ;;  %v1153_v10 = vrot.slane %v2189_v24, 2  ;;  %v1109_v12 = vrot.slane %v2049_v3, 6  ;;  %v1518_v41 = vld [vmem:[%s2436_s3 + $0x28] sm:$0xff]  ;;  %v1021_v15 = vsel %vm762_vm4, %v1018_v7, %v1020_v26 }
 0x13c   : > { %v733_v13 = vsel %vm720_vm2, %v730_v29, %v732_v32  ;;  %v731_v0 = vsel %vm720_vm2, %v728_v4, %v730_v29  ;;  %v1152_v16 = vsel %vm559_vm1, %v1149_v45, %v1151_v1  ;;  %v684_v17 = vsel %vm669_vm6, %v681_v49, %v683_v58 }
 0x13d   : > { %v1665_v20 = vpack.i.bf16 %v733_v13, %v731_v0  ;;  %v776_v30 = vrot.slane %v2185_v21, 5  ;;  %v1154_v48 = vsel %vm559_vm1, %v1151_v1, %v1153_v10  ;;  %941 = vmatpush.bf16.msrb.mxu1 %v1518_v41  ;;  %v1110_v7 = vsel %vm1093_vm3, %v1107_v56, %v1109_v12 }
 0x13e   : > { %1248 = vmatpush.bf16.msrb.mxu3 %v1518_v41  ;;  %v1675_v22 = vpack.i.bf16 %v684_v17, %v1021_v15  ;;  %v778_v4 = vrot.slane %v2189_v24, 5  ;;  %v734_v55 = vrot.slane %v2045_v6, 1  ;;  %v1198_v45 = vpack.c.bf16 %v1154_v48, %v1152_v16 }
 0x13f   : > { %v685_v56 = vrot.slane %v2189_v24, 4  ;;  %v736_v42 = vrot.slane %v2049_v3, 1  ;;  %v1200_v40 = vpack.c.bf16 %v1153_v10, %v1153_v10  ;;  %v1515_v3 = vld [vmem:[%s2436_s3 + $0x10] sm:$0xff] }
 0x140   : > { %1656 = vrot.lane.b32.xlu2 %v1655_v27, %s1733_s17  ;;  %1636 = vrot.lane.b32.xlu1 %v1635_v59, %s1732_s16  ;;  %v777_v27 = vsel %vm762_vm4, %v774_v33, %v776_v30  ;;  %v779_v11 = vsel %vm762_vm4, %v776_v30, %v778_v4  ;;  %v735_v59 = vsel %vm720_vm2, %v732_v32, %v734_v55  ;;  %v1224_v44 = vrot.slane %v1198_v45, 2  ;;  %v1517_v33 = vld [vmem:[%s2436_s3 + $0x20] sm:$0xff] }
 0x141   : > { %1646 = vrot.lane.b32.xlu0 %v1645_v37, %s1734_s25  ;;  %v1685_v36 = vpack.i.bf16 %v779_v11, %v777_v27  ;;  %v1680_v37 = vpack.i.bf16 %v735_v59, %v1064_v38  ;;  %v686_v46 = vsel %vm669_vm6, %v683_v58, %v685_v56  ;;  %942 = vmatpush.bf16.msrb.mxu1 %v1517_v33  ;;  %v1228_v34 = vrot.slane %v1200_v40, 2 }
 0x142   : > { %v1225_v49 = vsel %vm559_vm1, %v1220_v62, %v1224_v44  ;;  %1249 = vmatpush.bf16.msrb.mxu3 %v1517_v33  ;;  %v737_v38 = vsel %vm720_vm2, %v734_v55, %v736_v42 }
 0x143   : > { %v1229_v51 = vsel %vm559_vm1, %v1224_v44, %v1228_v34 }
 0x145   : > { %943 = vmatpush.bf16.msrb.mxu1 %v1516_v57 }
 0x146   : > { %1250 = vmatpush.bf16.msrb.mxu3 %v1516_v57 }
 0x148   : > { %1671 = vrot.lane.b32.xlu2 %v1670_v53, %s1733_s17  ;;  %1651 = vrot.lane.b32.xlu1 %v1650_v54, %s1732_s16 }
 0x149   : > { %1661 = vrot.lane.b32.xlu0 %v1660_v63, %s1734_s25  ;;  %944 = vmatpush.bf16.msrb.mxu1 %v1515_v3 }
 0x14a   : > { %1251 = vmatpush.bf16.msrb.mxu3 %v1515_v3 }
 0x14b   : > { %1508 = vmatmul.msk.bf16.gmra.mxu2 %vm829_vm5, %v1221_v47 }
 0x14d   : > { %945 = vmatpush.bf16.msrb.mxu1 %v1514_v61  ;;  %v1582_v52 = vpop.permute.xlu2 %1581 }
 0x14e   : > { %1252 = vmatpush.bf16.msrb.mxu3 %v1514_v61 }
 0x150   : > { %1127 = vrot.lane.b32.xlu2 %v1110_v7, %s1733_s17  ;;  %1666 = vrot.lane.b32.xlu1 %v1665_v20, %s1732_s16  ;;  %v1583_v7 = vunpack.i.l.bf16 %v1582_v52 }
 0x151   : > { %1676 = vrot.lane.b32.xlu0 %v1675_v22, %s1734_s25  ;;  %946 = vmatpush.bf16.msrb.mxu1 %v1513_v39 }
 0x152   : > { %1253 = vmatpush.bf16.msrb.mxu3 %v1513_v39 }
 0x155   : > { %v1572_v26 = vpop.permute.xlu1 %1571 }
 0x156   : > { %v1574_v47 = vunpack.i.h.bf16 %v1572_v26  ;;  %v1573_v58 = vunpack.i.l.bf16 %v1572_v26 }
 0x158   : > { %1686 = vrot.lane.b32.xlu2 %v1685_v36, %s1733_s17  ;;  %1681 = vrot.lane.b32.xlu1 %v1680_v37, %s1732_s16  ;;  %s1427_s17 = sshll.u32 %s1714_s18, 3 }
 0x159   : > { %701 = vrot.lane.b32.xlu0 %v686_v46, %s1734_s25  ;;  %p255_p7 = scmp.lt.s32.totalorder %s1427_s17, 15 }
 0x15b   : > { %1509 = vmatmul.msk.bf16.gmra.mxu2 %vm829_vm5, %v1225_v49  ;;  %s2452_s17 = smov (!%p255_p7, %s1427_s17), 15 }
 0x15c   : > { %s258_s28 = sadd.s32 %s1428_s27, %s2452_s17 }
 0x15d   : > { %v1592_v54 = vpop.permute.xlu2 %1591  ;;  %s1429_s29 = sshll.u32 %s258_s28, 3 }
 0x15e   : > { %v1594_v15 = vunpack.i.h.bf16 %v1592_v54  ;;  %v1593_v0 = vunpack.i.l.bf16 %v1592_v54  ;;  %s2383_s6 = scalar_lea.vmem %s2438_s5, %s1429_s29 }
 0x160   : > { %752 = vrot.lane.b32.xlu1 %v737_v38, %s1732_s16 }
 0x165   : > { %v1577_v53 = vpop.permute.xlu0 %1576 }
 0x166   : > { %v1579_v10 = vunpack.i.h.bf16 %v1577_v53  ;;  %v1578_v12 = vunpack.i.l.bf16 %v1577_v53 }
 0x168   : > { %v1165_v22 = vsel %vm829_vm5, %v2060_v14, %v1579_v10  ;;  %v1164_v4 = vsel %vm829_vm5, %v2053_v8, %v1578_v12 }
 0x16b   : > { %1510 = vmatmul.msk.bf16.gmra.mxu2 %vm829_vm5, %v1229_v51 }
 0x175   : > { %v1587_v62 = vpop.permute.xlu0 %1586 }
 0x176   : > { %v1589_v63 = vunpack.i.h.bf16 %v1587_v62  ;;  %v1588_v32 = vunpack.i.l.bf16 %v1587_v62 }
 0x178   : > { %v1167_v29 = vsel %vm829_vm5, %v1921_v18, %v1589_v63  ;;  %v1166_v1 = vsel %vm829_vm5, %v1932_v28, %v1588_v32  ;;  %v1584_v28 = vunpack.i.h.bf16 %v1582_v52 }
 0x179   : > { %v1176_v13 = vsel %vm838_vm7, %v1167_v29, %v1574_v47  ;;  %v1175_v41 = vsel %vm838_vm7, %v1166_v1, %v1573_v58 }
 0x17a   : > { %v1184_v18 = vsel %vm847_vm8, %v1175_v41, %v1593_v0  ;;  %v1185_v48 = vsel %vm847_vm8, %v1176_v13, %v1594_v15 }
 0x17b   : > { %v1193_v56 = vpack.c.bf16 %v1185_v48, %v1184_v18 }
 0x17d   : > { %v1213_v49 = vrot.slane %v1193_v56, 2 }
 0x182   : > { %v1622_v25 = vpop.permute.xlu2 %1621 }
 0x183   : > { %v1624_v14 = vunpack.i.h.bf16 %v1622_v25  ;;  %v1623_v40 = vunpack.i.l.bf16 %v1622_v25 }
 0x18a   : > { %v1627_v55 = vpop.permute.xlu2 %1626 }
 0x18b   : > { %v1629_v25 = vunpack.i.h.bf16 %v1627_v55  ;;  %v1628_v29 = vunpack.i.l.bf16 %v1627_v55 }
 0x192   : > { %v1642_v53 = vpop.permute.xlu2 %1641 }
 0x19a   : > { %v1597_v16 = vpop.permute.xlu1 %1596 }
 0x19b   : > { %v1599_v17 = vunpack.i.h.bf16 %v1597_v16  ;;  %v1598_v20 = vunpack.i.l.bf16 %v1597_v16  ;;  %v1607_v30 = vpop.permute.xlu0 %1606  ;;  %v1657_v16 = vpop.permute.xlu2 %1656 }
 0x19c   : > { %v1609_v37 = vunpack.i.h.bf16 %v1607_v30  ;;  %v1608_v44 = vunpack.i.l.bf16 %v1607_v30  ;;  %v1644_v30 = vunpack.i.h.bf16 %v1642_v53 }
 0x19d   : > { %v1173_v45 = vsel %vm838_vm7, %v1164_v4, %v1598_v20  ;;  %v1174_v27 = vsel %vm838_vm7, %v1165_v22, %v1599_v17 }
 0x19e   : > { %v1182_v11 = vsel %vm847_vm8, %v1173_v45, %v1583_v7  ;;  %v1183_v59 = vsel %vm847_vm8, %v1174_v27, %v1584_v28  ;;  %v831_v57 = vsel %vm829_vm5, %v1967_v5, %v1609_v37  ;;  %v830_v34 = vsel %vm829_vm5, %v1964_v2, %v1608_v44 }
 0x19f   : > { %v1191_v36 = vpack.c.bf16 %v1183_v59, %v1182_v11  ;;  %v1643_v28 = vunpack.i.l.bf16 %v1642_v53 }
 0x1a1   : > { %v1212_v46 = vrot.slane %v1191_v36, 2 }
 0x1a2   : > { %v1602_v33 = vpop.permute.xlu1 %1601 }
 0x1a3   : > { %v1612_v42 = vpop.permute.xlu0 %1611  ;;  %v1604_v38 = vunpack.i.h.bf16 %v1602_v33  ;;  %v1603_v8 = vunpack.i.l.bf16 %v1602_v33  ;;  %v1214_v51 = vsel %vm559_vm1, %v1212_v46, %v1213_v49  ;;  %v1659_v46 = vunpack.i.h.bf16 %v1657_v16 }
 0x1a4   : > { %1254 = vmatmul.bf16.vlgmr.msrb.gmra.mxu3 %v1214_v51  ;;  %v1614_v62 = vunpack.i.h.bf16 %v1612_v42  ;;  %v1613_v63 = vunpack.i.l.bf16 %v1612_v42  ;;  %v1658_v33 = vunpack.i.l.bf16 %v1657_v16 }
 0x1a5   : > { %v840_v3 = vsel %vm838_vm7, %v831_v57, %v1604_v38  ;;  %v839_v61 = vsel %vm838_vm7, %v830_v34, %v1603_v8 }
 0x1a6   : > { %v848_v39 = vsel %vm847_vm8, %v839_v61, %v1623_v40  ;;  %v849_v52 = vsel %vm847_vm8, %v840_v3, %v1624_v14  ;;  %v1169_v1 = vsel %vm829_vm5, %v1904_v60, %v1614_v62  ;;  %v1168_v47 = vsel %vm829_vm5, %v1923_v19, %v1613_v63 }
 0x1a7   : > { %v856_v54 = vpack.c.bf16 %v849_v52, %v848_v39 }
 0x1a9   : > { %947 = vmatmul.bf16.vlgmr.msrb.gmra.mxu1 %v856_v54 }
 0x1aa   : > { %v1617_v5 = vpop.permute.xlu1 %1616 }
 0x1ab   : > { %v1632_v32 = vpop.permute.xlu0 %1631  ;;  %v1619_v26 = vunpack.i.h.bf16 %v1617_v5  ;;  %v1618_v2 = vunpack.i.l.bf16 %v1617_v5 }
 0x1ac   : > { %v1634_v15 = vunpack.i.h.bf16 %v1632_v32  ;;  %v1633_v0 = vunpack.i.l.bf16 %v1632_v32 }
 0x1ad   : > { %v1178_v58 = vsel %vm838_vm7, %v1169_v1, %v1619_v26  ;;  %v1177_v10 = vsel %vm838_vm7, %v1168_v47, %v1618_v2 }
 0x1ae   : > { %v1186_v12 = vsel %vm847_vm8, %v1177_v10, %v1628_v29  ;;  %v1187_v13 = vsel %vm847_vm8, %v1178_v58, %v1629_v25  ;;  %v833_v19 = vsel %vm829_vm5, %v1996_v50, %v1634_v15  ;;  %v832_v7 = vsel %vm829_vm5, %v1984_v23, %v1633_v0  ;;  %v1672_v50 = vpop.permute.xlu2 %1671 }
 0x1af   : > { %v1195_v41 = vpack.c.bf16 %v1187_v13, %v1186_v12  ;;  %v1674_v53 = vunpack.i.h.bf16 %v1672_v50  ;;  %v1673_v54 = vunpack.i.l.bf16 %v1672_v50 }
 0x1b1   : > { %v1218_v17 = vrot.slane %v1195_v41, 2 }
 0x1b2   : > { %v1637_v20 = vpop.permute.xlu1 %1636 }
 0x1b3   : > { %v1647_v18 = vpop.permute.xlu0 %1646  ;;  %v1639_v60 = vunpack.i.h.bf16 %v1637_v20  ;;  %v1638_v48 = vunpack.i.l.bf16 %v1637_v20  ;;  %v1219_v22 = vsel %vm559_vm1, %v1213_v49, %v1218_v17 }
 0x1b4   : > { %1259 = vmatmul.bf16.gmra.mxu3 %v1219_v22  ;;  %v1649_v59 = vunpack.i.h.bf16 %v1647_v18  ;;  %v1648_v56 = vunpack.i.l.bf16 %v1647_v18 }
 0x1b5   : > { %v841_v4 = vsel %vm838_vm7, %v832_v7, %v1638_v48  ;;  %v842_v55 = vsel %vm838_vm7, %v833_v19, %v1639_v60 }
 0x1b6   : > { %v850_v45 = vsel %vm847_vm8, %v841_v4, %v1643_v28  ;;  %v851_v27 = vsel %vm847_vm8, %v842_v55, %v1644_v30  ;;  %v1171_v49 = vsel %vm829_vm5, %v2185_v21, %v1649_v59  ;;  %v1170_v14 = vsel %vm829_vm5, %v2110_v35, %v1648_v56  ;;  %v1128_v63 = vpop.permute.xlu2 %1127 }
 0x1b7   : > { %v858_v11 = vpack.c.bf16 %v851_v27, %v850_v45 }
 0x1b9   : > { %952 = vmatmul.bf16.gmra.mxu1 %v858_v11 }
 0x1ba   : > { %v1652_v36 = vpop.permute.xlu1 %1651 }
 0x1bb   : > { %v1662_v37 = vpop.permute.xlu0 %1661  ;;  %v1654_v44 = vunpack.i.h.bf16 %v1652_v36  ;;  %v1653_v23 = vunpack.i.l.bf16 %v1652_v36  ;;  %v2375_v36 = vld [vmem:[%s2437_s4] ss:$0 sm:$0xff] }
 0x1bc   : > { %v1664_v34 = vunpack.i.h.bf16 %v1662_v37  ;;  %v1663_v51 = vunpack.i.l.bf16 %v1662_v37 }
 0x1bd   : > { %v1180_v42 = vsel %vm838_vm7, %v1171_v49, %v1654_v44  ;;  %v1179_v38 = vsel %vm838_vm7, %v1170_v14, %v1653_v23 }
 0x1be   : > { %v1188_v8 = vsel %vm847_vm8, %v1179_v38, %v1658_v33  ;;  %v1189_v40 = vsel %vm847_vm8, %v1180_v42, %v1659_v46  ;;  %v835_v35 = vsel %vm829_vm5, %v2030_v31, %v1664_v34  ;;  %v834_v62 = vsel %vm829_vm5, %v2016_v9, %v1663_v51  ;;  %v977_v31 = vpop.f32.mrf.mxu2  ;;  %v1687_v41 = vpop.permute.xlu2 %1686 }
 0x1bf   : > { %v1197_v57 = vpack.c.bf16 %v1189_v40, %v1188_v8  ;;  %v1689_v20 = vunpack.i.h.bf16 %v1687_v41  ;;  %v1688_v19 = vunpack.i.l.bf16 %v1687_v41 }
 0x1c1   : > { %v1222_v3 = vrot.slane %v1197_v57, 2 }
 0x1c2   : > { %v1667_v61 = vpop.permute.xlu1 %1666 }
 0x1c3   : > { %v1669_v39 = vunpack.i.h.bf16 %v1667_v61  ;;  %v1668_v52 = vunpack.i.l.bf16 %v1667_v61  ;;  %v1223_v21 = vsel %vm559_vm1, %v1218_v17, %v1222_v3  ;;  %v1677_v5 = vpop.permute.xlu0 %1676 }
 0x1c4   : > { %1264 = vmatmul.bf16.gmra.mxu3 %v1223_v21  ;;  %v1678_v1 = vunpack.i.l.bf16 %v1677_v5  ;;  %v1679_v12 = vunpack.i.h.bf16 %v1677_v5 }
 0x1c5   : > { %v843_v32 = vsel %vm838_vm7, %v834_v62, %v1668_v52  ;;  %v844_v26 = vsel %vm838_vm7, %v835_v35, %v1669_v39 }
 0x1c6   : > { %v852_v2 = vsel %vm847_vm8, %v843_v32, %v1673_v54  ;;  %v853_v25 = vsel %vm847_vm8, %v844_v26, %v1674_v53  ;;  %v1172_v9 = vsel %vm829_vm5, %v2189_v24, %v1678_v1  ;;  %v836_v30 = vsel %vm829_vm5, %v2033_v43, %v1679_v12  ;;  %v979_v22 = vpop.f32.mrf.mxu2 }
 0x1c7   : > { %v860_v29 = vpack.c.bf16 %v853_v25, %v852_v2 }
 0x1c9   : > { %957 = vmatmul.bf16.gmra.mxu1 %v860_v29 }
 0x1ca   : > { %v1682_v47 = vpop.permute.xlu1 %1681 }
 0x1cb   : > { %v1683_v58 = vunpack.i.l.bf16 %v1682_v47  ;;  %v702_v15 = vpop.permute.xlu0 %701  ;;  %v1684_v0 = vunpack.i.h.bf16 %v1682_v47 }
 0x1cc   : > { %v837_v18 = vsel %vm829_vm5, %v2045_v6, %v702_v15 }
 0x1cd   : > { %v1181_v10 = vsel %vm838_vm7, %v1172_v9, %v1683_v58  ;;  %v845_v28 = vsel %vm838_vm7, %v836_v30, %v1684_v0 }
 0x1ce   : > { %v1190_v13 = vsel %vm847_vm8, %v1181_v10, %v1128_v63  ;;  %v854_v4 = vsel %vm847_vm8, %v845_v28, %v1688_v19  ;;  %v982_v55 = vpop.f32.mrf.mxu2 }
 0x1cf   : > { %v1199_v16 = vpack.c.bf16 %v1190_v13, %v1190_v13 }
 0x1d1   : > { %v1226_v17 = vrot.slane %v1199_v16, 2 }
 0x1d2   : > { %v753_v60 = vpop.permute.xlu1 %752 }
 0x1d3   : > { %v846_v24 = vsel %vm838_vm7, %v837_v18, %v753_v60  ;;  %v1227_v48 = vsel %vm559_vm1, %v1222_v3, %v1226_v17 }
 0x1d4   : > { %v855_v7 = vsel %vm847_vm8, %v846_v24, %v1689_v20  ;;  %1269 = vmatmul.bf16.gmra.mxu3 %v1227_v48 }
 0x1d5   : > { %v862_v43 = vpack.c.bf16 %v855_v7, %v854_v4 }
 0x1d6   : > { %v984_v6 = vpop.f32.mrf.mxu2 }
 0x1d9   : > { %962 = vmatmul.bf16.gmra.mxu1 %v862_v43 }
 0x1de   : > { %v987_v45 = vpop.f32.mrf.mxu2 }
 0x1e6   : > { %v2365_v27 = vpop.f32.mrf.mxu2 }
 0x1ee   : > { %v2367_v11 = vpop.f32.mrf.mxu2 }
 0x1f6   : > { %v2369_v59 = vpop.f32.mrf.mxu2 }
 0x1fe   : > { %v1284_v56 = vpop.f32.mrf.mxu2 }
 0x206   : > { %v1286_v50 = vpop.f32.mrf.mxu2 }
 0x20e   : > { %v1289_v57 = vpop.f32.mrf.mxu2 }
 0x216   : > { %v1291_v5 = vpop.f32.mrf.mxu2 }
 0x21e   : > { %v1294_v12 = vpop.f32.mrf.mxu2 }
 0x226   : > { %v948_v37 = vpop.f32.mrf.mxu1  ;;  %v1296_v24 = vpop.f32.mrf.mxu2 }
 0x227   : > { %v949_v44 = vadd.f32 %v2375_v36, %v948_v37  ;;  %v1255_v23 = vpop.f32.mrf.mxu3 }
 0x228   : > { %v1256_v33 = vadd.f32 %v2375_v36, %v1255_v23 }
 0x229   : > { %v978_v46 = vadd.f32 %v977_v31, %v949_v44 }
 0x22a   : > { %v1285_v14 = vadd.f32 %v1284_v56, %v1256_v33 }
 0x22b   : > { %v997_v49 = vmax.f32 %v978_v46, 0.0 }
 0x22c   : > { %v1304_v42 = vmax.f32 %v1285_v14, 0.0 }
 0x22e   : > { %v950_v38 = vpop.f32.mrf.mxu1  ;;  %v1312_v8 = vmax.f32 %v997_v49, %v1304_v42  ;;  %v1299_v37 = vpop.f32.mrf.mxu2 }
 0x22f   : > { %v951_v40 = vadd.f32 %v2375_v36, %v950_v38  ;;  %v1257_v34 = vpop.f32.mrf.mxu3 }
 0x230   : > { %1320 = vst.msk [vmem:[%s2383_s6] sm:$0xff] %vm838_vm7, %v1312_v8  ;;  %v1258_v3 = vadd.f32 %v2375_v36, %v1257_v34 }
 0x231   : > { %v980_v51 = vadd.f32 %v979_v22, %v951_v40 }
 0x232   : > { %v1287_v39 = vadd.f32 %v1286_v50, %v1258_v3 }
 0x233   : > { %v998_v61 = vmax.f32 %v980_v51, 0.0 }
 0x234   : > { %v1305_v52 = vmax.f32 %v1287_v39, 0.0 }
 0x236   : > { %v953_v21 = vpop.f32.mrf.mxu1  ;;  %v1313_v53 = vmax.f32 %v998_v61, %v1305_v52  ;;  %v1301_v34 = vpop.f32.mrf.mxu2 }
 0x237   : > { %v954_v54 = vadd.f32 %v2375_v36, %v953_v21  ;;  %v1260_v35 = vpop.f32.mrf.mxu3 }
 0x238   : > { %1321 = vst.msk [vmem:[%s2383_s6 + $0x8] sm:$0xff] %vm838_vm7, %v1313_v53  ;;  %v1261_v63 = vadd.f32 %v2375_v36, %v1260_v35 }
 0x239   : > { %v983_v62 = vadd.f32 %v982_v55, %v954_v54 }
 0x23a   : > { %v1290_v26 = vadd.f32 %v1289_v57, %v1261_v63 }
 0x23b   : > { %v999_v32 = vmax.f32 %v983_v62, 0.0 }
 0x23c   : > { %v1306_v2 = vmax.f32 %v1290_v26, 0.0 }
 0x23e   : > { %v955_v25 = vpop.f32.mrf.mxu1  ;;  %v1314_v29 = vmax.f32 %v999_v32, %v1306_v2 }
 0x23f   : > { %v956_v1 = vadd.f32 %v2375_v36, %v955_v25  ;;  %v1262_v47 = vpop.f32.mrf.mxu3 }
 0x240   : > { %1322 = vst.msk [vmem:[%s2383_s6 + $0x10] sm:$0xff] %vm838_vm7, %v1314_v29  ;;  %v1263_v31 = vadd.f32 %v2375_v36, %v1262_v47 }
 0x241   : > { %v985_v58 = vadd.f32 %v984_v6, %v956_v1 }
 0x242   : > { %v1292_v10 = vadd.f32 %v1291_v5, %v1263_v31 }
 0x243   : > { %v1000_v9 = vmax.f32 %v985_v58, 0.0 }
 0x244   : > { %v1307_v13 = vmax.f32 %v1292_v10, 0.0 }
 0x246   : > { %v958_v41 = vpop.f32.mrf.mxu1  ;;  %v1315_v15 = vmax.f32 %v1000_v9, %v1307_v13 }
 0x247   : > { %v959_v0 = vadd.f32 %v2375_v36, %v958_v41  ;;  %v1265_v16 = vpop.f32.mrf.mxu3 }
 0x248   : > { %1323 = vst.msk [vmem:[%s2383_s6 + $0x18] sm:$0xff] %vm838_vm7, %v1315_v15  ;;  %v1266_v20 = vadd.f32 %v2375_v36, %v1265_v16 }
 0x249   : > { %v988_v17 = vadd.f32 %v987_v45, %v959_v0 }
 0x24a   : > { %v1295_v18 = vadd.f32 %v1294_v12, %v1266_v20 }
 0x24b   : > { %v1001_v30 = vmax.f32 %v988_v17, 0.0 }
 0x24c   : > { %v1308_v60 = vmax.f32 %v1295_v18, 0.0 }
 0x24e   : > { %v960_v48 = vpop.f32.mrf.mxu1  ;;  %v1316_v28 = vmax.f32 %v1001_v30, %v1308_v60 }
 0x24f   : > { %v961_v19 = vadd.f32 %v2375_v36, %v960_v48  ;;  %v1267_v7 = vpop.f32.mrf.mxu3 }
 0x250   : > { %1324 = vst.msk [vmem:[%s2383_s6 + $0x20] sm:$0xff] %vm838_vm7, %v1316_v28  ;;  %v1268_v4 = vadd.f32 %v2375_v36, %v1267_v7 }
 0x251   : > { %v990_v22 = vadd.f32 %v2365_v27, %v961_v19 }
 0x252   : > { %v1297_v55 = vadd.f32 %v1296_v24, %v1268_v4 }
 0x253   : > { %v1002_v43 = vmax.f32 %v990_v22, 0.0 }
 0x254   : > { %v1309_v6 = vmax.f32 %v1297_v55, 0.0 }
 0x256   : > { %v963_v45 = vpop.f32.mrf.mxu1  ;;  %v1317_v56 = vmax.f32 %v1002_v43, %v1309_v6 }
 0x257   : > { %v964_v50 = vadd.f32 %v2375_v36, %v963_v45  ;;  %v1270_v44 = vpop.f32.mrf.mxu3 }
 0x258   : > { %1325 = vst.msk [vmem:[%s2383_s6 + $0x28] sm:$0xff] %vm838_vm7, %v1317_v56  ;;  %v1271_v46 = vadd.f32 %v2375_v36, %v1270_v44 }
 0x259   : > { %v993_v23 = vadd.f32 %v2367_v11, %v964_v50 }
 0x25a   : > { %v1300_v33 = vadd.f32 %v1299_v37, %v1271_v46 }
 0x25b   : > { %v1003_v27 = vmax.f32 %v993_v23, 0.0 }
 0x25c   : > { %v1310_v49 = vmax.f32 %v1300_v33, 0.0 }
 0x25e   : > { %v965_v14 = vpop.f32.mrf.mxu1  ;;  %v1318_v42 = vmax.f32 %v1003_v27, %v1310_v49 }
 0x25f   : > { %v966_v38 = vadd.f32 %v2375_v36, %v965_v14  ;;  %v1272_v8 = vpop.f32.mrf.mxu3 }
 0x260   : > { %1326 = vst.msk [vmem:[%s2383_s6 + $0x30] sm:$0xff] %vm838_vm7, %v1318_v42  ;;  %v1273_v57 = vadd.f32 %v2375_v36, %v1272_v8 }
 0x261   : > { %v995_v40 = vadd.f32 %v2369_v59, %v966_v38 }
 0x262   : > { %v1302_v11 = vadd.f32 %v1301_v34, %v1273_v57 }
 0x263   : > { %v1004_v51 = vmax.f32 %v995_v40, 0.0 }
 0x264   : > { %v1311_v3 = vmax.f32 %v1302_v11, 0.0 }
 0x266   : > { %v1319_v61 = vmax.f32 %v1004_v51, %v1311_v3 }
 0x268   : > { %1327 = vst.msk [vmem:[%s2383_s6 + $0x38] sm:$0xff] %vm838_vm7, %v1319_v61 }
 0x269 PF: > { %s15_s22 = sadd.s32 1, %s1730_s22   ;;  %s2439_s18 = smov %s1722_s20 }
 0x26a   : > { %p12_p8 = scmp.ge.s32.totalorder %s15_s22, 10   ;;  %s2440_s19 = smov %s1726_s21 }
 0x26b   : > { %s2441_s20 = smov %s2444_s23  ;;  %s2442_s21 = smov %s2448_s24 }
 0x26c   :  { %14 = sbr.rel (!%p12_p8) target bundleno = 3 (0x3), region = 70 }

// kernel: siamese_forward.3
= control target key start
LH: loop header
LB: loop body
LE: loop exit
PB: predicated region body
PF: predicated region fallthrough
CT: control target
= control target key end

     0   :  { %s3922_s18 = smov 0   ;;  %s4598_s0 = inlined_call_operand.vmem [shape: f32[4,8192], index: 0, kind: input, shape index: {}]   ;;  %s4599_s1 = inlined_call_operand.vmem [shape: bf16[8192,256], index: 1, kind: input, shape index: {}]   ;;  %s4600_s2 = inlined_call_operand.vmem [shape: f32[1,256], index: 2, kind: input, shape index: {}]   ;;  %s4601_s3 = inlined_call_operand.vmem [shape: bf16[256,128], index: 3, kind: input, shape index: {}]   ;;  %s4602_s4 = inlined_call_operand.vmem [shape: f32[1,128], index: 4, kind: input, shape index: {}]   ;;  %s4603_s5 = inlined_call_operand.vmem [shape: f32[4,128], index: 5, kind: output, shape index: {}]  }
   0x1 LB: > { %s3928_s19 = sadd.s32 4294967295, %s3889_s18   ;;  %p2502_p0 = scmp.ge.s32.totalorder %s3889_s18, 1  ;;  %s3889_s18 = sphi %s3922_s18, %s15_s18  }
   0x2   : > { %p195_p1 = scmp.lt.s32.totalorder %s3889_s18, 5 }
   0x4   : > { %p196_p2 = pnand %p2502_p0, %p195_p1 }
   0x5   : > { %s2503_s20 = sshll.u32 (!%p196_p2), %s3928_s19, 4  ;;  %s2505_s21 = sshll.u32 (!%p196_p2), %s3928_s19, 8 }
   0x6   : > { %199 = sbr.rel (%p196_p2) target bundleno = 590 (0x24e), region = 40  ;;  %p225_p3 = scmp.lt.s32.totalorder (!%p196_p2), %s2503_s20, 63 }
   0x7   : > { %p231_p4 = scmp.lt.s32.totalorder (!%p196_p2), %s2505_s21, 1023  ;;  %p2508_p5 = scmp.ne.s32.totalorder (!%p196_p2), %s3928_s19, 0 }
   0xb   : > { %s4605_s20 = smov (!%p225_p3, %s2503_s20), 63  ;;  %s4607_s21 = smov (!%p231_p4, %s2505_s21), 1023 }
   0xc   : > { %s2504_s22 = sshll.u32 %s4605_s20, 2  ;;  %s3600_s26 = sshll.u32 %s4607_s21, 3 }
   0xd   : > { %s3937_s25 = scalar_lea.vmem %s4598_s0, %s2504_s22  ;;  %s3942_s29 = scalar_lea.vmem %s4599_s1, %s3600_s26 }
   0xe   : > { %240 = sbr.rel (%p2508_p5) target bundleno = 21 (0x15), region = 44 }
  0x13   : > { %v3891_v0 = vmov 0.0  }
  0x14   : > { %241 = vst [vmem:[#allocation2] sm:$0xff] %v3891_v0 }
  0x15 PF: > { %v2567_v1 = vld [vmem:[%s3942_s29 + $0x70] sm:$0xf]  ;;  %v3616_v2 = vld [vmem:[%s3942_s29 + $0x74] sm:$0xf0]  ;;  %v2559_v12 = vld [vmem:[%s3942_s29 + $0x60] sm:$0xf] }
  0x16   : > { %v2631_v3 = vld [vmem:[%s3942_s29 + $0xf0] sm:$0xf]  ;;  %v2568_v4 = vor.u32 %v3616_v2, %v2567_v1  ;;  %v3632_v5 = vld [vmem:[%s3942_s29 + $0xf4] sm:$0xf0]  ;;  %v3614_v14 = vld [vmem:[%s3942_s29 + $0x64] sm:$0xf0] }
  0x17   : > { %v2695_v6 = vld [vmem:[%s3942_s29 + $0x170] sm:$0xf]  ;;  %v3648_v7 = vld [vmem:[%s3942_s29 + $0x174] sm:$0xf0]  ;;  %v2632_v8 = vor.u32 %v3632_v5, %v2631_v3  ;;  %v2623_v15 = vld [vmem:[%s3942_s29 + $0xe0] sm:$0xf]  ;;  %v2560_v17 = vor.u32 %v3614_v14, %v2559_v12 }
  0x18   : > { %v2696_v9 = vor.u32 %v3648_v7, %v2695_v6  ;;  %v2759_v10 = vld [vmem:[%s3942_s29 + $0x1f0] sm:$0xf]  ;;  %v3664_v11 = vld [vmem:[%s3942_s29 + $0x1f4] sm:$0xf0]  ;;  %1854 = vmatpush.bf16.msra.mxu0 %v2568_v4  ;;  %v3630_v16 = vld [vmem:[%s3942_s29 + $0xe4] sm:$0xf0] }
  0x19   : > { %v2760_v13 = vor.u32 %v3664_v11, %v2759_v10  ;;  %1867 = vmatpush.bf16.msra.mxu1 %v2632_v8  ;;  %v2624_v18 = vor.u32 %v3630_v16, %v2623_v15  ;;  %v2687_v19 = vld [vmem:[%s3942_s29 + $0x160] sm:$0xf]  ;;  %v3646_v20 = vld [vmem:[%s3942_s29 + $0x164] sm:$0xf0]  ;;  %v2551_v24 = vld [vmem:[%s3942_s29 + $0x50] sm:$0xf] }
  0x1a   : > { %1880 = vmatpush.bf16.msra.mxu2 %v2696_v9  ;;  %v2751_v21 = vld [vmem:[%s3942_s29 + $0x1e0] sm:$0xf]  ;;  %v2688_v22 = vor.u32 %v3646_v20, %v2687_v19  ;;  %v3662_v23 = vld [vmem:[%s3942_s29 + $0x1e4] sm:$0xf0]  ;;  %v3612_v25 = vld [vmem:[%s3942_s29 + $0x54] sm:$0xf0] }
  0x1b   : > { %1893 = vmatpush.bf16.msra.mxu3 %v2760_v13  ;;  %v2752_v26 = vor.u32 %v3662_v23, %v2751_v21  ;;  %v2615_v27 = vld [vmem:[%s3942_s29 + $0xd0] sm:$0xf]  ;;  %v3628_v28 = vld [vmem:[%s3942_s29 + $0xd4] sm:$0xf0]  ;;  %v2552_v30 = vor.u32 %v3612_v25, %v2551_v24  ;;  %v2543_v36 = vld [vmem:[%s3942_s29 + $0x40] sm:$0xf] }
  0x1c   : > { %v2679_v29 = vld [vmem:[%s3942_s29 + $0x150] sm:$0xf]  ;;  %1855 = vmatpush.bf16.msra.mxu0 %v2560_v17  ;;  %v3644_v31 = vld [vmem:[%s3942_s29 + $0x154] sm:$0xf0]  ;;  %v2616_v34 = vor.u32 %v3628_v28, %v2615_v27  ;;  %v3610_v37 = vld [vmem:[%s3942_s29 + $0x44] sm:$0xf0] }
  0x1d   : > { %v2743_v32 = vld [vmem:[%s3942_s29 + $0x1d0] sm:$0xf]  ;;  %v3660_v33 = vld [vmem:[%s3942_s29 + $0x1d4] sm:$0xf0]  ;;  %1868 = vmatpush.bf16.msra.mxu1 %v2624_v18  ;;  %v2680_v35 = vor.u32 %v3644_v31, %v2679_v29  ;;  %v2607_v38 = vld [vmem:[%s3942_s29 + $0xc0] sm:$0xf]  ;;  %v2544_v45 = vor.u32 %v3610_v37, %v2543_v36 }
  0x1e   : > { %1881 = vmatpush.bf16.msra.mxu2 %v2688_v22  ;;  %v2744_v39 = vor.u32 %v3660_v33, %v2743_v32  ;;  %v3626_v40 = vld [vmem:[%s3942_s29 + $0xc4] sm:$0xf0]  ;;  %v2671_v41 = vld [vmem:[%s3942_s29 + $0x140] sm:$0xf]  ;;  %v2535_v48 = vld [vmem:[%s3942_s29 + $0x30] sm:$0xf] }
  0x1f   : > { %1894 = vmatpush.bf16.msra.mxu3 %v2752_v26  ;;  %v3642_v42 = vld [vmem:[%s3942_s29 + $0x144] sm:$0xf0]  ;;  %v2735_v43 = vld [vmem:[%s3942_s29 + $0x1c0] sm:$0xf]  ;;  %v2608_v46 = vor.u32 %v3626_v40, %v2607_v38  ;;  %v3608_v49 = vld [vmem:[%s3942_s29 + $0x34] sm:$0xf0] }
  0x20   : > { %v3658_v44 = vld [vmem:[%s3942_s29 + $0x1c4] sm:$0xf0]  ;;  %1856 = vmatpush.bf16.msra.mxu0 %v2552_v30  ;;  %v2672_v47 = vor.u32 %v3642_v42, %v2671_v41  ;;  %v2599_v50 = vld [vmem:[%s3942_s29 + $0xb0] sm:$0xf]  ;;  %v3624_v52 = vld [vmem:[%s3942_s29 + $0xb4] sm:$0xf0]  ;;  %v2536_v57 = vor.u32 %v3608_v49, %v2535_v48 }
  0x21   : > { %1869 = vmatpush.bf16.msra.mxu1 %v2616_v34  ;;  %v2736_v51 = vor.u32 %v3658_v44, %v2735_v43  ;;  %v2663_v53 = vld [vmem:[%s3942_s29 + $0x130] sm:$0xf]  ;;  %v3640_v54 = vld [vmem:[%s3942_s29 + $0x134] sm:$0xf0]  ;;  %v2600_v58 = vor.u32 %v3624_v52, %v2599_v50  ;;  %v2527_v60 = vld [vmem:[%s3942_s29 + $0x20] sm:$0xf] }
  0x22   : > { %1882 = vmatpush.bf16.msra.mxu2 %v2680_v35  ;;  %v2727_v55 = vld [vmem:[%s3942_s29 + $0x1b0] sm:$0xf]  ;;  %v3656_v56 = vld [vmem:[%s3942_s29 + $0x1b4] sm:$0xf0]  ;;  %v2664_v59 = vor.u32 %v3640_v54, %v2663_v53  ;;  %v3606_v61 = vld [vmem:[%s3942_s29 + $0x24] sm:$0xf0] }
  0x23   : > { %1895 = vmatpush.bf16.msra.mxu3 %v2744_v39  ;;  %v2591_v62 = vld [vmem:[%s3942_s29 + $0xa0] sm:$0xf]  ;;  %v2728_v63 = vor.u32 %v3656_v56, %v2727_v55  ;;  %v3622_v0 = vld [vmem:[%s3942_s29 + $0xa4] sm:$0xf0]  ;;  %v2528_v5 = vor.u32 %v3606_v61, %v2527_v60  ;;  %v2519_v8 = vld [vmem:[%s3942_s29 + $0x10] sm:$0xf] }
  0x24   : > { %1857 = vmatpush.bf16.msra.mxu0 %v2544_v45  ;;  %v2655_v1 = vld [vmem:[%s3942_s29 + $0x120] sm:$0xf]  ;;  %v3638_v2 = vld [vmem:[%s3942_s29 + $0x124] sm:$0xf0]  ;;  %v2592_v6 = vor.u32 %v3622_v0, %v2591_v62  ;;  %v3604_v9 = vld [vmem:[%s3942_s29 + $0x14] sm:$0xf0] }
  0x25   : > { %1870 = vmatpush.bf16.msra.mxu1 %v2608_v46  ;;  %v2719_v3 = vld [vmem:[%s3942_s29 + $0x1a0] sm:$0xf]  ;;  %v3654_v4 = vld [vmem:[%s3942_s29 + $0x1a4] sm:$0xf0]  ;;  %v2656_v7 = vor.u32 %v3638_v2, %v2655_v1  ;;  %v2583_v10 = vld [vmem:[%s3942_s29 + $0x90] sm:$0xf]  ;;  %v2520_v17 = vor.u32 %v3604_v9, %v2519_v8 }
  0x26   : > { %1883 = vmatpush.bf16.msra.mxu2 %v2672_v47  ;;  %v2720_v11 = vor.u32 %v3654_v4, %v2719_v3  ;;  %v3620_v12 = vld [vmem:[%s3942_s29 + $0x94] sm:$0xf0]  ;;  %v2647_v13 = vld [vmem:[%s3942_s29 + $0x110] sm:$0xf]  ;;  %v2511_v18 = vld [vmem:[%s3942_s29] sm:$0xf] }
  0x27   : > { %1896 = vmatpush.bf16.msra.mxu3 %v2736_v51  ;;  %v3636_v14 = vld [vmem:[%s3942_s29 + $0x114] sm:$0xf0]  ;;  %v2711_v15 = vld [vmem:[%s3942_s29 + $0x190] sm:$0xf]  ;;  %v3602_v19 = vld [vmem:[%s3942_s29 + $0x4] sm:$0xf0]  ;;  %v2584_v20 = vor.u32 %v3620_v12, %v2583_v10 }
  0x28   : > { %1858 = vmatpush.bf16.msra.mxu0 %v2536_v57  ;;  %v3652_v16 = vld [vmem:[%s3942_s29 + $0x194] sm:$0xf0]  ;;  %v2648_v21 = vor.u32 %v3636_v14, %v2647_v13  ;;  %v2575_v22 = vld [vmem:[%s3942_s29 + $0x80] sm:$0xf]  ;;  %v3618_v23 = vld [vmem:[%s3942_s29 + $0x84] sm:$0xf0]  ;;  %v2512_v32 = vor.u32 %v3602_v19, %v2511_v18 }
  0x29   : > { %1871 = vmatpush.bf16.msra.mxu1 %v2600_v58  ;;  %v2639_v24 = vld [vmem:[%s3942_s29 + $0x100] sm:$0xf]  ;;  %v2712_v25 = vor.u32 %v3652_v16, %v2711_v15  ;;  %v3634_v26 = vld [vmem:[%s3942_s29 + $0x104] sm:$0xf0]  ;;  %v2823_v29 = vld [vmem:[%s3942_s29 + $0x270] sm:$0xf]  ;;  %v2576_v36 = vor.u32 %v3618_v23, %v2575_v22 }
  0x2a   : > { %1884 = vmatpush.bf16.msra.mxu2 %v2664_v59  ;;  %v2703_v27 = vld [vmem:[%s3942_s29 + $0x180] sm:$0xf]  ;;  %v3650_v28 = vld [vmem:[%s3942_s29 + $0x184] sm:$0xf0]  ;;  %v3680_v30 = vld [vmem:[%s3942_s29 + $0x274] sm:$0xf0]  ;;  %v2640_v37 = vor.u32 %v3634_v26, %v2639_v24 }
  0x2b   : > { %1897 = vmatpush.bf16.msra.mxu3 %v2728_v63  ;;  %v2887_v31 = vld [vmem:[%s3942_s29 + $0x2f0] sm:$0xf]  ;;  %v3696_v33 = vld [vmem:[%s3942_s29 + $0x2f4] sm:$0xf0]  ;;  %v2704_v40 = vor.u32 %v3650_v28, %v2703_v27  ;;  %v2824_v41 = vor.u32 %v3680_v30, %v2823_v29  ;;  %v2815_v44 = vld [vmem:[%s3942_s29 + $0x260] sm:$0xf] }
  0x2c   : > { %1859 = vmatpush.bf16.msra.mxu0 %v2528_v5  ;;  %v2951_v34 = vld [vmem:[%s3942_s29 + $0x370] sm:$0xf]  ;;  %v3712_v35 = vld [vmem:[%s3942_s29 + $0x374] sm:$0xf0]  ;;  %v2888_v42 = vor.u32 %v3696_v33, %v2887_v31  ;;  %v3678_v45 = vld [vmem:[%s3942_s29 + $0x264] sm:$0xf0] }
  0x2d   : > { %1872 = vmatpush.bf16.msra.mxu1 %v2592_v6  ;;  %v3015_v38 = vld [vmem:[%s3942_s29 + $0x3f0] sm:$0xf]  ;;  %v3728_v39 = vld [vmem:[%s3942_s29 + $0x3f4] sm:$0xf0]  ;;  %v2952_v43 = vor.u32 %v3712_v35, %v2951_v34  ;;  %v2879_v46 = vld [vmem:[%s3942_s29 + $0x2e0] sm:$0xf]  ;;  %v2816_v53 = vor.u32 %v3678_v45, %v2815_v44 }
  0x2e   : > { %1885 = vmatpush.bf16.msra.mxu2 %v2656_v7  ;;  %v3016_v47 = vor.u32 %v3728_v39, %v3015_v38  ;;  %v3694_v48 = vld [vmem:[%s3942_s29 + $0x2e4] sm:$0xf0]  ;;  %v2943_v49 = vld [vmem:[%s3942_s29 + $0x360] sm:$0xf]  ;;  %v2807_v54 = vld [vmem:[%s3942_s29 + $0x250] sm:$0xf] }
  0x2f   : > { %1898 = vmatpush.bf16.msra.mxu3 %v2720_v11  ;;  %v3710_v50 = vld [vmem:[%s3942_s29 + $0x364] sm:$0xf0]  ;;  %v3007_v51 = vld [vmem:[%s3942_s29 + $0x3e0] sm:$0xf]  ;;  %v3676_v55 = vld [vmem:[%s3942_s29 + $0x254] sm:$0xf0]  ;;  %v2880_v56 = vor.u32 %v3694_v48, %v2879_v46 }
  0x30   : > { %1860 = vmatpush.bf16.msra.mxu0 %v2520_v17  ;;  %v3726_v52 = vld [vmem:[%s3942_s29 + $0x3e4] sm:$0xf0]  ;;  %v2944_v57 = vor.u32 %v3710_v50, %v2943_v49  ;;  %v2871_v58 = vld [vmem:[%s3942_s29 + $0x2d0] sm:$0xf]  ;;  %v3692_v59 = vld [vmem:[%s3942_s29 + $0x2d4] sm:$0xf0]  ;;  %v2808_v3 = vor.u32 %v3676_v55, %v2807_v54 }
  0x31   : > { %1873 = vmatpush.bf16.msra.mxu1 %v2584_v20  ;;  %v244_v60 = vld [vmem:[%s3937_s25 + $0x8] sm:$0xff]  ;;  %v3008_v61 = vor.u32 %v3726_v52, %v3007_v51  ;;  %v2935_v62 = vld [vmem:[%s3942_s29 + $0x350] sm:$0xf]  ;;  %v3708_v63 = vld [vmem:[%s3942_s29 + $0x354] sm:$0xf0]  ;;  %v2872_v7 = vor.u32 %v3692_v59, %v2871_v58  ;;  %vm2273_vm0 = vcmask 1043456  }
  0x32   : > { %1886 = vmatpush.bf16.msra.mxu2 %v2648_v21  ;;  %261 = vst [vmem:[#allocation1 + $0x10] ss:$2 sm:$0xff] %v244_v60  ;;  %v2999_v0 = vld [vmem:[%s3942_s29 + $0x3d0] sm:$0xf]  ;;  %v3724_v1 = vld [vmem:[%s3942_s29 + $0x3d4] sm:$0xf0]  ;;  %v2936_v8 = vor.u32 %v3708_v63, %v2935_v62 }
  0x33   : > { %1899 = vmatpush.bf16.msra.mxu3 %v2712_v25  ;;  %v2799_v2 = vld [vmem:[%s3942_s29 + $0x240] sm:$0xf]  ;;  %v3674_v4 = vld [vmem:[%s3942_s29 + $0x244] sm:$0xf0]  ;;  %v3000_v12 = vor.u32 %v3724_v1, %v2999_v0  ;;  %v2791_v15 = vld [vmem:[%s3942_s29 + $0x230] sm:$0xf] }
  0x34   : > { %1861 = vmatpush.bf16.msra.mxu0 %v2512_v32  ;;  %v2863_v5 = vld [vmem:[%s3942_s29 + $0x2c0] sm:$0xf]  ;;  %v3690_v6 = vld [vmem:[%s3942_s29 + $0x2c4] sm:$0xf0]  ;;  %v3672_v16 = vld [vmem:[%s3942_s29 + $0x234] sm:$0xf0]  ;;  %v2800_v18 = vor.u32 %v3674_v4, %v2799_v2 }
  0x35   : > { %1874 = vmatpush.bf16.msra.mxu1 %v2576_v36  ;;  %v2927_v9 = vld [vmem:[%s3942_s29 + $0x340] sm:$0xf]  ;;  %v3706_v10 = vld [vmem:[%s3942_s29 + $0x344] sm:$0xf0]  ;;  %v2855_v19 = vld [vmem:[%s3942_s29 + $0x2b0] sm:$0xf]  ;;  %v2864_v22 = vor.u32 %v3690_v6, %v2863_v5  ;;  %v2792_v34 = vor.u32 %v3672_v16, %v2791_v15 }
  0x36   : > { %1887 = vmatpush.bf16.msra.mxu2 %v2640_v37  ;;  %v243_v11 = vld [vmem:[%s3937_s25] sm:$0xff]  ;;  %v3722_v14 = vld [vmem:[%s3942_s29 + $0x3c4] sm:$0xf0]  ;;  %v3688_v20 = vld [vmem:[%s3942_s29 + $0x2b4] sm:$0xf0]  ;;  %v2928_v23 = vor.u32 %v3706_v10, %v2927_v9  ;;  %p3533_p6 = scmp.ne.s32.totalorder %s3928_s19, 3 }
  0x37   : > { %1900 = vmatpush.bf16.msra.mxu3 %v2704_v40  ;;  %v2991_v13 = vld [vmem:[%s3942_s29 + $0x3c0] sm:$0xf]  ;;  %259 = vst [vmem:[#allocation1] ss:$2 sm:$0xff] %v243_v11  ;;  %v248_v17 = vld [vmem:[%s3937_s25 + $0x28] sm:$0xff]  ;;  %v2856_v38 = vor.u32 %v3688_v20, %v2855_v19  ;;  %v246_v63 = vld [vmem:[%s3937_s25 + $0x18] sm:$0xff] }
  0x38   : > { %1906 = vmatpush.bf16.msrb.mxu0 %v2824_v41  ;;  %v2919_v21 = vld [vmem:[%s3942_s29 + $0x330] sm:$0xf]  ;;  %v2992_v26 = vor.u32 %v3722_v14, %v2991_v13  ;;  %v3704_v27 = vld [vmem:[%s3942_s29 + $0x334] sm:$0xf0]  ;;  %v2783_v31 = vld [vmem:[%s3942_s29 + $0x220] sm:$0xf] }
  0x39   : > { %1919 = vmatpush.bf16.msrb.mxu1 %v2888_v42  ;;  %v268_v24 = vld.sshfl [vmem:[#allocation1 + $0x10] sm:$0xff pattern:$0x75316420]  ;;  %v269_v25 = vld.sshfl [vmem:[#allocation1 + $0x18] sm:$0xff pattern:$0x75316420]  ;;  %v2920_v39 = vor.u32 %v3704_v27, %v2919_v21 }
  0x3a   : > { %1932 = vmatpush.bf16.msrb.mxu2 %v2952_v43  ;;  %v2983_v28 = vld [vmem:[%s3942_s29 + $0x3b0] sm:$0xf]  ;;  %v4051_v29 = vpack.c.bf16 %v268_v24, %v268_v24  ;;  %275 = vst [vmem:[#allocation1 + $0x10] ss:$2 sm:$0xff] %v248_v17  ;;  %v3720_v30 = vld [vmem:[%s3942_s29 + $0x3b4] sm:$0xf0]  ;;  %v4055_v32 = vpack.c.bf16 %v269_v25, %v269_v25 }
  0x3b   : > { %1945 = vmatpush.bf16.msrb.mxu3 %v3016_v47  ;;  %v247_v33 = vld [vmem:[%s3937_s25 + $0x20] sm:$0xff]  ;;  %v3670_v35 = vld [vmem:[%s3942_s29 + $0x224] sm:$0xf0]  ;;  %v2984_v42 = vor.u32 %v3720_v30, %v2983_v28  ;;  %v2775_v50 = vld [vmem:[%s3942_s29 + $0x210] sm:$0xf] }
  0x3c   : > { %1907 = vmatpush.bf16.msrb.mxu0 %v2816_v53  ;;  %1888 = vmatmul.bf16.vlgmr.msra.gmra.mxu2 %v4051_v29  ;;  %v2847_v36 = vld [vmem:[%s3942_s29 + $0x2a0] sm:$0xf]  ;;  %v3686_v37 = vld [vmem:[%s3942_s29 + $0x2a4] sm:$0xf0]  ;;  %v2784_v49 = vor.u32 %v3670_v35, %v2783_v31  ;;  %v3668_v51 = vld [vmem:[%s3942_s29 + $0x214] sm:$0xf0] }
  0x3d   : > { %1920 = vmatpush.bf16.msrb.mxu1 %v2880_v56  ;;  %v2911_v43 = vld [vmem:[%s3942_s29 + $0x320] sm:$0xf]  ;;  %v3702_v44 = vld [vmem:[%s3942_s29 + $0x324] sm:$0xf0]  ;;  %1901 = vmatmul.bf16.vlgmr.msra.gmra.mxu3 %v4055_v32  ;;  %v2848_v52 = vor.u32 %v3686_v37, %v2847_v36  ;;  %v2839_v54 = vld [vmem:[%s3942_s29 + $0x290] sm:$0xf]  ;;  %v2776_v0 = vor.u32 %v3668_v51, %v2775_v50 }
  0x3e   : > { %1933 = vmatpush.bf16.msrb.mxu2 %v2944_v57  ;;  %v266_v40 = vld.sshfl [vmem:[#allocation1] sm:$0xff pattern:$0x75316420]  ;;  %v267_v41 = vld.sshfl [vmem:[#allocation1 + $0x8] sm:$0xff pattern:$0x75316420]  ;;  %v2912_v53 = vor.u32 %v3702_v44, %v2911_v43 }
  0x3f   : > { %1946 = vmatpush.bf16.msrb.mxu3 %v3008_v61  ;;  %v4064_v45 = vpack.c.bf16 %v266_v40, %v266_v40  ;;  %274 = vst [vmem:[#allocation1] ss:$2 sm:$0xff] %v247_v33  ;;  %v4066_v46 = vpack.c.bf16 %v267_v41, %v267_v41  ;;  %v2975_v47 = vld [vmem:[%s3942_s29 + $0x3a0] sm:$0xf]  ;;  %v3718_v48 = vld [vmem:[%s3942_s29 + $0x3a4] sm:$0xf0] }
  0x40   : > { %1908 = vmatpush.bf16.msrb.mxu0 %v2808_v3  ;;  %v3684_v55 = vld [vmem:[%s3942_s29 + $0x294] sm:$0xf0]  ;;  %v2903_v56 = vld [vmem:[%s3942_s29 + $0x310] sm:$0xf]  ;;  %v2976_v57 = vor.u32 %v3718_v48, %v2975_v47  ;;  %v2767_v61 = vld [vmem:[%s3942_s29 + $0x200] sm:$0xf] }
  0x41   : > { %1921 = vmatpush.bf16.msrb.mxu1 %v2872_v7  ;;  %1862 = vmatmul.bf16.vlgmr.msra.gmra.mxu0 %v4064_v45  ;;  %v3700_v58 = vld [vmem:[%s3942_s29 + $0x314] sm:$0xf0]  ;;  %v2967_v59 = vld [vmem:[%s3942_s29 + $0x390] sm:$0xf]  ;;  %v3666_v62 = vld [vmem:[%s3942_s29 + $0x204] sm:$0xf0]  ;;  %v2840_v5 = vor.u32 %v3684_v55, %v2839_v54 }
  0x42   : > { %1934 = vmatpush.bf16.msrb.mxu2 %v2936_v8  ;;  %1875 = vmatmul.bf16.vlgmr.msra.gmra.mxu1 %v4066_v46  ;;  %v3716_v60 = vld [vmem:[%s3942_s29 + $0x394] sm:$0xf0]  ;;  %v2831_v1 = vld [vmem:[%s3942_s29 + $0x280] sm:$0xf]  ;;  %v3682_v2 = vld [vmem:[%s3942_s29 + $0x284] sm:$0xf0]  ;;  %v2904_v6 = vor.u32 %v3700_v58, %v2903_v56  ;;  %v2768_v16 = vor.u32 %v3666_v62, %v2767_v61 }
  0x43   : > { %1947 = vmatpush.bf16.msrb.mxu3 %v3000_v12  ;;  %v2895_v3 = vld [vmem:[%s3942_s29 + $0x300] sm:$0xf]  ;;  %265 = vst [vmem:[#allocation1 + $0x30] ss:$2 sm:$0xff] %v246_v63  ;;  %v245_v4 = vld [vmem:[%s3937_s25 + $0x10] sm:$0xff]  ;;  %v2968_v9 = vor.u32 %v3716_v60, %v2967_v59  ;;  %v2832_v20 = vor.u32 %v3682_v2, %v2831_v1  ;;  %v250_v24 = vld [vmem:[%s3937_s25 + $0x38] sm:$0xff] }
  0x44   : > { %1909 = vmatpush.bf16.msrb.mxu0 %v2800_v18  ;;  %v3698_v7 = vld [vmem:[%s3942_s29 + $0x304] sm:$0xf0]  ;;  %v2959_v8 = vld [vmem:[%s3942_s29 + $0x380] sm:$0xf]  ;;  %263 = vst [vmem:[#allocation1 + $0x20] ss:$2 sm:$0xff] %v245_v4 }
  0x45   : > { %1922 = vmatpush.bf16.msrb.mxu1 %v2864_v22  ;;  %v3714_v10 = vld [vmem:[%s3942_s29 + $0x384] sm:$0xf0]  ;;  %v3079_v11 = vld [vmem:[%s3942_s29 + $0x470] sm:$0xf]  ;;  %v3744_v12 = vld [vmem:[%s3942_s29 + $0x474] sm:$0xf0]  ;;  %v2896_v21 = vor.u32 %v3698_v7, %v2895_v3 }
  0x46   : > { %1935 = vmatpush.bf16.msrb.mxu2 %v2928_v23  ;;  %v3143_v13 = vld [vmem:[%s3942_s29 + $0x4f0] sm:$0xf]  ;;  %v3760_v14 = vld [vmem:[%s3942_s29 + $0x4f4] sm:$0xf0]  ;;  %v3071_v22 = vld [vmem:[%s3942_s29 + $0x460] sm:$0xf]  ;;  %v2960_v25 = vor.u32 %v3714_v10, %v2959_v8 }
  0x47   : > { %1948 = vmatpush.bf16.msrb.mxu3 %v2992_v26  ;;  %v3207_v15 = vld [vmem:[%s3942_s29 + $0x570] sm:$0xf]  ;;  %v3776_v17 = vld [vmem:[%s3942_s29 + $0x574] sm:$0xf0]  ;;  %v3742_v23 = vld [vmem:[%s3942_s29 + $0x464] sm:$0xf0]  ;;  %v3080_v26 = vor.u32 %v3744_v12, %v3079_v11 }
  0x48   : > { %1910 = vmatpush.bf16.msrb.mxu0 %v2792_v34  ;;  %v3271_v18 = vld [vmem:[%s3942_s29 + $0x5f0] sm:$0xf]  ;;  %v3792_v19 = vld [vmem:[%s3942_s29 + $0x5f4] sm:$0xf0]  ;;  %v3135_v27 = vld [vmem:[%s3942_s29 + $0x4e0] sm:$0xf]  ;;  %v3144_v34 = vor.u32 %v3760_v14, %v3143_v13  ;;  %v3208_v35 = vor.u32 %v3776_v17, %v3207_v15  ;;  %v3072_v47 = vor.u32 %v3742_v23, %v3071_v22 }
  0x49   : > { %1923 = vmatpush.bf16.msrb.mxu1 %v2856_v38  ;;  %v3758_v28 = vld [vmem:[%s3942_s29 + $0x4e4] sm:$0xf0]  ;;  %v3199_v30 = vld [vmem:[%s3942_s29 + $0x560] sm:$0xf]  ;;  %v249_v33 = vld [vmem:[%s3937_s25 + $0x30] sm:$0xff]  ;;  %v3272_v38 = vor.u32 %v3792_v19, %v3271_v18 }
  0x4a   : > { %1936 = vmatpush.bf16.msrb.mxu2 %v2920_v39  ;;  %v3774_v31 = vld [vmem:[%s3942_s29 + $0x564] sm:$0xf0]  ;;  %v272_v36 = vld.sshfl [vmem:[#allocation1 + $0x30] sm:$0xff pattern:$0x75316420] }
  0x4b   : > { %1949 = vmatpush.bf16.msrb.mxu3 %v2984_v42  ;;  %v273_v37 = vld.sshfl [vmem:[#allocation1 + $0x38] sm:$0xff pattern:$0x75316420]  ;;  %v3263_v39 = vld [vmem:[%s3942_s29 + $0x5e0] sm:$0xf]  ;;  %v4109_v41 = vpack.c.bf16 %v272_v36, %v272_v36  ;;  %v3200_v50 = vor.u32 %v3774_v31, %v3199_v30 }
  0x4c   : > { %1911 = vmatpush.bf16.msrb.mxu0 %v2784_v49  ;;  %v3790_v40 = vld [vmem:[%s3942_s29 + $0x5e4] sm:$0xf0]  ;;  %277 = vst [vmem:[#allocation1 + $0x30] ss:$2 sm:$0xff] %v250_v24  ;;  %v4111_v43 = vpack.c.bf16 %v273_v37, %v273_v37  ;;  %v3136_v49 = vor.u32 %v3758_v28, %v3135_v27  ;;  %v3063_v51 = vld [vmem:[%s3942_s29 + $0x450] sm:$0xf] }
  0x4d   : > { %1924 = vmatpush.bf16.msrb.mxu1 %v2848_v52  ;;  %v270_v42 = vld.sshfl [vmem:[#allocation1 + $0x20] sm:$0xff pattern:$0x75316420]  ;;  %v271_v44 = vld.sshfl [vmem:[#allocation1 + $0x28] sm:$0xff pattern:$0x75316420]  ;;  %v3264_v54 = vor.u32 %v3790_v40, %v3263_v39 }
  0x4e   : > { %1937 = vmatpush.bf16.msrb.mxu2 %v2912_v53  ;;  %276 = vst [vmem:[#allocation1 + $0x20] ss:$2 sm:$0xff] %v249_v33  ;;  %v4113_v48 = vpack.c.bf16 %v271_v44, %v271_v44  ;;  %v3740_v52 = vld [vmem:[%s3942_s29 + $0x454] sm:$0xf0]  ;;  %v3127_v53 = vld [vmem:[%s3942_s29 + $0x4d0] sm:$0xf]  ;;  %v4119_v55 = vpack.c.bf16 %v270_v42, %v270_v42 }
  0x4f   : > { %1950 = vmatpush.bf16.msrb.mxu3 %v2976_v57  ;;  %v3756_v56 = vld [vmem:[%s3942_s29 + $0x4d4] sm:$0xf0]  ;;  %v3191_v57 = vld [vmem:[%s3942_s29 + $0x550] sm:$0xf]  ;;  %v3064_v61 = vor.u32 %v3740_v52, %v3063_v51  ;;  %v3738_v1 = vld [vmem:[%s3942_s29 + $0x444] sm:$0xf0] }
  0x50   : > { %1912 = vmatpush.bf16.msrb.mxu0 %v2776_v0  ;;  %v3772_v58 = vld [vmem:[%s3942_s29 + $0x554] sm:$0xf0]  ;;  %v3255_v59 = vld [vmem:[%s3942_s29 + $0x5d0] sm:$0xf]  ;;  %v3128_v62 = vor.u32 %v3756_v56, %v3127_v53  ;;  %v3055_v0 = vld [vmem:[%s3942_s29 + $0x440] sm:$0xf] }
  0x51   : > { %1925 = vmatpush.bf16.msrb.mxu1 %v2840_v5  ;;  %v3788_v60 = vld [vmem:[%s3942_s29 + $0x5d4] sm:$0xf0]  ;;  %v3192_v63 = vor.u32 %v3772_v58, %v3191_v57  ;;  %v3119_v2 = vld [vmem:[%s3942_s29 + $0x4c0] sm:$0xf]  ;;  %v3754_v4 = vld [vmem:[%s3942_s29 + $0x4c4] sm:$0xf0] }
  0x52   : > { %1938 = vmatpush.bf16.msrb.mxu2 %v2904_v6  ;;  %v3256_v3 = vor.u32 %v3788_v60, %v3255_v59  ;;  %v3183_v5 = vld [vmem:[%s3942_s29 + $0x540] sm:$0xf]  ;;  %v3770_v6 = vld [vmem:[%s3942_s29 + $0x544] sm:$0xf0]  ;;  %v3120_v10 = vor.u32 %v3754_v4, %v3119_v2  ;;  %v3047_v12 = vld [vmem:[%s3942_s29 + $0x430] sm:$0xf] }
  0x53   : > { %1951 = vmatpush.bf16.msrb.mxu3 %v2968_v9  ;;  %v3247_v7 = vld [vmem:[%s3942_s29 + $0x5c0] sm:$0xf]  ;;  %v3786_v8 = vld [vmem:[%s3942_s29 + $0x5c4] sm:$0xf0]  ;;  %v3056_v9 = vor.u32 %v3738_v1, %v3055_v0  ;;  %v3184_v11 = vor.u32 %v3770_v6, %v3183_v5  ;;  %v3736_v13 = vld [vmem:[%s3942_s29 + $0x434] sm:$0xf0] }
  0x54   : > { %1913 = vmatpush.bf16.msrb.mxu0 %v2768_v16  ;;  %v3111_v14 = vld [vmem:[%s3942_s29 + $0x4b0] sm:$0xf]  ;;  %v3248_v15 = vor.u32 %v3786_v8, %v3247_v7  ;;  %v3752_v16 = vld [vmem:[%s3942_s29 + $0x4b4] sm:$0xf0]  ;;  %v3039_v24 = vld [vmem:[%s3942_s29 + $0x420] sm:$0xf] }
  0x55   : > { %1926 = vmatpush.bf16.msrb.mxu1 %v2832_v20  ;;  %v3175_v17 = vld [vmem:[%s3942_s29 + $0x530] sm:$0xf]  ;;  %v3768_v18 = vld [vmem:[%s3942_s29 + $0x534] sm:$0xf0]  ;;  %v3112_v22 = vor.u32 %v3752_v16, %v3111_v14  ;;  %v3750_v28 = vld [vmem:[%s3942_s29 + $0x4a4] sm:$0xf0] }
  0x56   : > { %1939 = vmatpush.bf16.msrb.mxu2 %v2896_v21  ;;  %v3239_v19 = vld [vmem:[%s3942_s29 + $0x5b0] sm:$0xf]  ;;  %v3784_v20 = vld [vmem:[%s3942_s29 + $0x5b4] sm:$0xf0]  ;;  %v3048_v21 = vor.u32 %v3736_v13, %v3047_v12  ;;  %v3176_v23 = vor.u32 %v3768_v18, %v3175_v17  ;;  %v3167_v30 = vld [vmem:[%s3942_s29 + $0x520] sm:$0xf] }
  0x57   : > { %1952 = vmatpush.bf16.msrb.mxu3 %v2960_v25  ;;  %1914 = vmatmul.bf16.vlgmr.msrb.gmra.mxu0 %v4119_v55  ;;  %v3734_v25 = vld [vmem:[%s3942_s29 + $0x424] sm:$0xf0]  ;;  %v3240_v27 = vor.u32 %v3784_v20, %v3239_v19  ;;  %v3231_v33 = vld [vmem:[%s3942_s29 + $0x5a0] sm:$0xf]  ;;  %v3732_v39 = vld [vmem:[%s3942_s29 + $0x414] sm:$0xf0] }
  0x58   : > { %1958 = vmatpush.bf16.msra.mxu0 %v3080_v26  ;;  %1927 = vmatmul.bf16.vlgmr.msrb.gmra.mxu1 %v4113_v48  ;;  %v3103_v26 = vld [vmem:[%s3942_s29 + $0x4a0] sm:$0xf]  ;;  %v3766_v31 = vld [vmem:[%s3942_s29 + $0x524] sm:$0xf0]  ;;  %v3095_v40 = vld [vmem:[%s3942_s29 + $0x490] sm:$0xf] }
  0x59   : > { %1971 = vmatpush.bf16.msra.mxu1 %v3144_v34  ;;  %1940 = vmatmul.bf16.vlgmr.msrb.gmra.mxu2 %v4109_v41  ;;  %v3782_v34 = vld [vmem:[%s3942_s29 + $0x5a4] sm:$0xf0]  ;;  %v3104_v36 = vor.u32 %v3750_v28, %v3103_v26  ;;  %v3168_v37 = vor.u32 %v3766_v31, %v3167_v30  ;;  %v3748_v44 = vld [vmem:[%s3942_s29 + $0x494] sm:$0xf0]  ;;  %v3023_v52 = vld [vmem:[%s3942_s29 + $0x400] sm:$0xf] }
  0x5a   : > { %1984 = vmatpush.bf16.msra.mxu2 %v3208_v35  ;;  %1953 = vmatmul.bf16.vlgmr.msrb.gmra.mxu3 %v4111_v43  ;;  %v3040_v35 = vor.u32 %v3734_v25, %v3039_v24  ;;  %v3232_v42 = vor.u32 %v3782_v34, %v3231_v33  ;;  %v3780_v51 = vld [vmem:[%s3942_s29 + $0x594] sm:$0xf0]  ;;  %v3087_v56 = vld [vmem:[%s3942_s29 + $0x480] sm:$0xf]  ;;  %v3746_v57 = vld [vmem:[%s3942_s29 + $0x484] sm:$0xf0]  ;;  %v3096_v58 = vor.u32 %v3748_v44, %v3095_v40 }
  0x5b   : > { %1997 = vmatpush.bf16.msra.mxu3 %v3272_v38  ;;  %v3031_v38 = vld [vmem:[%s3942_s29 + $0x410] sm:$0xf]  ;;  %v3151_v60 = vld [vmem:[%s3942_s29 + $0x500] sm:$0xf]  ;;  %v3778_v0 = vld [vmem:[%s3942_s29 + $0x584] sm:$0xf0] }
  0x5c   : > { %1959 = vmatpush.bf16.msra.mxu0 %v3072_v47  ;;  %v3159_v47 = vld [vmem:[%s3942_s29 + $0x510] sm:$0xf]  ;;  %v3032_v53 = vor.u32 %v3732_v39, %v3031_v38  ;;  %v3808_v2 = vld [vmem:[%s3942_s29 + $0x674] sm:$0xf0]  ;;  %v3327_v20 = vld [vmem:[%s3942_s29 + $0x660] sm:$0xf] }
  0x5d   : > { %1972 = vmatpush.bf16.msra.mxu1 %v3136_v49  ;;  %v3764_v49 = vld [vmem:[%s3942_s29 + $0x514] sm:$0xf0]  ;;  %v3335_v1 = vld [vmem:[%s3942_s29 + $0x670] sm:$0xf]  ;;  %v3822_v25 = vld [vmem:[%s3942_s29 + $0x6e4] sm:$0xf0] }
  0x5e   : > { %1985 = vmatpush.bf16.msra.mxu2 %v3200_v50  ;;  %v3223_v50 = vld [vmem:[%s3942_s29 + $0x590] sm:$0xf]  ;;  %v3160_v59 = vor.u32 %v3764_v49, %v3159_v47  ;;  %v3824_v4 = vld [vmem:[%s3942_s29 + $0x6f4] sm:$0xf0]  ;;  %v3455_v26 = vld [vmem:[%s3942_s29 + $0x760] sm:$0xf] }
  0x5f   : > { %1998 = vmatpush.bf16.msra.mxu3 %v3264_v54  ;;  %v3730_v54 = vld [vmem:[%s3942_s29 + $0x404] sm:$0xf0]  ;;  %v3463_v5 = vld [vmem:[%s3942_s29 + $0x770] sm:$0xf]  ;;  %v3840_v7 = vld [vmem:[%s3942_s29 + $0x774] sm:$0xf0] }
  0x60   : > { %1960 = vmatpush.bf16.msra.mxu0 %v3064_v61  ;;  %v3762_v61 = vld [vmem:[%s3942_s29 + $0x504] sm:$0xf0]  ;;  %v3024_v6 = vor.u32 %v3730_v54, %v3023_v52  ;;  %v3527_v8 = vld [vmem:[%s3942_s29 + $0x7f0] sm:$0xf]  ;;  %v3464_v19 = vor.u32 %v3840_v7, %v3463_v5  ;;  %v3519_v31 = vld [vmem:[%s3942_s29 + $0x7e0] sm:$0xf] }
  0x61   : > { %1973 = vmatpush.bf16.msra.mxu1 %v3128_v62  ;;  %v3215_v62 = vld [vmem:[%s3942_s29 + $0x580] sm:$0xf]  ;;  %v280_v13 = vld.sshfl [vmem:[#allocation1 + $0x10] sm:$0xff pattern:$0x75316420] }
  0x62   : > { %1986 = vmatpush.bf16.msra.mxu2 %v3192_v63  ;;  %v3224_v63 = vor.u32 %v3780_v51, %v3223_v50  ;;  %v278_v12 = vld.sshfl [vmem:[#allocation1] sm:$0xff pattern:$0x75316420]  ;;  %v3216_v14 = vor.u32 %v3778_v0, %v3215_v62  ;;  %v279_v16 = vld.sshfl [vmem:[#allocation1 + $0x8] sm:$0xff pattern:$0x75316420]  ;;  %v4185_v28 = vpack.c.bf16 %v280_v13, %v280_v13 }
  0x63   : > { %1999 = vmatpush.bf16.msra.mxu3 %v3256_v3  ;;  %v3399_v3 = vld [vmem:[%s3942_s29 + $0x6f0] sm:$0xf]  ;;  %v281_v17 = vld.sshfl [vmem:[#allocation1 + $0x18] sm:$0xff pattern:$0x75316420]  ;;  %v4180_v24 = vpack.c.bf16 %v278_v12, %v278_v12  ;;  %v4187_v30 = vpack.c.bf16 %v279_v16, %v279_v16 }
  0x64   : > { %1961 = vmatpush.bf16.msra.mxu0 %v3056_v9  ;;  %v3856_v9 = vld [vmem:[%s3942_s29 + $0x7f4] sm:$0xf0]  ;;  %v3400_v18 = vor.u32 %v3824_v4, %v3399_v3  ;;  %v3854_v33 = vld [vmem:[%s3942_s29 + $0x7e4] sm:$0xf0]  ;;  %v4191_v34 = vpack.c.bf16 %v281_v17, %v281_v17  ;;  %v3319_v38 = vld [vmem:[%s3942_s29 + $0x650] sm:$0xf] }
  0x65   : > { %1974 = vmatpush.bf16.msra.mxu1 %v3120_v10  ;;  %v3088_v10 = vor.u32 %v3746_v57, %v3087_v56  ;;  %v3804_v39 = vld [vmem:[%s3942_s29 + $0x654] sm:$0xf0]  ;;  %v3383_v40 = vld [vmem:[%s3942_s29 + $0x6d0] sm:$0xf]  ;;  %v3311_v56 = vld [vmem:[%s3942_s29 + $0x640] sm:$0xf] }
  0x66   : > { %1987 = vmatpush.bf16.msra.mxu2 %v3184_v11  ;;  %v3152_v11 = vor.u32 %v3762_v61, %v3151_v60  ;;  %v3820_v44 = vld [vmem:[%s3942_s29 + $0x6d4] sm:$0xf0]  ;;  %v3447_v47 = vld [vmem:[%s3942_s29 + $0x750] sm:$0xf]  ;;  %v3320_v52 = vor.u32 %v3804_v39, %v3319_v38  ;;  %v3802_v57 = vld [vmem:[%s3942_s29 + $0x644] sm:$0xf0] }
  0x67   : > { %2000 = vmatpush.bf16.msra.mxu3 %v3248_v15  ;;  %v3336_v15 = vor.u32 %v3808_v2, %v3335_v1  ;;  %v3836_v49 = vld [vmem:[%s3942_s29 + $0x754] sm:$0xf0]  ;;  %v3511_v50 = vld [vmem:[%s3942_s29 + $0x7d0] sm:$0xf]  ;;  %v3818_v60 = vld [vmem:[%s3942_s29 + $0x6c4] sm:$0xf0]  ;;  %v3312_v1 = vor.u32 %v3802_v57, %v3311_v56 }
  0x68   : > { %1962 = vmatpush.bf16.msra.mxu0 %v3048_v21  ;;  %v3806_v21 = vld [vmem:[%s3942_s29 + $0x664] sm:$0xf0]  ;;  %v3852_v51 = vld [vmem:[%s3942_s29 + $0x7d4] sm:$0xf0]  ;;  %v3448_v54 = vor.u32 %v3836_v49, %v3447_v47  ;;  %v3439_v61 = vld [vmem:[%s3942_s29 + $0x740] sm:$0xf] }
  0x69   : > { %1975 = vmatpush.bf16.msra.mxu1 %v3112_v22  ;;  %v3391_v22 = vld [vmem:[%s3942_s29 + $0x6e0] sm:$0xf]  ;;  %v3834_v62 = vld [vmem:[%s3942_s29 + $0x744] sm:$0xf0]  ;;  %v3303_v4 = vld [vmem:[%s3942_s29 + $0x630] sm:$0xf] }
  0x6a   : > { %1988 = vmatpush.bf16.msra.mxu2 %v3176_v23  ;;  %v3528_v23 = vor.u32 %v3856_v9, %v3527_v8  ;;  %v3850_v0 = vld [vmem:[%s3942_s29 + $0x7c4] sm:$0xf0]  ;;  %v3440_v3 = vor.u32 %v3834_v62, %v3439_v61  ;;  %v3800_v5 = vld [vmem:[%s3942_s29 + $0x634] sm:$0xf0]  ;;  %v3431_v9 = vld [vmem:[%s3942_s29 + $0x730] sm:$0xf] }
  0x6b   : > { %2001 = vmatpush.bf16.msra.mxu3 %v3240_v27  ;;  %v3838_v27 = vld [vmem:[%s3942_s29 + $0x764] sm:$0xf0]  ;;  %v3816_v8 = vld [vmem:[%s3942_s29 + $0x6b4] sm:$0xf0]  ;;  %v3304_v13 = vor.u32 %v3800_v5, %v3303_v4  ;;  %v3295_v16 = vld [vmem:[%s3942_s29 + $0x620] sm:$0xf] }
  0x6c   : > { %1963 = vmatpush.bf16.msra.mxu0 %v3040_v35  ;;  %v3328_v35 = vor.u32 %v3806_v21, %v3327_v20  ;;  %v3848_v12 = vld [vmem:[%s3942_s29 + $0x7b4] sm:$0xf0]  ;;  %v3798_v17 = vld [vmem:[%s3942_s29 + $0x624] sm:$0xf0]  ;;  %v3423_v21 = vld [vmem:[%s3942_s29 + $0x720] sm:$0xf] }
  0x6d   : > { %1976 = vmatpush.bf16.msra.mxu1 %v3104_v36  ;;  %v3392_v36 = vor.u32 %v3822_v25, %v3391_v22  ;;  %v3814_v20 = vld [vmem:[%s3942_s29 + $0x6a4] sm:$0xf0]  ;;  %v3812_v38 = vld [vmem:[%s3942_s29 + $0x694] sm:$0xf0]  ;;  %v3415_v39 = vld [vmem:[%s3942_s29 + $0x710] sm:$0xf] }
  0x6e   : > { %1989 = vmatpush.bf16.msra.mxu2 %v3168_v37  ;;  %v3456_v37 = vor.u32 %v3838_v27, %v3455_v26  ;;  %v3830_v22 = vld [vmem:[%s3942_s29 + $0x724] sm:$0xf0]  ;;  %v3296_v26 = vor.u32 %v3798_v17, %v3295_v16  ;;  %v3279_v47 = vld [vmem:[%s3942_s29 + $0x600] sm:$0xf]  ;;  %v3615_v61 = vld [vmem:[%s3942_s29 + $0x74] sm:$0xf] }
  0x6f   : > { %2002 = vmatpush.bf16.msra.mxu3 %v3232_v42  ;;  %v3520_v42 = vor.u32 %v3854_v33, %v3519_v31  ;;  %v3846_v25 = vld [vmem:[%s3942_s29 + $0x7a4] sm:$0xf0]  ;;  %v3424_v31 = vor.u32 %v3830_v22, %v3423_v21  ;;  %v3287_v33 = vld [vmem:[%s3942_s29 + $0x610] sm:$0xf]  ;;  %v3407_v56 = vld [vmem:[%s3942_s29 + $0x700] sm:$0xf] }
  0x70   : > { %1964 = vmatpush.bf16.msra.mxu0 %v3032_v53  ;;  %v3384_v53 = vor.u32 %v3820_v44, %v3383_v40  ;;  %v3828_v40 = vld [vmem:[%s3942_s29 + $0x714] sm:$0xf0]  ;;  %v3826_v57 = vld [vmem:[%s3942_s29 + $0x704] sm:$0xf0]  ;;  %v2569_v62 = vld [vmem:[%s3942_s29 + $0x78] sm:$0xf0] }
  0x71   : > { %1977 = vmatpush.bf16.msra.mxu1 %v3096_v58  ;;  %v3375_v58 = vld [vmem:[%s3942_s29 + $0x6c0] sm:$0xf]  ;;  %v3844_v44 = vld [vmem:[%s3942_s29 + $0x794] sm:$0xf0]  ;;  %v3663_v4 = vld [vmem:[%s3942_s29 + $0x1f4] sm:$0xf] }
  0x72   : > { %1990 = vmatpush.bf16.msra.mxu2 %v3160_v59  ;;  %v3512_v59 = vor.u32 %v3852_v51, %v3511_v50  ;;  %v3376_v2 = vor.u32 %v3818_v60, %v3375_v58  ;;  %v3794_v50 = vld [vmem:[%s3942_s29 + $0x604] sm:$0xf0]  ;;  %v3343_v51 = vld [vmem:[%s3942_s29 + $0x680] sm:$0xf]  ;;  %v2761_v5 = vld [vmem:[%s3942_s29 + $0x1f8] sm:$0xf0] }
  0x73   : > { %2003 = vmatpush.bf16.msra.mxu3 %v3224_v63  ;;  %v3503_v63 = vld [vmem:[%s3942_s29 + $0x7c0] sm:$0xf]  ;;  %v3842_v60 = vld [vmem:[%s3942_s29 + $0x784] sm:$0xf0]  ;;  %v3613_v16 = vld [vmem:[%s3942_s29 + $0x64] sm:$0xf] }
  0x74   : > { %1965 = vmatpush.bf16.msra.mxu0 %v3024_v6  ;;  %v3367_v6 = vld [vmem:[%s3942_s29 + $0x6b0] sm:$0xf]  ;;  %v3504_v7 = vor.u32 %v3850_v0, %v3503_v63  ;;  %v3471_v58 = vld [vmem:[%s3942_s29 + $0x780] sm:$0xf]  ;;  %v3631_v63 = vld [vmem:[%s3942_s29 + $0xf4] sm:$0xf] }
  0x75   : > { %1978 = vmatpush.bf16.msra.mxu1 %v3088_v10  ;;  %v3832_v10 = vld [vmem:[%s3942_s29 + $0x734] sm:$0xf0]  ;;  %v2633_v0 = vld [vmem:[%s3942_s29 + $0xf8] sm:$0xf0]  ;;  %v2561_v17 = vld [vmem:[%s3942_s29 + $0x68] sm:$0xf0] }
  0x76   : > { %1991 = vmatpush.bf16.msra.mxu2 %v3152_v11  ;;  %v3495_v11 = vld [vmem:[%s3942_s29 + $0x7b0] sm:$0xf]  ;;  %v2625_v21 = vld [vmem:[%s3942_s29 + $0xe8] sm:$0xf0]  ;;  %v3645_v22 = vld [vmem:[%s3942_s29 + $0x164] sm:$0xf] }
  0x77   : > { %2004 = vmatpush.bf16.msra.mxu3 %v3216_v14  ;;  %1966 = vmatmul.bf16.vlgmr.msra.gmra.mxu0 %v4180_v24  ;;  %v3368_v14 = vor.u32 %v3816_v8, %v3367_v6  ;;  %v282_v8 = vld.sshfl [vmem:[#allocation1 + $0x20] sm:$0xff pattern:$0x75316420] }
  0x78   : > { %2010 = vmatpush.bf16.msrb.mxu0 %v3336_v15  ;;  %1979 = vmatmul.bf16.vlgmr.msra.gmra.mxu1 %v4187_v30  ;;  %v3432_v15 = vor.u32 %v3832_v10, %v3431_v9  ;;  %v284_v9 = vld.sshfl [vmem:[#allocation1 + $0x30] sm:$0xff pattern:$0x75316420]  ;;  %v3472_v10 = vor.u32 %v3842_v60, %v3471_v58  ;;  %v3625_v58 = vld [vmem:[%s3942_s29 + $0xc4] sm:$0xf] }
  0x79   : > { %2023 = vmatpush.bf16.msrb.mxu1 %v3400_v18  ;;  %1992 = vmatmul.bf16.vlgmr.msra.gmra.mxu2 %v4185_v28  ;;  %v3359_v18 = vld [vmem:[%s3942_s29 + $0x6a0] sm:$0xf]  ;;  %v2609_v60 = vld [vmem:[%s3942_s29 + $0xc8] sm:$0xf0] }
  0x7a   : > { %2036 = vmatpush.bf16.msrb.mxu2 %v3464_v19  ;;  %2005 = vmatmul.bf16.vlgmr.msra.gmra.mxu3 %v4191_v34  ;;  %v3496_v19 = vor.u32 %v3848_v12, %v3495_v11  ;;  %v3360_v27 = vor.u32 %v3814_v20, %v3359_v18  ;;  %v2572_v11 = vor.u32 %v3615_v61, %v2569_v62  ;;  %v283_v12 = vld.sshfl [vmem:[#allocation1 + $0x28] sm:$0xff pattern:$0x75316420]  ;;  %v3629_v18 = vld [vmem:[%s3942_s29 + $0xe4] sm:$0xf] }
  0x7b   : > { %2049 = vmatpush.bf16.msrb.mxu3 %v3528_v23  ;;  %v3487_v23 = vld [vmem:[%s3942_s29 + $0x7a0] sm:$0xf]  ;;  %v4256_v20 = vpack.c.bf16 %v282_v8, %v282_v8  ;;  %v3641_v61 = vld [vmem:[%s3942_s29 + $0x144] sm:$0xf]  ;;  %v2673_v62 = vld [vmem:[%s3942_s29 + $0x148] sm:$0xf0] }
  0x7c   : > { %2011 = vmatpush.bf16.msrb.mxu0 %v3328_v35  ;;  %v3796_v35 = vld [vmem:[%s3942_s29 + $0x614] sm:$0xf0]  ;;  %v2601_v8 = vld [vmem:[%s3942_s29 + $0xb8] sm:$0xf0] }
  0x7d   : > { %2024 = vmatpush.bf16.msrb.mxu1 %v3392_v36  ;;  %v3351_v36 = vld [vmem:[%s3942_s29 + $0x690] sm:$0xf]  ;;  %v3288_v49 = vor.u32 %v3796_v35, %v3287_v33  ;;  %v2564_v35 = vor.u32 %v3613_v16, %v2561_v17  ;;  %v3605_v16 = vld [vmem:[%s3942_s29 + $0x24] sm:$0xf]  ;;  %v2529_v17 = vld [vmem:[%s3942_s29 + $0x28] sm:$0xf0] }
  0x7e   : > { %2037 = vmatpush.bf16.msrb.mxu2 %v3456_v37  ;;  %v3488_v37 = vor.u32 %v3846_v25, %v3487_v23  ;;  %v2689_v23 = vld [vmem:[%s3942_s29 + $0x168] sm:$0xf0]  ;;  %v4261_v25 = vpack.c.bf16 %v284_v9, %v284_v9  ;;  %v3639_v9 = vld [vmem:[%s3942_s29 + $0x134] sm:$0xf] }
  0x7f   : > { %2050 = vmatpush.bf16.msrb.mxu3 %v3520_v42  ;;  %v3479_v42 = vld [vmem:[%s3942_s29 + $0x790] sm:$0xf] }
  0x80   : > { %2012 = vmatpush.bf16.msrb.mxu0 %v3320_v52  ;;  %v3810_v52 = vld [vmem:[%s3942_s29 + $0x684] sm:$0xf0] }
  0x81   : > { %2025 = vmatpush.bf16.msrb.mxu1 %v3384_v53  ;;  %v3352_v53 = vor.u32 %v3812_v38, %v3351_v36  ;;  %v3344_v6 = vor.u32 %v3810_v52, %v3343_v51  ;;  %v2628_v36 = vor.u32 %v3629_v18, %v2625_v21  ;;  %v3611_v38 = vld [vmem:[%s3942_s29 + $0x54] sm:$0xf]  ;;  %v2745_v51 = vld [vmem:[%s3942_s29 + $0x1d8] sm:$0xf0]  ;;  %v3621_v18 = vld [vmem:[%s3942_s29 + $0xa4] sm:$0xf] }
  0x82   : > { %2038 = vmatpush.bf16.msrb.mxu2 %v3448_v54  ;;  %v3416_v54 = vor.u32 %v3828_v40, %v3415_v39  ;;  %v2553_v39 = vld [vmem:[%s3942_s29 + $0x58] sm:$0xf0]  ;;  %v3627_v40 = vld [vmem:[%s3942_s29 + $0xd4] sm:$0xf]  ;;  %v2593_v21 = vld [vmem:[%s3942_s29 + $0xa8] sm:$0xf0] }
  0x83   : > { %2051 = vmatpush.bf16.msrb.mxu3 %v3512_v59  ;;  %v3480_v59 = vor.u32 %v3844_v44, %v3479_v42  ;;  %v2617_v44 = vld [vmem:[%s3942_s29 + $0xd8] sm:$0xf0]  ;;  %v2556_v52 = vor.u32 %v3611_v38, %v2553_v39  ;;  %v3603_v38 = vld [vmem:[%s3942_s29 + $0x14] sm:$0xf] }
  0x84   : > { %2013 = vmatpush.bf16.msrb.mxu0 %v3312_v1  ;;  %v3647_v1 = vld [vmem:[%s3942_s29 + $0x174] sm:$0xf]  ;;  %v2521_v39 = vld [vmem:[%s3942_s29 + $0x18] sm:$0xf0] }
  0x85   : > { %2026 = vmatpush.bf16.msrb.mxu1 %v3376_v2  ;;  %v3280_v2 = vor.u32 %v3794_v50, %v3279_v47  ;;  %v3643_v47 = vld [vmem:[%s3942_s29 + $0x154] sm:$0xf] }
  0x86   : > { %2039 = vmatpush.bf16.msrb.mxu2 %v3440_v3  ;;  %v2697_v3 = vld [vmem:[%s3942_s29 + $0x178] sm:$0xf0]  ;;  %v3659_v50 = vld [vmem:[%s3942_s29 + $0x1d4] sm:$0xf] }
  0x87   : > { %2052 = vmatpush.bf16.msrb.mxu3 %v3504_v7  ;;  %v3408_v7 = vor.u32 %v3826_v57, %v3407_v56  ;;  %v3609_v56 = vld [vmem:[%s3942_s29 + $0x44] sm:$0xf]  ;;  %v2545_v57 = vld [vmem:[%s3942_s29 + $0x48] sm:$0xf0] }
  0x88   : > { %2014 = vmatpush.bf16.msrb.mxu0 %v3304_v13  ;;  %v285_v13 = vld.sshfl [vmem:[#allocation1 + $0x38] sm:$0xff pattern:$0x75316420] }
  0x89   : > { %2027 = vmatpush.bf16.msrb.mxu1 %v3368_v14  ;;  %v2636_v14 = vor.u32 %v3631_v63, %v2633_v0  ;;  %v4267_v33 = vpack.c.bf16 %v285_v13, %v285_v13  ;;  %v3657_v63 = vld [vmem:[%s3942_s29 + $0x1c4] sm:$0xf]  ;;  %v2737_v0 = vld [vmem:[%s3942_s29 + $0x1c8] sm:$0xf0] }
  0x8a   : > { %2040 = vmatpush.bf16.msrb.mxu2 %v3432_v15  ;;  %v2700_v15 = vor.u32 %v3647_v1, %v2697_v3  ;;  %v2548_v1 = vor.u32 %v3609_v56, %v2545_v57  ;;  %v2676_v3 = vor.u32 %v3641_v61, %v2673_v62  ;;  %v2641_v62 = vld [vmem:[%s3942_s29 + $0x108] sm:$0xf0] }
  0x8b   : > { %2053 = vmatpush.bf16.msrb.mxu3 %v3496_v19  ;;  %v2764_v19 = vor.u32 %v3663_v4, %v2761_v5  ;;  %v3607_v4 = vld [vmem:[%s3942_s29 + $0x34] sm:$0xf]  ;;  %v2537_v5 = vld [vmem:[%s3942_s29 + $0x38] sm:$0xf0] }
  0x8c   : > { %2015 = vmatpush.bf16.msrb.mxu0 %v3296_v26  ;;  %v4263_v26 = vpack.c.bf16 %v283_v12, %v283_v12  ;;  %v2729_v12 = vld [vmem:[%s3942_s29 + $0x1b8] sm:$0xf0]  ;;  %v2540_v13 = vor.u32 %v3607_v4, %v2537_v5 }
  0x8d   : > { %2028 = vmatpush.bf16.msrb.mxu1 %v3360_v27  ;;  %v3661_v27 = vld [vmem:[%s3942_s29 + $0x1e4] sm:$0xf]  ;;  %v2889_v5 = vld [vmem:[%s3942_s29 + $0x2f8] sm:$0xf0] }
  0x8e   : > { %2041 = vmatpush.bf16.msrb.mxu2 %v3424_v31  ;;  %v2753_v31 = vld [vmem:[%s3942_s29 + $0x1e8] sm:$0xf0] }
  0x8f   : > { %2054 = vmatpush.bf16.msrb.mxu3 %v3488_v37  ;;  %v2692_v37 = vor.u32 %v3645_v22, %v2689_v23  ;;  %v2756_v42 = vor.u32 %v3661_v27, %v2753_v31  ;;  %v3637_v22 = vld [vmem:[%s3942_s29 + $0x124] sm:$0xf]  ;;  %v2657_v23 = vld [vmem:[%s3942_s29 + $0x128] sm:$0xf0] }
  0x90   : > { %2016 = vmatpush.bf16.msrb.mxu0 %v3288_v49  ;;  %v2681_v49 = vld [vmem:[%s3942_s29 + $0x158] sm:$0xf0]  ;;  %v3653_v27 = vld [vmem:[%s3942_s29 + $0x1a4] sm:$0xf]  ;;  %v2721_v31 = vld [vmem:[%s3942_s29 + $0x1a8] sm:$0xf0] }
  0x91   : > { %2029 = vmatpush.bf16.msrb.mxu1 %v3352_v53  ;;  %v2620_v53 = vor.u32 %v3627_v40, %v2617_v44  ;;  %v3619_v40 = vld [vmem:[%s3942_s29 + $0x94] sm:$0xf]  ;;  %v2585_v44 = vld [vmem:[%s3942_s29 + $0x98] sm:$0xf0] }
  0x92   : > { %2042 = vmatpush.bf16.msrb.mxu2 %v3416_v54  ;;  %v2684_v54 = vor.u32 %v3643_v47, %v2681_v49  ;;  %v3635_v47 = vld [vmem:[%s3942_s29 + $0x114] sm:$0xf]  ;;  %v2649_v49 = vld [vmem:[%s3942_s29 + $0x118] sm:$0xf0]  ;;  %v2588_v56 = vor.u32 %v3619_v40, %v2585_v44 }
  0x93   : > { %2055 = vmatpush.bf16.msrb.mxu3 %v3480_v59  ;;  %v2748_v59 = vor.u32 %v3659_v50, %v2745_v51  ;;  %v3651_v50 = vld [vmem:[%s3942_s29 + $0x194] sm:$0xf]  ;;  %v2713_v51 = vld [vmem:[%s3942_s29 + $0x198] sm:$0xf0]  ;;  %v2652_v57 = vor.u32 %v3635_v47, %v2649_v49 }
  0x94   : > { %2017 = vmatpush.bf16.msrb.mxu0 %v3280_v2  ;;  %v2612_v2 = vor.u32 %v3625_v58, %v2609_v60  ;;  %v3617_v58 = vld [vmem:[%s3942_s29 + $0x84] sm:$0xf]  ;;  %v2716_v61 = vor.u32 %v3651_v50, %v2713_v51  ;;  %v3691_v40 = vld [vmem:[%s3942_s29 + $0x2d4] sm:$0xf]  ;;  %v2873_v44 = vld [vmem:[%s3942_s29 + $0x2d8] sm:$0xf0] }
  0x95   : > { %2030 = vmatpush.bf16.msrb.mxu1 %v3344_v6  ;;  %v3623_v6 = vld [vmem:[%s3942_s29 + $0xb4] sm:$0xf]  ;;  %v3633_v60 = vld [vmem:[%s3942_s29 + $0x104] sm:$0xf]  ;;  %v2937_v49 = vld [vmem:[%s3942_s29 + $0x358] sm:$0xf0] }
  0x96   : > { %2043 = vmatpush.bf16.msrb.mxu2 %v3408_v7  ;;  %v2740_v7 = vor.u32 %v3657_v63, %v2737_v0  ;;  %v3649_v63 = vld [vmem:[%s3942_s29 + $0x184] sm:$0xf]  ;;  %v2705_v0 = vld [vmem:[%s3942_s29 + $0x188] sm:$0xf0]  ;;  %v3707_v47 = vld [vmem:[%s3942_s29 + $0x354] sm:$0xf] }
  0x97   : > { %2056 = vmatpush.bf16.msrb.mxu3 %v3472_v10  ;;  %2018 = vmatmul.bf16.vlgmr.msrb.gmra.mxu0 %v4256_v20  ;;  %v2665_v10 = vld [vmem:[%s3942_s29 + $0x138] sm:$0xf0]  ;;  %v3723_v50 = vld [vmem:[%s3942_s29 + $0x3d4] sm:$0xf] }
  0x98   : > { %2062 = vmatpush.bf16.msra.mxu0 %v2572_v11  ;;  %2031 = vmatmul.bf16.vlgmr.msrb.gmra.mxu1 %v4263_v26  ;;  %v3655_v11 = vld [vmem:[%s3942_s29 + $0x1b4] sm:$0xf]  ;;  %v3001_v51 = vld [vmem:[%s3942_s29 + $0x3d8] sm:$0xf0] }
  0x99   : > { %2075 = vmatpush.bf16.msra.mxu1 %v2636_v14  ;;  %2044 = vmatmul.bf16.vlgmr.msrb.gmra.mxu2 %v4261_v25  ;;  %v2604_v14 = vor.u32 %v3623_v6, %v2601_v8  ;;  %v3711_v6 = vld [vmem:[%s3942_s29 + $0x374] sm:$0xf] }
  0x9a   : > { %2088 = vmatpush.bf16.msra.mxu2 %v2700_v15  ;;  %2057 = vmatmul.bf16.vlgmr.msrb.gmra.mxu3 %v4267_v33  ;;  %v2668_v15 = vor.u32 %v3639_v9, %v2665_v10  ;;  %v2644_v9 = vor.u32 %v3633_v60, %v2641_v62  ;;  %v3727_v10 = vld [vmem:[%s3942_s29 + $0x3f4] sm:$0xf]  ;;  %v3721_v60 = vld [vmem:[%s3942_s29 + $0x3c4] sm:$0xf] }
  0x9b   : > { %2101 = vmatpush.bf16.msra.mxu3 %v2764_v19  ;;  %v2732_v19 = vor.u32 %v3655_v11, %v2729_v12  ;;  %v3017_v11 = vld [vmem:[%s3942_s29 + $0x3f8] sm:$0xf0]  ;;  %v2708_v12 = vor.u32 %v3649_v63, %v2705_v0  ;;  %v3671_v0 = vld [vmem:[%s3942_s29 + $0x234] sm:$0xf] }
  0x9c   : > { %2063 = vmatpush.bf16.msra.mxu0 %v2564_v35  ;;  %v2532_v35 = vor.u32 %v3605_v16, %v2529_v17  ;;  %v3677_v16 = vld [vmem:[%s3942_s29 + $0x264] sm:$0xf]  ;;  %v2817_v17 = vld [vmem:[%s3942_s29 + $0x268] sm:$0xf0] }
  0x9d   : > { %2076 = vmatpush.bf16.msra.mxu1 %v2628_v36  ;;  %v2596_v36 = vor.u32 %v3621_v18, %v2593_v21  ;;  %v3693_v18 = vld [vmem:[%s3942_s29 + $0x2e4] sm:$0xf]  ;;  %v2881_v21 = vld [vmem:[%s3942_s29 + $0x2e8] sm:$0xf0] }
  0x9e   : > { %2089 = vmatpush.bf16.msra.mxu2 %v2692_v37  ;;  %v2660_v37 = vor.u32 %v3637_v22, %v2657_v23  ;;  %v3709_v22 = vld [vmem:[%s3942_s29 + $0x364] sm:$0xf]  ;;  %v2945_v23 = vld [vmem:[%s3942_s29 + $0x368] sm:$0xf0] }
  0x9f   : > { %2102 = vmatpush.bf16.msra.mxu3 %v2756_v42  ;;  %v2724_v42 = vor.u32 %v3653_v27, %v2721_v31  ;;  %v3725_v27 = vld [vmem:[%s3942_s29 + $0x3e4] sm:$0xf]  ;;  %v3009_v31 = vld [vmem:[%s3942_s29 + $0x3e8] sm:$0xf0] }
  0xa0   : > { %2064 = vmatpush.bf16.msra.mxu0 %v2556_v52  ;;  %v2524_v52 = vor.u32 %v3603_v38, %v2521_v39  ;;  %v3675_v38 = vld [vmem:[%s3942_s29 + $0x254] sm:$0xf]  ;;  %v2809_v39 = vld [vmem:[%s3942_s29 + $0x258] sm:$0xf0] }
  0xa1   : > { %2077 = vmatpush.bf16.msra.mxu1 %v2620_v53  ;;  %v3601_v53 = vld [vmem:[%s3942_s29 + $0x4] sm:$0xf] }
  0xa2   : > { %2090 = vmatpush.bf16.msra.mxu2 %v2684_v54  ;;  %v2513_v54 = vld [vmem:[%s3942_s29 + $0x8] sm:$0xf0] }
  0xa3   : > { %2103 = vmatpush.bf16.msra.mxu3 %v2748_v59  ;;  %v2577_v59 = vld [vmem:[%s3942_s29 + $0x88] sm:$0xf0]  ;;  %v2516_v4 = vor.u32 %v3601_v53, %v2513_v54  ;;  %v2876_v53 = vor.u32 %v3691_v40, %v2873_v44  ;;  %v2940_v54 = vor.u32 %v3707_v47, %v2937_v49  ;;  %v2905_v40 = vld [vmem:[%s3942_s29 + $0x318] sm:$0xf0]  ;;  %v3665_v49 = vld [vmem:[%s3942_s29 + $0x204] sm:$0xf] }
  0xa4   : > { %2065 = vmatpush.bf16.msra.mxu0 %v2548_v1  ;;  %v3679_v1 = vld [vmem:[%s3942_s29 + $0x274] sm:$0xf]  ;;  %v2580_v8 = vor.u32 %v3617_v58, %v2577_v59  ;;  %v2865_v58 = vld [vmem:[%s3942_s29 + $0x2c8] sm:$0xf0]  ;;  %v2969_v44 = vld [vmem:[%s3942_s29 + $0x398] sm:$0xf0] }
  0xa5   : > { %2078 = vmatpush.bf16.msra.mxu1 %v2612_v2  ;;  %v2825_v2 = vld [vmem:[%s3942_s29 + $0x278] sm:$0xf0]  ;;  %v2929_v59 = vld [vmem:[%s3942_s29 + $0x348] sm:$0xf0] }
  0xa6   : > { %2091 = vmatpush.bf16.msra.mxu2 %v2676_v3  ;;  %v3695_v3 = vld [vmem:[%s3942_s29 + $0x2f4] sm:$0xf] }
  0xa7   : > { %2104 = vmatpush.bf16.msra.mxu3 %v2740_v7  ;;  %v2953_v7 = vld [vmem:[%s3942_s29 + $0x378] sm:$0xf0] }
  0xa8   : > { %2066 = vmatpush.bf16.msra.mxu0 %v2540_v13  ;;  %v2828_v13 = vor.u32 %v3679_v1, %v2825_v2  ;;  %v2793_v1 = vld [vmem:[%s3942_s29 + $0x238] sm:$0xf0]  ;;  %v3687_v2 = vld [vmem:[%s3942_s29 + $0x2b4] sm:$0xf] }
  0xa9   : > { %2079 = vmatpush.bf16.msra.mxu1 %v2604_v14  ;;  %v2892_v14 = vor.u32 %v3695_v3, %v2889_v5  ;;  %v3703_v5 = vld [vmem:[%s3942_s29 + $0x334] sm:$0xf] }
  0xaa   : > { %2092 = vmatpush.bf16.msra.mxu2 %v2668_v15  ;;  %v2956_v15 = vor.u32 %v3711_v6, %v2953_v7  ;;  %v2921_v6 = vld [vmem:[%s3942_s29 + $0x338] sm:$0xf0]  ;;  %v3719_v7 = vld [vmem:[%s3942_s29 + $0x3b4] sm:$0xf] }
  0xab   : > { %2105 = vmatpush.bf16.msra.mxu3 %v2732_v19  ;;  %v3020_v19 = vor.u32 %v3727_v10, %v3017_v11  ;;  %v2924_v11 = vor.u32 %v3703_v5, %v2921_v6  ;;  %v3791_v6 = vld [vmem:[%s3942_s29 + $0x5f4] sm:$0xf] }
  0xac   : > { %2067 = vmatpush.bf16.msra.mxu0 %v2532_v35  ;;  %v2820_v35 = vor.u32 %v3677_v16, %v2817_v17  ;;  %v2849_v16 = vld [vmem:[%s3942_s29 + $0x2a8] sm:$0xf0]  ;;  %v3701_v17 = vld [vmem:[%s3942_s29 + $0x324] sm:$0xf] }
  0xad   : > { %2080 = vmatpush.bf16.msra.mxu1 %v2596_v36  ;;  %v2884_v36 = vor.u32 %v3693_v18, %v2881_v21  ;;  %v2913_v18 = vld [vmem:[%s3942_s29 + $0x328] sm:$0xf0] }
  0xae   : > { %2093 = vmatpush.bf16.msra.mxu2 %v2660_v37  ;;  %v2948_v37 = vor.u32 %v3709_v22, %v2945_v23  ;;  %v2977_v21 = vld [vmem:[%s3942_s29 + $0x3a8] sm:$0xf0] }
  0xaf   : > { %2106 = vmatpush.bf16.msra.mxu3 %v2724_v42  ;;  %v3012_v42 = vor.u32 %v3725_v27, %v3009_v31  ;;  %v2916_v27 = vor.u32 %v3701_v17, %v2913_v18  ;;  %v3667_v31 = vld [vmem:[%s3942_s29 + $0x214] sm:$0xf]  ;;  %v3137_v18 = vld [vmem:[%s3942_s29 + $0x4e8] sm:$0xf0] }
  0xb0   : > { %2068 = vmatpush.bf16.msra.mxu0 %v2524_v52  ;;  %v2812_v52 = vor.u32 %v3675_v38, %v2809_v39  ;;  %v2841_v38 = vld [vmem:[%s3942_s29 + $0x298] sm:$0xf0]  ;;  %v3699_v39 = vld [vmem:[%s3942_s29 + $0x314] sm:$0xf] }
  0xb1   : > { %2081 = vmatpush.bf16.msra.mxu1 %v2588_v56  ;;  %v2801_v56 = vld [vmem:[%s3942_s29 + $0x248] sm:$0xf0] }
  0xb2   : > { %2094 = vmatpush.bf16.msra.mxu2 %v2652_v57  ;;  %v3689_v57 = vld [vmem:[%s3942_s29 + $0x2c4] sm:$0xf] }
  0xb3   : > { %2107 = vmatpush.bf16.msra.mxu3 %v2716_v61  ;;  %v2868_v62 = vor.u32 %v3689_v57, %v2865_v58  ;;  %v3713_v58 = vld [vmem:[%s3942_s29 + $0x384] sm:$0xf] }
  0xb4   : > { %2069 = vmatpush.bf16.msra.mxu0 %v2516_v4  ;;  %v2857_v4 = vld [vmem:[%s3942_s29 + $0x2b8] sm:$0xf0] }
  0xb5   : > { %2082 = vmatpush.bf16.msra.mxu1 %v2580_v8  ;;  %v2985_v8 = vld [vmem:[%s3942_s29 + $0x3b8] sm:$0xf0]  ;;  %v2860_v10 = vor.u32 %v3687_v2, %v2857_v4 }
  0xb6   : > { %2095 = vmatpush.bf16.msra.mxu2 %v2644_v9  ;;  %v2796_v9 = vor.u32 %v3671_v0, %v2793_v1  ;;  %v3145_v0 = vld [vmem:[%s3942_s29 + $0x4f8] sm:$0xf0]  ;;  %v3775_v1 = vld [vmem:[%s3942_s29 + $0x574] sm:$0xf] }
  0xb7   : > { %2108 = vmatpush.bf16.msra.mxu3 %v2708_v12  ;;  %2070 = vmatmul.bf16.vlgmr.msra.gmra.mxu0 %v4064_v45  ;;  %v3004_v45 = vor.u32 %v3723_v50, %v3001_v51  ;;  %v3669_v12 = vld [vmem:[%s3942_s29 + $0x224] sm:$0xf]  ;;  %v2769_v50 = vld [vmem:[%s3942_s29 + $0x208] sm:$0xf0]  ;;  %v3209_v2 = vld [vmem:[%s3942_s29 + $0x578] sm:$0xf0] }
  0xb8   : > { %2114 = vmatpush.bf16.msrb.mxu0 %v2828_v13  ;;  %2083 = vmatmul.bf16.vlgmr.msra.gmra.mxu1 %v4066_v46  ;;  %v2993_v46 = vld [vmem:[%s3942_s29 + $0x3c8] sm:$0xf0] }
  0xb9   : > { %2127 = vmatpush.bf16.msrb.mxu1 %v2892_v14  ;;  %2096 = vmatmul.bf16.vlgmr.msra.gmra.mxu2 %v4051_v29  ;;  %v3673_v29 = vld [vmem:[%s3942_s29 + $0x244] sm:$0xf]  ;;  %v2996_v3 = vor.u32 %v3721_v60, %v2993_v46  ;;  %v2785_v13 = vld [vmem:[%s3942_s29 + $0x228] sm:$0xf0]  ;;  %v3081_v60 = vld [vmem:[%s3942_s29 + $0x478] sm:$0xf0] }
  0xba   : > { %2140 = vmatpush.bf16.msrb.mxu2 %v2956_v15  ;;  %2109 = vmatmul.bf16.vlgmr.msra.gmra.mxu3 %v4055_v32  ;;  %v3705_v32 = vld [vmem:[%s3942_s29 + $0x344] sm:$0xf]  ;;  %v2804_v61 = vor.u32 %v3673_v29, %v2801_v56  ;;  %v2988_v15 = vor.u32 %v3719_v7, %v2985_v8  ;;  %v2788_v22 = vor.u32 %v3669_v12, %v2785_v13  ;;  %v3759_v46 = vld [vmem:[%s3942_s29 + $0x4f4] sm:$0xf]  ;;  %v3273_v7 = vld [vmem:[%s3942_s29 + $0x5f8] sm:$0xf0] }
  0xbb   : > { %2153 = vmatpush.bf16.msrb.mxu3 %v3020_v19  ;;  %v2932_v63 = vor.u32 %v3705_v32, %v2929_v59  ;;  %v3685_v14 = vld [vmem:[%s3942_s29 + $0x2a4] sm:$0xf]  ;;  %v2961_v32 = vld [vmem:[%s3942_s29 + $0x388] sm:$0xf0]  ;;  %v3743_v59 = vld [vmem:[%s3942_s29 + $0x474] sm:$0xf]  ;;  %v3148_v12 = vor.u32 %v3759_v46, %v3145_v0  ;;  %v3212_v13 = vor.u32 %v3775_v1, %v3209_v2  ;;  %v3276_v17 = vor.u32 %v3791_v6, %v3273_v7 }
  0xbc   : > { %2115 = vmatpush.bf16.msrb.mxu0 %v2820_v35  ;;  %v3717_v19 = vld [vmem:[%s3942_s29 + $0x3a4] sm:$0xf]  ;;  %v2852_v23 = vor.u32 %v3685_v14, %v2849_v16  ;;  %v2777_v35 = vld [vmem:[%s3942_s29 + $0x218] sm:$0xf0]  ;;  %v2964_v8 = vor.u32 %v3713_v58, %v2961_v32  ;;  %v3121_v58 = vld [vmem:[%s3942_s29 + $0x4c8] sm:$0xf0] }
  0xbd   : > { %2128 = vmatpush.bf16.msrb.mxu1 %v2884_v36  ;;  %v3683_v36 = vld [vmem:[%s3942_s29 + $0x294] sm:$0xf]  ;;  %v2780_v47 = vor.u32 %v3667_v31, %v2777_v35  ;;  %v3697_v29 = vld [vmem:[%s3942_s29 + $0x304] sm:$0xf]  ;;  %v3049_v1 = vld [vmem:[%s3942_s29 + $0x438] sm:$0xf0] }
  0xbe   : > { %2141 = vmatpush.bf16.msrb.mxu2 %v2948_v37  ;;  %v2980_v37 = vor.u32 %v3717_v19, %v2977_v21  ;;  %v2844_v51 = vor.u32 %v3683_v36, %v2841_v38  ;;  %v3741_v14 = vld [vmem:[%s3942_s29 + $0x464] sm:$0xf]  ;;  %v3201_v21 = vld [vmem:[%s3942_s29 + $0x568] sm:$0xf0]  ;;  %v3739_v38 = vld [vmem:[%s3942_s29 + $0x454] sm:$0xf] }
  0xbf   : > { %2154 = vmatpush.bf16.msrb.mxu3 %v3012_v42  ;;  %v3715_v42 = vld [vmem:[%s3942_s29 + $0x394] sm:$0xf]  ;;  %v1876_v56 = vpop.f32.mrf.mxu1  ;;  %v3757_v16 = vld [vmem:[%s3942_s29 + $0x4e4] sm:$0xf]  ;;  %v3177_v6 = vld [vmem:[%s3942_s29 + $0x538] sm:$0xf0] }
  0xc0   : > { %2116 = vmatpush.bf16.msrb.mxu0 %v2812_v52  ;;  %v2908_v52 = vor.u32 %v3699_v39, %v2905_v40  ;;  %v2972_v57 = vor.u32 %v3715_v42, %v2969_v44  ;;  %v3773_v19 = vld [vmem:[%s3942_s29 + $0x564] sm:$0xf]  ;;  %v3140_v36 = vor.u32 %v3757_v16, %v3137_v18  ;;  %v3065_v39 = vld [vmem:[%s3942_s29 + $0x458] sm:$0xf0]  ;;  %v3755_v40 = vld [vmem:[%s3942_s29 + $0x4d4] sm:$0xf] }
  0xc1   : > { %2129 = vmatpush.bf16.msrb.mxu1 %v2876_v53  ;;  %v3681_v53 = vld [vmem:[%s3942_s29 + $0x284] sm:$0xf]  ;;  %v3735_v0 = vld [vmem:[%s3942_s29 + $0x434] sm:$0xf] }
  0xc2   : > { %2142 = vmatpush.bf16.msrb.mxu2 %v2940_v54  ;;  %v2833_v54 = vld [vmem:[%s3942_s29 + $0x288] sm:$0xf0]  ;;  %v3769_v32 = vld [vmem:[%s3942_s29 + $0x544] sm:$0xf]  ;;  %v3751_v2 = vld [vmem:[%s3942_s29 + $0x4b4] sm:$0xf] }
  0xc3   : > { %2155 = vmatpush.bf16.msrb.mxu3 %v3004_v45  ;;  %v2897_v45 = vld [vmem:[%s3942_s29 + $0x308] sm:$0xf0]  ;;  %v2836_v4 = vor.u32 %v3681_v53, %v2833_v54  ;;  %v3257_v53 = vld [vmem:[%s3942_s29 + $0x5d8] sm:$0xf0]  ;;  %v3068_v54 = vor.u32 %v3739_v38, %v3065_v39  ;;  %v3783_v7 = vld [vmem:[%s3942_s29 + $0x5b4] sm:$0xf] }
  0xc4   : > { %2117 = vmatpush.bf16.msrb.mxu0 %v2804_v61  ;;  %v1863_v61 = vpop.f32.mrf.mxu0  ;;  %v2900_v5 = vor.u32 %v3697_v29, %v2897_v45  ;;  %v3749_v16 = vld [vmem:[%s3942_s29 + $0x4a4] sm:$0xf] }
  0xc5   : > { %2130 = vmatpush.bf16.msrb.mxu1 %v2868_v62  ;;  %v1889_v62 = vpop.f32.mrf.mxu2 }
  0xc6   : > { %2143 = vmatpush.bf16.msrb.mxu2 %v2932_v63  ;;  %v2772_v63 = vor.u32 %v3665_v49, %v2769_v50  ;;  %v3129_v49 = vld [vmem:[%s3942_s29 + $0x4d8] sm:$0xf0]  ;;  %v3771_v50 = vld [vmem:[%s3942_s29 + $0x554] sm:$0xf] }
  0xc7   : > { %2156 = vmatpush.bf16.msrb.mxu3 %v2996_v3  ;;  %v1877_v3 = vadd.f32 %v1876_v56, %v1863_v61  ;;  %v1878_v31 = vpop.f32.mrf.mxu1  ;;  %v3132_v29 = vor.u32 %v3755_v40, %v3129_v49 }
  0xc8   : > { %2118 = vmatpush.bf16.msrb.mxu0 %v2796_v9  ;;  %v3084_v9 = vor.u32 %v3743_v59, %v3081_v60  ;;  %v3185_v59 = vld [vmem:[%s3942_s29 + $0x548] sm:$0xf0]  ;;  %v3785_v60 = vld [vmem:[%s3942_s29 + $0x5c4] sm:$0xf] }
  0xc9   : > { %2131 = vmatpush.bf16.msrb.mxu1 %v2860_v10  ;;  %v1890_v10 = vadd.f32 %v1889_v62, %v1877_v3  ;;  %v3781_v31 = vld [vmem:[%s3942_s29 + $0x5a4] sm:$0xf] }
  0xca   : > { %2144 = vmatpush.bf16.msrb.mxu2 %v2924_v11  ;;  %v1902_v11 = vpop.f32.mrf.mxu3 }
  0xcb   : > { %2157 = vmatpush.bf16.msrb.mxu3 %v2988_v15  ;;  %v3073_v15 = vld [vmem:[%s3942_s29 + $0x468] sm:$0xf0] }
  0xcc   : > { %2119 = vmatpush.bf16.msrb.mxu0 %v2788_v22  ;;  %v4403_v22 = vadd.f32 %v1902_v11, %v1890_v10  ;;  %v3076_v35 = vor.u32 %v3741_v14, %v3073_v15  ;;  %v1865_v42 = vpop.f32.mrf.mxu0  ;;  %v3052_v10 = vor.u32 %v3735_v0, %v3049_v1  ;;  %v3733_v14 = vld [vmem:[%s3942_s29 + $0x424] sm:$0xf]  ;;  %v3041_v15 = vld [vmem:[%s3942_s29 + $0x428] sm:$0xf0]  ;;  %v3807_v0 = vld [vmem:[%s3942_s29 + $0x674] sm:$0xf] }
  0xcd   : > { %2132 = vmatpush.bf16.msrb.mxu1 %v2852_v23  ;;  %v3789_v23 = vld [vmem:[%s3942_s29 + $0x5e4] sm:$0xf]  ;;  %v1891_v44 = vpop.f32.mrf.mxu2  ;;  %v3731_v42 = vld [vmem:[%s3942_s29 + $0x414] sm:$0xf]  ;;  %v3337_v1 = vld [vmem:[%s3942_s29 + $0x678] sm:$0xf0] }
  0xce   : > { %2145 = vmatpush.bf16.msrb.mxu2 %v2916_v27  ;;  %v3265_v27 = vld [vmem:[%s3942_s29 + $0x5e8] sm:$0xf0]  ;;  %v3033_v44 = vld [vmem:[%s3942_s29 + $0x418] sm:$0xf0] }
  0xcf   : > { %2158 = vmatpush.bf16.msrb.mxu3 %v2980_v37  ;;  %v3204_v37 = vor.u32 %v3773_v19, %v3201_v21  ;;  %v3105_v21 = vld [vmem:[%s3942_s29 + $0x4a8] sm:$0xf0] }
  0xd0   : > { %2120 = vmatpush.bf16.msrb.mxu0 %v2780_v47  ;;  %v3268_v47 = vor.u32 %v3789_v23, %v3265_v27  ;;  %v3765_v23 = vld [vmem:[%s3942_s29 + $0x524] sm:$0xf]  ;;  %v3169_v27 = vld [vmem:[%s3942_s29 + $0x528] sm:$0xf0]  ;;  %v3108_v39 = vor.u32 %v3749_v16, %v3105_v21 }
  0xd1   : > { %2133 = vmatpush.bf16.msrb.mxu1 %v2844_v51  ;;  %v3193_v51 = vld [vmem:[%s3942_s29 + $0x558] sm:$0xf0]  ;;  %v3172_v40 = vor.u32 %v3765_v23, %v3169_v27  ;;  %v3329_v16 = vld [vmem:[%s3942_s29 + $0x668] sm:$0xf0]  ;;  %v3837_v21 = vld [vmem:[%s3942_s29 + $0x764] sm:$0xf] }
  0xd2   : > { %2146 = vmatpush.bf16.msrb.mxu2 %v2908_v52  ;;  %v3787_v52 = vld [vmem:[%s3942_s29 + $0x5d4] sm:$0xf]  ;;  %v3196_v56 = vor.u32 %v3771_v50, %v3193_v51  ;;  %v3097_v51 = vld [vmem:[%s3942_s29 + $0x498] sm:$0xf0]  ;;  %v3457_v23 = vld [vmem:[%s3942_s29 + $0x768] sm:$0xf0] }
  0xd3   : > { %2159 = vmatpush.bf16.msrb.mxu3 %v2972_v57  ;;  %v3737_v57 = vld [vmem:[%s3942_s29 + $0x444] sm:$0xf]  ;;  %v3260_v45 = vor.u32 %v3787_v52, %v3257_v53  ;;  %v3763_v52 = vld [vmem:[%s3942_s29 + $0x514] sm:$0xf]  ;;  %v3161_v53 = vld [vmem:[%s3942_s29 + $0x518] sm:$0xf0] }
  0xd4   : > { %2121 = vmatpush.bf16.msrb.mxu0 %v2772_v63  ;;  %v3188_v63 = vor.u32 %v3769_v32, %v3185_v59  ;;  %v3089_v32 = vld [vmem:[%s3942_s29 + $0x488] sm:$0xf0]  ;;  %v3761_v59 = vld [vmem:[%s3942_s29 + $0x504] sm:$0xf] }
  0xd5   : > { %2134 = vmatpush.bf16.msrb.mxu1 %v2836_v4  ;;  %v1928_v61 = vpop.f32.mrf.mxu1  ;;  %v3113_v4 = vld [vmem:[%s3942_s29 + $0x4b8] sm:$0xf0]  ;;  %v3853_v27 = vld [vmem:[%s3942_s29 + $0x7e4] sm:$0xf] }
  0xd6   : > { %2147 = vmatpush.bf16.msrb.mxu2 %v2900_v5  ;;  %v3767_v5 = vld [vmem:[%s3942_s29 + $0x534] sm:$0xf] }
  0xd7   : > { %2160 = vmatpush.bf16.msrb.mxu3 %v2964_v8  ;;  %2122 = vmatmul.bf16.vlgmr.msrb.gmra.mxu0 %v4119_v55  ;;  %v3057_v55 = vld [vmem:[%s3942_s29 + $0x448] sm:$0xf0]  ;;  %v3241_v8 = vld [vmem:[%s3942_s29 + $0x5b8] sm:$0xf0] }
  0xd8   : > { %2166 = vmatpush.bf16.msra.mxu0 %v3084_v9  ;;  %2135 = vmatmul.bf16.vlgmr.msrb.gmra.mxu1 %v4113_v48  ;;  %v3249_v48 = vld [vmem:[%s3942_s29 + $0x5c8] sm:$0xf0]  ;;  %v3060_v46 = vor.u32 %v3737_v57, %v3057_v55  ;;  %v1915_v9 = vpop.f32.mrf.mxu0  ;;  %v3244_v18 = vor.u32 %v3783_v7, %v3241_v8  ;;  %v3729_v57 = vld [vmem:[%s3942_s29 + $0x404] sm:$0xf] }
  0xd9   : > { %2179 = vmatpush.bf16.msra.mxu1 %v3148_v12  ;;  %2148 = vmatmul.bf16.vlgmr.msrb.gmra.mxu2 %v4109_v41  ;;  %v1904_v41 = vpop.f32.mrf.mxu3  ;;  %v3252_v3 = vor.u32 %v3785_v60, %v3249_v48  ;;  %v1916_v11 = vadd.f32 %v1915_v9, %v4403_v22  ;;  %v3116_v12 = vor.u32 %v3751_v2, %v3113_v4  ;;  %v3025_v55 = vld [vmem:[%s3942_s29 + $0x408] sm:$0xf0]  ;;  %v3823_v2 = vld [vmem:[%s3942_s29 + $0x6f4] sm:$0xf]  ;;  %v3401_v4 = vld [vmem:[%s3942_s29 + $0x6f8] sm:$0xf0] }
  0xda   : > { %2192 = vmatpush.bf16.msra.mxu2 %v3212_v13  ;;  %2161 = vmatmul.bf16.vlgmr.msrb.gmra.mxu3 %v4111_v43  ;;  %v3753_v43 = vld [vmem:[%s3942_s29 + $0x4c4] sm:$0xf]  ;;  %v3180_v13 = vor.u32 %v3767_v5, %v3177_v6  ;;  %v3225_v41 = vld [vmem:[%s3942_s29 + $0x598] sm:$0xf0]  ;;  %v3839_v5 = vld [vmem:[%s3942_s29 + $0x774] sm:$0xf] }
  0xdb   : > { %2205 = vmatpush.bf16.msra.mxu3 %v3276_v17  ;;  %v3124_v62 = vor.u32 %v3753_v43, %v3121_v58  ;;  %v1929_v19 = vadd.f32 %v1928_v61, %v1916_v11  ;;  %v3745_v58 = vld [vmem:[%s3942_s29 + $0x484] sm:$0xf]  ;;  %v3465_v6 = vld [vmem:[%s3942_s29 + $0x778] sm:$0xf0]  ;;  %v3855_v9 = vld [vmem:[%s3942_s29 + $0x7f4] sm:$0xf] }
  0xdc   : > { %2167 = vmatpush.bf16.msra.mxu0 %v3076_v35  ;;  %v1941_v17 = vpop.f32.mrf.mxu2  ;;  %v3233_v35 = vld [vmem:[%s3942_s29 + $0x5a8] sm:$0xf0]  ;;  %v3777_v61 = vld [vmem:[%s3942_s29 + $0x584] sm:$0xf]  ;;  %v3092_v7 = vor.u32 %v3745_v58, %v3089_v32 }
  0xdd   : > { %2180 = vmatpush.bf16.msra.mxu1 %v3140_v36  ;;  %v3044_v36 = vor.u32 %v3733_v14, %v3041_v15  ;;  %v1930_v38 = vpop.f32.mrf.mxu1  ;;  %v3236_v49 = vor.u32 %v3781_v31, %v3233_v35  ;;  %v3468_v14 = vor.u32 %v3839_v5, %v3465_v6  ;;  %v3805_v15 = vld [vmem:[%s3942_s29 + $0x664] sm:$0xf] }
  0xde   : > { %2193 = vmatpush.bf16.msra.mxu2 %v3204_v37  ;;  %v1942_v37 = vadd.f32 %v1941_v17, %v1929_v19  ;;  %v3821_v17 = vld [vmem:[%s3942_s29 + $0x6e4] sm:$0xf]  ;;  %v3393_v19 = vld [vmem:[%s3942_s29 + $0x6e8] sm:$0xf0]  ;;  %v3332_v31 = vor.u32 %v3805_v15, %v3329_v16  ;;  %v3321_v38 = vld [vmem:[%s3942_s29 + $0x658] sm:$0xf0] }
  0xdf   : > { %2206 = vmatpush.bf16.msra.mxu3 %v3268_v47  ;;  %v3747_v47 = vld [vmem:[%s3942_s29 + $0x494] sm:$0xf]  ;;  %v3396_v35 = vor.u32 %v3821_v17, %v3393_v19  ;;  %v3845_v17 = vld [vmem:[%s3942_s29 + $0x7a4] sm:$0xf] }
  0xe0   : > { %2168 = vmatpush.bf16.msra.mxu0 %v3068_v54  ;;  %v3779_v54 = vld [vmem:[%s3942_s29 + $0x594] sm:$0xf]  ;;  %v3100_v43 = vor.u32 %v3747_v47, %v3097_v51  ;;  %v3449_v47 = vld [vmem:[%s3942_s29 + $0x758] sm:$0xf0] }
  0xe1   : > { %2181 = vmatpush.bf16.msra.mxu1 %v3132_v29  ;;  %v1954_v22 = vpop.f32.mrf.mxu3  ;;  %v1917_v29 = vpop.f32.mrf.mxu0  ;;  %v3228_v48 = vor.u32 %v3779_v54, %v3225_v41  ;;  %v3513_v51 = vld [vmem:[%s3942_s29 + $0x7d8] sm:$0xf0]  ;;  %v3801_v54 = vld [vmem:[%s3942_s29 + $0x644] sm:$0xf]  ;;  %v3313_v41 = vld [vmem:[%s3942_s29 + $0x648] sm:$0xf0] }
  0xe2   : > { %2194 = vmatpush.bf16.msra.mxu2 %v3196_v56  ;;  %v4447_v50 = vadd.f32 %v1954_v22, %v1942_v37  ;;  %v3036_v56 = vor.u32 %v3731_v42, %v3033_v44  ;;  %v3521_v22 = vld [vmem:[%s3942_s29 + $0x7e8] sm:$0xf0]  ;;  %v3803_v37 = vld [vmem:[%s3942_s29 + $0x654] sm:$0xf]  ;;  %v3385_v42 = vld [vmem:[%s3942_s29 + $0x6d8] sm:$0xf0]  ;;  %v3316_v58 = vor.u32 %v3801_v54, %v3313_v41 }
  0xe3   : > { %2207 = vmatpush.bf16.msra.mxu3 %v3260_v45  ;;  %v3164_v45 = vor.u32 %v3763_v52, %v3161_v53  ;;  %v3835_v44 = vld [vmem:[%s3942_s29 + $0x754] sm:$0xf]  ;;  %v3377_v29 = vld [vmem:[%s3942_s29 + $0x6c8] sm:$0xf0]  ;;  %v3809_v54 = vld [vmem:[%s3942_s29 + $0x684] sm:$0xf] }
  0xe4   : > { %2169 = vmatpush.bf16.msra.mxu0 %v3060_v46  ;;  %v1943_v60 = vpop.f32.mrf.mxu2  ;;  %v3153_v46 = vld [vmem:[%s3942_s29 + $0x508] sm:$0xf0]  ;;  %v3452_v53 = vor.u32 %v3835_v44, %v3449_v47  ;;  %v3843_v44 = vld [vmem:[%s3942_s29 + $0x794] sm:$0xf]  ;;  %v3481_v47 = vld [vmem:[%s3942_s29 + $0x798] sm:$0xf0] }
  0xe5   : > { %2182 = vmatpush.bf16.msra.mxu1 %v3124_v62  ;;  %v3217_v62 = vld [vmem:[%s3942_s29 + $0x588] sm:$0xf0]  ;;  %v3156_v8 = vor.u32 %v3761_v59, %v3153_v46  ;;  %v3305_v46 = vld [vmem:[%s3942_s29 + $0x638] sm:$0xf0]  ;;  %v3484_v41 = vor.u32 %v3843_v44, %v3481_v47 }
  0xe6   : > { %2195 = vmatpush.bf16.msra.mxu2 %v3188_v63  ;;  %v3220_v11 = vor.u32 %v3777_v61, %v3217_v62  ;;  %v3815_v61 = vld [vmem:[%s3942_s29 + $0x6b4] sm:$0xf] }
  0xe7   : > { %2208 = vmatpush.bf16.msra.mxu3 %v3252_v3  ;;  %v3028_v3 = vor.u32 %v3729_v57, %v3025_v55  ;;  %v3441_v57 = vld [vmem:[%s3942_s29 + $0x748] sm:$0xf0]  ;;  %v3849_v55 = vld [vmem:[%s3942_s29 + $0x7c4] sm:$0xf] }
  0xe8   : > { %2170 = vmatpush.bf16.msra.mxu0 %v3052_v10  ;;  %v3529_v10 = vld [vmem:[%s3942_s29 + $0x7f8] sm:$0xf0] }
  0xe9   : > { %2183 = vmatpush.bf16.msra.mxu1 %v3116_v12  ;;  %v1956_v63 = vpop.f32.mrf.mxu3  ;;  %v3340_v12 = vor.u32 %v3807_v0, %v3337_v1  ;;  %v3369_v0 = vld [vmem:[%s3942_s29 + $0x6b8] sm:$0xf0]  ;;  %v3831_v1 = vld [vmem:[%s3942_s29 + $0x734] sm:$0xf] }
  0xea   : > { %2196 = vmatpush.bf16.msra.mxu2 %v3180_v13  ;;  %v3404_v13 = vor.u32 %v3823_v2, %v3401_v4  ;;  %v3847_v2 = vld [vmem:[%s3942_s29 + $0x7b4] sm:$0xf]  ;;  %v3372_v5 = vor.u32 %v3815_v61, %v3369_v0 }
  0xeb   : > { %2209 = vmatpush.bf16.msra.mxu3 %v3244_v18  ;;  %v3532_v18 = vor.u32 %v3855_v9, %v3529_v10  ;;  %v3813_v9 = vld [vmem:[%s3942_s29 + $0x6a4] sm:$0xf] }
  0xec   : > { %2171 = vmatpush.bf16.msra.mxu0 %v3044_v36  ;;  %v3460_v36 = vor.u32 %v3837_v21, %v3457_v23 }
  0xed   : > { %2184 = vmatpush.bf16.msra.mxu1 %v3108_v39  ;;  %v3819_v39 = vld [vmem:[%s3942_s29 + $0x6d4] sm:$0xf] }
  0xee   : > { %2197 = vmatpush.bf16.msra.mxu2 %v3172_v40  ;;  %v3524_v40 = vor.u32 %v3853_v27, %v3521_v22  ;;  %v3388_v52 = vor.u32 %v3819_v39, %v3385_v42  ;;  %v3353_v39 = vld [vmem:[%s3942_s29 + $0x698] sm:$0xf0] }
  0xef   : > { %2210 = vmatpush.bf16.msra.mxu3 %v3236_v49  ;;  %v3851_v49 = vld [vmem:[%s3942_s29 + $0x7d4] sm:$0xf]  ;;  %v3417_v42 = vld [vmem:[%s3942_s29 + $0x718] sm:$0xf0] }
  0xf0   : > { %2172 = vmatpush.bf16.msra.mxu0 %v3036_v56  ;;  %v3833_v56 = vld [vmem:[%s3942_s29 + $0x744] sm:$0xf] }
  0xf1   : > { %2185 = vmatpush.bf16.msra.mxu1 %v3100_v43  ;;  %v3505_v43 = vld [vmem:[%s3942_s29 + $0x7c8] sm:$0xf0]  ;;  %v3444_v60 = vor.u32 %v3833_v56, %v3441_v57  ;;  %v3841_v57 = vld [vmem:[%s3942_s29 + $0x784] sm:$0xf] }
  0xf2   : > { %2198 = vmatpush.bf16.msra.mxu2 %v3164_v45  ;;  %v3508_v62 = vor.u32 %v3849_v55, %v3505_v43 }
  0xf3   : > { %2211 = vmatpush.bf16.msra.mxu3 %v3228_v48  ;;  %v3799_v48 = vld [vmem:[%s3942_s29 + $0x634] sm:$0xf] }
  0xf4   : > { %2173 = vmatpush.bf16.msra.mxu0 %v3028_v3  ;;  %v3497_v3 = vld [vmem:[%s3942_s29 + $0x7b8] sm:$0xf0]  ;;  %v3308_v4 = vor.u32 %v3799_v48, %v3305_v46 }
  0xf5   : > { %2186 = vmatpush.bf16.msra.mxu1 %v3092_v7  ;;  %v1980_v32 = vpop.f32.mrf.mxu1  ;;  %v3797_v7 = vld [vmem:[%s3942_s29 + $0x624] sm:$0xf]  ;;  %v3500_v10 = vor.u32 %v3847_v2, %v3497_v3 }
  0xf6   : > { %2199 = vmatpush.bf16.msra.mxu2 %v3156_v8  ;;  %v3297_v8 = vld [vmem:[%s3942_s29 + $0x628] sm:$0xf0] }
  0xf7   : > { %2212 = vmatpush.bf16.msra.mxu3 %v3220_v11  ;;  %2174 = vmatmul.bf16.vlgmr.msra.gmra.mxu0 %v4180_v24  ;;  %v3324_v24 = vor.u32 %v3803_v37, %v3321_v38  ;;  %v3300_v21 = vor.u32 %v3797_v7, %v3297_v8  ;;  %v3811_v37 = vld [vmem:[%s3942_s29 + $0x694] sm:$0xf] }
  0xf8   : > { %2218 = vmatpush.bf16.msrb.mxu0 %v3340_v12  ;;  %2187 = vmatmul.bf16.vlgmr.msra.gmra.mxu1 %v4187_v30  ;;  %v3516_v30 = vor.u32 %v3851_v49, %v3513_v51  ;;  %v3361_v12 = vld [vmem:[%s3942_s29 + $0x6a8] sm:$0xf0]  ;;  %v3356_v51 = vor.u32 %v3811_v37, %v3353_v39 }
  0xf9   : > { %2231 = vmatpush.bf16.msrb.mxu1 %v3404_v13  ;;  %2200 = vmatmul.bf16.vlgmr.msra.gmra.mxu2 %v4185_v28  ;;  %v3817_v28 = vld [vmem:[%s3942_s29 + $0x6c4] sm:$0xf]  ;;  %v3364_v22 = vor.u32 %v3813_v9, %v3361_v12 }
  0xfa   : > { %2244 = vmatpush.bf16.msrb.mxu2 %v3468_v14  ;;  %2213 = vmatmul.bf16.vlgmr.msra.gmra.mxu3 %v4191_v34  ;;  %v1967_v34 = vpop.f32.mrf.mxu0  ;;  %v3380_v59 = vor.u32 %v3817_v28, %v3377_v29  ;;  %v3829_v13 = vld [vmem:[%s3942_s29 + $0x724] sm:$0xf]  ;;  %v3425_v14 = vld [vmem:[%s3942_s29 + $0x728] sm:$0xf0] }
  0xfb   : > { %2257 = vmatpush.bf16.msrb.mxu3 %v3532_v18  ;;  %v1968_v45 = vadd.f32 %v1967_v34, %v4447_v50  ;;  %v3433_v50 = vld [vmem:[%s3942_s29 + $0x738] sm:$0xf0]  ;;  %v3489_v18 = vld [vmem:[%s3942_s29 + $0x7a8] sm:$0xf0] }
  0xfc   : > { %2219 = vmatpush.bf16.msrb.mxu0 %v3332_v31  ;;  %v3436_v6 = vor.u32 %v3831_v1, %v3433_v50  ;;  %v1993_v11 = vpop.f32.mrf.mxu2  ;;  %v3428_v31 = vor.u32 %v3829_v13, %v3425_v14  ;;  %v3492_v38 = vor.u32 %v3845_v17, %v3489_v18  ;;  %v3345_v28 = vld [vmem:[%s3942_s29 + $0x688] sm:$0xf0] }
  0xfd   : > { %2232 = vmatpush.bf16.msrb.mxu1 %v3396_v35  ;;  %v1981_v63 = vadd.f32 %v1980_v32, %v1968_v45  ;;  %v2006_v16 = vpop.f32.mrf.mxu3  ;;  %v1982_v23 = vpop.f32.mrf.mxu1  ;;  %v3795_v35 = vld [vmem:[%s3942_s29 + $0x614] sm:$0xf]  ;;  %v3409_v29 = vld [vmem:[%s3942_s29 + $0x708] sm:$0xf0]  ;;  %v3348_v45 = vor.u32 %v3809_v54, %v3345_v28 }
  0xfe   : > { %2245 = vmatpush.bf16.msrb.mxu2 %v3460_v36  ;;  %v3289_v36 = vld [vmem:[%s3942_s29 + $0x618] sm:$0xf0]  ;;  %v3473_v34 = vld [vmem:[%s3942_s29 + $0x788] sm:$0xf0] }
  0xff   : > { %2258 = vmatpush.bf16.msrb.mxu3 %v3524_v40  ;;  %v1994_v15 = vadd.f32 %v1993_v11, %v1981_v63  ;;  %v3827_v40 = vld [vmem:[%s3942_s29 + $0x714] sm:$0xf]  ;;  %v3292_v49 = vor.u32 %v3795_v35, %v3289_v36  ;;  %v3476_v32 = vor.u32 %v3841_v57, %v3473_v34  ;;  %v242_v57 = vld [vmem:[#allocation2] sm:$0xff] }
 0x100   : > { %2220 = vmatpush.bf16.msrb.mxu0 %v3324_v24  ;;  %v3420_v24 = vor.u32 %v3827_v40, %v3417_v42 }
 0x101   : > { %2233 = vmatpush.bf16.msrb.mxu1 %v3388_v52  ;;  %v2007_v27 = vadd.f32 %v2006_v16, %v1994_v15  ;;  %v3793_v52 = vld [vmem:[%s3942_s29 + $0x604] sm:$0xf] }
 0x102   : > { %2246 = vmatpush.bf16.msrb.mxu2 %v3452_v53  ;;  %v1969_v19 = vpop.f32.mrf.mxu0  ;;  %v3281_v53 = vld [vmem:[%s3942_s29 + $0x608] sm:$0xf0] }
 0x103   : > { %2259 = vmatpush.bf16.msrb.mxu3 %v3516_v30  ;;  %v3825_v30 = vld [vmem:[%s3942_s29 + $0x704] sm:$0xf]  ;;  %v3284_v43 = vor.u32 %v3793_v52, %v3281_v53 }
 0x104   : > { %2221 = vmatpush.bf16.msrb.mxu0 %v3316_v58  ;;  %v1995_v56 = vpop.f32.mrf.mxu2  ;;  %v3412_v58 = vor.u32 %v3825_v30, %v3409_v29 }
 0x105   : > { %2234 = vmatpush.bf16.msrb.mxu1 %v3380_v59  ;;  %v2008_v55 = vpop.f32.mrf.mxu3 }
 0x106   : > { %2247 = vmatpush.bf16.msrb.mxu2 %v3444_v60 }
 0x107   : > { %2260 = vmatpush.bf16.msrb.mxu3 %v3508_v62 }
 0x108   : > { %2222 = vmatpush.bf16.msrb.mxu0 %v3308_v4 }
 0x109   : > { %2235 = vmatpush.bf16.msrb.mxu1 %v3372_v5 }
 0x10a   : > { %2248 = vmatpush.bf16.msrb.mxu2 %v3436_v6 }
 0x10b   : > { %2261 = vmatpush.bf16.msrb.mxu3 %v3500_v10 }
 0x10c   : > { %2223 = vmatpush.bf16.msrb.mxu0 %v3300_v21 }
 0x10d   : > { %2236 = vmatpush.bf16.msrb.mxu1 %v3364_v22 }
 0x10e   : > { %2249 = vmatpush.bf16.msrb.mxu2 %v3428_v31 }
 0x10f   : > { %2262 = vmatpush.bf16.msrb.mxu3 %v3492_v38 }
 0x110   : > { %2224 = vmatpush.bf16.msrb.mxu0 %v3292_v49 }
 0x111   : > { %2237 = vmatpush.bf16.msrb.mxu1 %v3356_v51 }
 0x112   : > { %2250 = vmatpush.bf16.msrb.mxu2 %v3420_v24 }
 0x113   : > { %2263 = vmatpush.bf16.msrb.mxu3 %v3484_v41 }
 0x114   : > { %2225 = vmatpush.bf16.msrb.mxu0 %v3284_v43  ;;  %v2019_v59 = vpop.f32.mrf.mxu0 }
 0x115   : > { %2238 = vmatpush.bf16.msrb.mxu1 %v3348_v45  ;;  %v2020_v60 = vadd.f32 %v2019_v59, %v2007_v27  ;;  %v2032_v48 = vpop.f32.mrf.mxu1 }
 0x116   : > { %2251 = vmatpush.bf16.msrb.mxu2 %v3412_v58 }
 0x117   : > { %2264 = vmatpush.bf16.msrb.mxu3 %v3476_v32  ;;  %2226 = vmatmul.bf16.vlgmr.msrb.gmra.mxu0 %v4256_v20  ;;  %v2033_v46 = vadd.f32 %v2032_v48, %v2020_v60 }
 0x118   : > { %2239 = vmatmul.bf16.vlgmr.msrb.gmra.mxu1 %v4263_v26 }
 0x119   : > { %2252 = vmatmul.bf16.vlgmr.msrb.gmra.mxu2 %v4261_v25 }
 0x11a   : > { %2265 = vmatmul.bf16.vlgmr.msrb.gmra.mxu3 %v4267_v33 }
 0x11c   : > { %v2045_v61 = vpop.f32.mrf.mxu2  ;;  %v2021_v0 = vpop.f32.mrf.mxu0 }
 0x11d   : > { %v2046_v62 = vadd.f32 %v2045_v61, %v2033_v46  ;;  %v2058_v63 = vpop.f32.mrf.mxu3  ;;  %v2034_v1 = vpop.f32.mrf.mxu1 }
 0x11f   : > { %v2059_v50 = vadd.f32 %v2058_v63, %v2046_v62 }
 0x124   : > { %v2047_v2 = vpop.f32.mrf.mxu2 }
 0x125   : > { %v2060_v3 = vpop.f32.mrf.mxu3 }
 0x134   : > { %v2071_v4 = vpop.f32.mrf.mxu0 }
 0x135   : > { %v2084_v20 = vpop.f32.mrf.mxu1 }
 0x136   : > { %v2085_v5 = vadd.f32 %v2084_v20, %v2071_v4 }
 0x13c   : > { %v2097_v26 = vpop.f32.mrf.mxu2  ;;  %v2073_v33 = vpop.f32.mrf.mxu0 }
 0x13d   : > { %v2098_v6 = vadd.f32 %v2097_v26, %v2085_v5  ;;  %v2110_v25 = vpop.f32.mrf.mxu3  ;;  %v2086_v8 = vpop.f32.mrf.mxu1 }
 0x13f   : > { %v2111_v7 = vadd.f32 %v2110_v25, %v2098_v6 }
 0x144   : > { %v2099_v9 = vpop.f32.mrf.mxu2 }
 0x145   : > { %v2112_v10 = vpop.f32.mrf.mxu3 }
 0x154   : > { %v2123_v11 = vpop.f32.mrf.mxu0 }
 0x155   : > { %v2136_v12 = vpop.f32.mrf.mxu1  ;;  %v2124_v23 = vadd.f32 %v2123_v11, %v2111_v7 }
 0x157   : > { %v2137_v35 = vadd.f32 %v2136_v12, %v2124_v23 }
 0x15c   : > { %v2149_v13 = vpop.f32.mrf.mxu2  ;;  %v2125_v15 = vpop.f32.mrf.mxu0 }
 0x15d   : > { %v2162_v14 = vpop.f32.mrf.mxu3  ;;  %v2138_v16 = vpop.f32.mrf.mxu1  ;;  %v2150_v37 = vadd.f32 %v2149_v13, %v2137_v35 }
 0x15f   : > { %v2163_v40 = vadd.f32 %v2162_v14, %v2150_v37 }
 0x164   : > { %v2151_v17 = vpop.f32.mrf.mxu2 }
 0x165   : > { %v2164_v18 = vpop.f32.mrf.mxu3 }
 0x174   : > { %v2175_v19 = vpop.f32.mrf.mxu0 }
 0x175   : > { %v2188_v21 = vpop.f32.mrf.mxu1  ;;  %v2176_v42 = vadd.f32 %v2175_v19, %v2163_v40 }
 0x177   : > { %v2189_v44 = vadd.f32 %v2188_v21, %v2176_v42 }
 0x17c   : > { %v2201_v27 = vpop.f32.mrf.mxu2  ;;  %v2177_v31 = vpop.f32.mrf.mxu0 }
 0x17d   : > { %v2214_v22 = vpop.f32.mrf.mxu3  ;;  %v2190_v36 = vpop.f32.mrf.mxu1  ;;  %v2202_v47 = vadd.f32 %v2201_v27, %v2189_v44 }
 0x17f   : > { %v2215_v49 = vadd.f32 %v2214_v22, %v2202_v47 }
 0x184   : > { %v2203_v38 = vpop.f32.mrf.mxu2 }
 0x185   : > { %v2216_v39 = vpop.f32.mrf.mxu3 }
 0x194   : > { %v2227_v51 = vpop.f32.mrf.mxu0 }
 0x195   : > { %v2240_v24 = vpop.f32.mrf.mxu1  ;;  %v2228_v52 = vadd.f32 %v2227_v51, %v2215_v49 }
 0x197   : > { %v2241_v53 = vadd.f32 %v2240_v24, %v2228_v52 }
 0x19c   : > { %v2253_v54 = vpop.f32.mrf.mxu2  ;;  %v2229_v30 = vpop.f32.mrf.mxu0 }
 0x19d   : > { %v2254_v41 = vadd.f32 %v2253_v54, %v2241_v53  ;;  %v2266_v28 = vpop.f32.mrf.mxu3  ;;  %v2242_v29 = vpop.f32.mrf.mxu1 }
 0x19f   : > { %v2267_v56 = vadd.f32 %v2266_v28, %v2254_v41 }
 0x1a1   : > { %v2272_v34 = vrot.slane %v2267_v56, 4 }
 0x1a2   : > { %2281 = sbr.rel (%p3533_p6) target bundleno = 590 (0x24e), region = 48 }
 0x1a3   : > { %v2274_v55 = vsel %vm2273_vm0, %v2059_v50, %v2272_v34 }
 0x1a4   : > { %v2276_v43 = vadd.f32 %v2274_v55, %v242_v57  ;;  %v2255_v45 = vpop.f32.mrf.mxu2 }
 0x1a5   : > { %v2268_v58 = vpop.f32.mrf.mxu3 }
 0x1a6   : > { %2277 = vst [vmem:[#allocation2] sm:$0xff] %v2276_v43 }
 0x1a7   : > { %v3864_v32 = vld [vmem:[%s4601_s3 + $0x38] sm:$0xff]  ;;  %v3863_v60 = vld [vmem:[%s4601_s3 + $0x30] sm:$0xff]  ;;  %v2283_v46 = vld [vmem:[%s4600_s2] sm:$0x3] }
 0x1a8   : > { %v3872_v59 = vld [vmem:[%s4601_s3 + $0x78] sm:$0xff]  ;;  %2432 = vmatpush.bf16.msra.mxu0 %v3864_v32  ;;  %v3871_v48 = vld [vmem:[%s4601_s3 + $0x70] sm:$0xff]  ;;  %v3862_v61 = vld [vmem:[%s4601_s3 + $0x28] sm:$0xff]  ;;  %v2285_v63 = vperm.slane %v2283_v46, 0  ;;  %v2286_v0 = vperm.slane %v2283_v46, 1 }
 0x1a9   : > { %2445 = vmatpush.bf16.msra.mxu1 %v3872_v59  ;;  %v3870_v62 = vld [vmem:[%s4601_s3 + $0x68] sm:$0xff]  ;;  %v3861_v2 = vld [vmem:[%s4601_s3 + $0x20] sm:$0xff]  ;;  %v3860_v26 = vld [vmem:[%s4601_s3 + $0x18] sm:$0xff] }
 0x1aa   : > { %v2287_v50 = vrot.slane %v2286_v0, 4  ;;  %v3869_v3 = vld [vmem:[%s4601_s3 + $0x60] sm:$0xff]  ;;  %v3868_v6 = vld [vmem:[%s4601_s3 + $0x58] sm:$0xff]  ;;  %v3859_v25 = vld [vmem:[%s4601_s3 + $0x10] sm:$0xff] }
 0x1ab   : > { %v3867_v7 = vld [vmem:[%s4601_s3 + $0x50] sm:$0xff]  ;;  %v3858_v33 = vld [vmem:[%s4601_s3 + $0x8] sm:$0xff]  ;;  %v3857_v9 = vld [vmem:[%s4601_s3] sm:$0xff] }
 0x1ac   : > { %2433 = vmatpush.bf16.msra.mxu0 %v3863_v60  ;;  %v2288_v4 = vsel %vm2273_vm0, %v2285_v63, %v2287_v50  ;;  %v3866_v8 = vld [vmem:[%s4601_s3 + $0x48] sm:$0xff]  ;;  %v3865_v10 = vld [vmem:[%s4601_s3 + $0x40] sm:$0xff] }
 0x1ad   : > { %2446 = vmatpush.bf16.msra.mxu1 %v3871_v48  ;;  %v2282_v1 = vld [vmem:[#allocation2] sm:$0xff]  ;;  %v3882_v15 = vld [vmem:[%s4602_s4] ss:$0 sm:$0xff] }
 0x1ae   : > { %v2290_v20 = vadd.f32 %v2288_v4, %v2282_v1 }
 0x1b0   : > { %2434 = vmatpush.bf16.msra.mxu0 %v3862_v61  ;;  %v2291_v5 = vmax.f32 %v2290_v20, 0.0 }
 0x1b1   : > { %2447 = vmatpush.bf16.msra.mxu1 %v3870_v62 }
 0x1b2   : > { %2293 = vst [vmem:[#allocation1] ss:$2 sm:$0xff] %v2291_v5 }
 0x1b4   : > { %2435 = vmatpush.bf16.msra.mxu0 %v3861_v2 }
 0x1b5   : > { %2448 = vmatpush.bf16.msra.mxu1 %v3869_v3 }
 0x1b8   : > { %2436 = vmatpush.bf16.msra.mxu0 %v3860_v26 }
 0x1b9   : > { %2449 = vmatpush.bf16.msra.mxu1 %v3868_v6  ;;  %v2294_v11 = vld.sshfl [vmem:[#allocation1] sm:$0xff pattern:$0x75316420]  ;;  %v2295_v12 = vld.sshfl [vmem:[#allocation1 + $0x8] sm:$0xff pattern:$0x75316420] }
 0x1ba   : > { %v2298_v13 = vpack.c.bf16 %v2294_v11, %v2294_v11  ;;  %v2299_v14 = vpack.c.bf16 %v2295_v12, %v2295_v12 }
 0x1bc   : > { %2437 = vmatpush.bf16.msra.mxu0 %v3859_v25 }
 0x1bd   : > { %2450 = vmatpush.bf16.msra.mxu1 %v3867_v7 }
 0x1c0   : > { %2438 = vmatpush.bf16.msra.mxu0 %v3858_v33 }
 0x1c1   : > { %2451 = vmatpush.bf16.msra.mxu1 %v3866_v8 }
 0x1c4   : > { %2439 = vmatpush.bf16.msra.mxu0 %v3857_v9 }
 0x1c5   : > { %2452 = vmatpush.bf16.msra.mxu1 %v3865_v10 }
 0x1c7   : > { %2440 = vmatmul.bf16.vlgmr.msra.gmra.mxu0 %v2298_v13 }
 0x1c8   : > { %2453 = vmatmul.bf16.vlgmr.msra.gmra.mxu1 %v2299_v14 }
 0x244   : > { %v2441_v16 = vpop.f32.mrf.mxu0 }
 0x245   : > { %v2454_v17 = vpop.f32.mrf.mxu1  ;;  %v2442_v18 = vadd.f32 %v3882_v15, %v2441_v16 }
 0x247   : > { %v2455_v19 = vadd.f32 %v2454_v17, %v2442_v18 }
 0x249   : > { %2458 = vst [vmem:[%s4603_s5] sm:$0xf] %v2455_v19 }
 0x24c   : > { %v2443_v21 = vpop.f32.mrf.mxu0 }
 0x24d   : > { %v2456_v23 = vpop.f32.mrf.mxu1 }
 0x24e PF: > { %s15_s18 = sadd.s32 1, %s3889_s18  }
 0x24f   : > { %p12_p7 = scmp.ge.s32.totalorder %s15_s18, 6  }
 0x251   :  { %14 = sbr.rel (!%p12_p7) target bundleno = 1 (0x1), region = 80 }

</bundles_post_ra>
